<compile_context>
chip_gen: v7x
topology: tpu7x:2x2x1
jax: 0.10.0
libtpu: 0.0.40
codegen_flags: <defaults>
</compile_context>

<pallas_src>
import math
import functools

import numpy as np
import jax
import jax.numpy as jnp
from jax import lax
from jax.experimental import pallas as pl
from jax.experimental.pallas import tpu as pltpu

_F32 = jnp.float32
_INV_SQRT2 = 0.7071067811865476

_WEIGHT_ORDER = ('w_attn', 'wo', 'bo2', 'w_ff1', 'w_ff2', 'bn_w', 'bn_b')


def _gelu_exact(x):
    # nn.GELU() default (exact, erf-based)
    return 0.5 * x * (1.0 + lax.erf(x * _INV_SQRT2))


def _complex_bn(xr, xi, bn_w, bn_b, a_small, b_small, eps):
    """ComplexBatchNorm1d with batch-only statistics (per (seq, feature)).

    a_small: (S, M) batch-averaging matrix; b_small: (M, S) broadcast-back.
    xr, xi: (M, D) real / imag activations.
    """
    mr = jnp.dot(a_small, xr, preferred_element_type=_F32)        # (S, D)
    mi = jnp.dot(a_small, xi, preferred_element_type=_F32)
    cr = xr - jnp.dot(b_small, mr, preferred_element_type=_F32)   # centered
    ci = xi - jnp.dot(b_small, mi, preferred_element_type=_F32)
    crr = jnp.dot(a_small, cr * cr, preferred_element_type=_F32) + eps
    cii = jnp.dot(a_small, ci * ci, preferred_element_type=_F32) + eps
    cri = jnp.dot(a_small, cr * ci, preferred_element_type=_F32)
    det = jnp.maximum(crr * cii - cri * cri, 1e-20)                # clamp: can round < 0
    s = jnp.sqrt(det)
    t = jnp.sqrt(cii + crr + 2.0 * s)
    inv_st = 1.0 / jnp.maximum(s * t, 1e-20)
    rrr = (cii + s) * inv_st
    rii = (crr + s) * inv_st
    rri = -cri * inv_st
    rrr_b = jnp.dot(b_small, rrr, preferred_element_type=_F32)     # (M, D)
    rii_b = jnp.dot(b_small, rii, preferred_element_type=_F32)
    rri_b = jnp.dot(b_small, rri, preferred_element_type=_F32)
    nr = rrr_b * cr + rri_b * ci
    ni = rii_b * ci + rri_b * cr
    yr = bn_w[0:1, :] * nr + bn_w[2:3, :] * ni + bn_b[0:1, :]
    yi = bn_w[2:3, :] * nr + bn_w[1:2, :] * ni + bn_b[1:2, :]
    return yr, yi


def _encoder_kernel(x_ref, a_ref, b_ref, pool_ref, sel_ref,
                    wattn_ref, wo_ref, bo2_ref, wff1_ref, wff2_ref,
                    bnw_ref, bnb_ref, y_ref,
                    *, bs, S, D, d_k, d_v, L, r, scale, eps):
    M = bs * S
    B2 = 2 * bs
    layer = pl.program_id(0)

    @pl.when(layer == 0)
    def _():
        y_ref[...] = x_ref[...]          # y_ref doubles as the layer carry

    x = y_ref[...]                       # (2M, D): rows [real (M) ; imag (M)]
    sel = sel_ref[...]                   # (2M, 2) part selector (for fused biases)
    a_small = a_ref[...]                 # (S, M)
    b_small = b_ref[...]                 # (M, S)
    bn_w = bnw_ref[0]                    # (3, D)
    bn_b = bnb_ref[0]                    # (2, D)

    def make_aug(xs):
        # [xs | swap(xs) | sel] with swap = [-imag ; real]; one complex Linear
        # then becomes a single matmul against host-stacked [W_r ; W_i ; biases].
        xswap = jnp.concatenate([-xs[M:], xs[:M]], axis=0)
        return jnp.concatenate([xs, xswap, sel], axis=1)

    # --------------- complex multi-head (n_heads = 1) attention ---------------
    # One matmul yields [Q | K | V] for real and imag rows at once.  The K/V
    # columns already contain the pre-pool complex combine, and V's columns are
    # permuted host-side so the transpose(1,2).view grouping falls out for free.
    qkv = jnp.dot(make_aug(x), wattn_ref[0], preferred_element_type=_F32)  # (2M, 2dk+dv)
    qkv3 = qkv.reshape(B2, S, 2 * d_k + d_v)
    q3 = qkv3[:, :, :d_k]                        # (B2, S, dk): [Qr batches ; Qi batches]
    kv3 = qkv3[:, :, d_k:]                       # (B2, S, dk+dv) pre-pool combined

    # per-batch AvgPool1d over the sequence dimension
    pool_b = jnp.broadcast_to(pool_ref[...], (B2, L, S))
    kvp3 = jnp.einsum('bls,bsw->blw', pool_b, kv3, preferred_element_type=_F32)
    kp3 = kvp3[:, :, :d_k]                       # (B2, L, dk): [Kr ; Ki]
    vp3 = kvp3[:, :, d_k:]                       # (B2, L, dv): [Vr ; Vi] (pi-permuted)

    # scores for all four (q-part, k-part) combinations, per batch, no mask
    kp3_swap = jnp.concatenate([kp3[bs:], kp3[:bs]], axis=0)
    s_same = jnp.einsum('bqd,bkd->bqk', q3, kp3,
                        preferred_element_type=_F32) * scale      # [qr.kr ; qi.ki]
    s_cross = jnp.einsum('bqd,bkd->bqk', q3, kp3_swap,
                         preferred_element_type=_F32) * scale     # [qr.ki ; qi.kr]

    def _softmax(sc):
        m = jnp.max(sc, axis=-1, keepdims=True)
        e = jnp.exp(sc - m)
        return e / jnp.sum(e, axis=-1, keepdims=True)

    sm_same = _softmax(s_same)                   # [A1 ; A4]
    sm_cross = _softmax(s_cross)                 # [A2 ; A3]
    a_p = sm_same[:bs] - sm_same[bs:]            # P = A1 - A4
    a_q = sm_cross[:bs] + sm_cross[bs:]          # Q = A2 + A3
    a_pack = jnp.concatenate([a_p, a_q], axis=0)               # (B2, S, L)

    # attention output computed directly transposed: (B2, dv, S)
    vp3_swap = jnp.concatenate([vp3[bs:], vp3[:bs]], axis=0)
    o1t = jnp.einsum('blv,bql->bvq', vp3, a_pack, preferred_element_type=_F32)
    o2t = jnp.einsum('blv,bql->bvq', vp3_swap, a_pack, preferred_element_type=_F32)
    out_r_t = o1t[:bs] - o1t[bs:]                # (P@Vr - Q@Vi)^T
    out_i_t = o2t[:bs] + o2t[bs:]                # (Q@Vr + P@Vi)^T
    ct = jnp.concatenate([out_r_t, out_i_t], axis=0)           # (B2, dv, S)

    # transpose(1,2).contiguous().view + to_out folded as:
    #   out2[b,u,m] = sum_j sum_i ct[b, j*S+u, i] * Wo[j*S+i, m]
    wo = wo_ref[0]                                              # (dv, D)
    out2 = jnp.einsum('bui,im->bum', ct[:, 0:S, :], wo[0:S, :],
                      preferred_element_type=_F32)
    for j in range(1, r):
        out2 = out2 + jnp.einsum('bui,im->bum',
                                 ct[:, j * S:(j + 1) * S, :],
                                 wo[j * S:(j + 1) * S, :],
                                 preferred_element_type=_F32)
    t = out2.reshape(2 * M, D)
    s2r = t[:M] - t[M:]                  # to_out(real) - to_out(imag) (bias cancels)
    s2i = t[:M] + t[M:] + bo2_ref[0]     # to_out(real) + to_out(imag) (bias doubles)

    # residual + ComplexBatchNorm1d
    yr, yi = _complex_bn(x[:M] + s2r, x[M:] + s2i, bn_w, bn_b, a_small, b_small, eps)
    xs1 = jnp.concatenate([yr, yi], axis=0)                     # (2M, D)

    # --------------- complex position-wise feed-forward ---------------
    h = jnp.dot(make_aug(xs1), wff1_ref[0], preferred_element_type=_F32)   # (2M, d_ff)
    g = _gelu_exact(h)
    f = jnp.dot(make_aug(g), wff2_ref[0], preferred_element_type=_F32)     # (2M, D)
    res = xs1 + f
    yr2, yi2 = _complex_bn(res[:M], res[M:], bn_w, bn_b, a_small, b_small, eps)
    y_ref[...] = jnp.concatenate([yr2, yi2], axis=0)


# ----------------------------------------------------------------------------
# Wrapper
# ----------------------------------------------------------------------------
def tst_encoder_forward(src_real, src_imag, stacked, consts, *, bs, S, D,
                        d_k, d_v, d_ff, L, n_layers, scale, eps=1e-5):
    del d_ff  # shapes carried by the stacked weights
    assert d_v % S == 0
    M = bs * S
    r = d_v // S
    x0 = jnp.concatenate([src_real.reshape(M, D), src_imag.reshape(M, D)], axis=0)
    pool, a_small, b_small, sel = consts

    def cspec(arr):
        return pl.BlockSpec(arr.shape, lambda l: (0,) * arr.ndim)

    def wspec(arr):      # stacked per-layer weights: (n_layers, a, b)
        return pl.BlockSpec((1,) + tuple(arr.shape[1:]),
                            lambda l: (l,) + (0,) * (arr.ndim - 1))

    kern = functools.partial(_encoder_kernel, bs=bs, S=S, D=D, d_k=d_k,
                             d_v=d_v, L=L, r=r, scale=scale, eps=eps)

    y = pl.pallas_call(
        kern,
        out_shape=jax.ShapeDtypeStruct((2 * M, D), _F32),
        grid=(n_layers,),
        in_specs=[cspec(x0), cspec(a_small), cspec(b_small), cspec(pool),
                  cspec(sel)] + [wspec(stacked[k]) for k in _WEIGHT_ORDER],
        out_specs=pl.BlockSpec((2 * M, D), lambda l: (0, 0)),
        compiler_params=pltpu.CompilerParams(
            dimension_semantics=("arbitrary",),
            vmem_limit_bytes=32 * 1024 * 1024),
    )(x0, a_small, b_small, pool, sel,
      *[stacked[k] for k in _WEIGHT_ORDER])

    return y[:M].reshape(bs, S, D), y[M:].reshape(bs, S, D)


# ----------------------------------------------------------------------------
# Host-side constants (pooling / batch-mean / part-selector matrices)
# ----------------------------------------------------------------------------
def build_constants(bs, S, L, kernel_size, stride):
    M = bs * S
    pool = np.zeros((L, S), np.float32)              # per-batch AvgPool1d matrix
    for l in range(L):
        pool[l, l * stride:l * stride + kernel_size] = 1.0 / kernel_size
    a_small = np.zeros((S, M), np.float32)           # batch-mean pooling
    b_small = np.zeros((M, S), np.float32)           # broadcast back over batch
    for b in range(bs):
        for s in range(S):
            a_small[s, b * S + s] = 1.0 / bs
            b_small[b * S + s, s] = 1.0
    sel = np.zeros((2 * M, 2), np.float32)           # real/imag row selector
    sel[:M, 0] = 1.0
    sel[M:, 1] = 1.0
    return (jnp.asarray(pool), jnp.asarray(a_small), jnp.asarray(b_small),
            jnp.asarray(sel))


# ----------------------------------------------------------------------------
# Deterministic parameter init (shapes per the module __init__) and folding
# ----------------------------------------------------------------------------
def _init_linear(key, din, dout):
    k1, k2 = jax.random.split(key)
    bound = 1.0 / math.sqrt(din)
    w = jax.random.uniform(k1, (din, dout), _F32, -bound, bound)  # stored [in, out]
    b = jax.random.uniform(k2, (1, dout), _F32, -bound, bound)
    return w, b


def init_params(key, n_layers, d_model, d_ff, n_heads):
    d_k = d_model // n_heads
    d_v = d_model // n_heads
    sqrt2 = 1.4142135623730951
    layers = []
    for lk in jax.random.split(key, n_layers):
        ks = jax.random.split(lk, 11)
        p = {}
        p['wq_r'], p['bq_r'] = _init_linear(ks[0], d_model, d_k)   # W_Q
        p['wq_i'], p['bq_i'] = _init_linear(ks[1], d_model, d_k)   # W_Qimag
        p['wk_r'], p['bk_r'] = _init_linear(ks[2], d_model, d_k)   # W_K
        p['wk_i'], p['bk_i'] = _init_linear(ks[3], d_model, d_k)   # W_Kimag
        p['wv_r'], p['bv_r'] = _init_linear(ks[4], d_model, d_v)   # W_V
        p['wv_i'], p['bv_i'] = _init_linear(ks[5], d_model, d_v)   # W_Vimag
        p['wo'],   p['bo']   = _init_linear(ks[6], d_v, d_model)   # to_out
        p['w1'],   p['b1']   = _init_linear(ks[7], d_model, d_ff)  # Linear1
        p['w1f'],  p['b1f']  = _init_linear(ks[8], d_model, d_ff)  # Linear1_fu
        p['w2'],   p['b2']   = _init_linear(ks[9], d_ff, d_model)  # Linear2
        p['w2f'],  p['b2f']  = _init_linear(ks[10], d_ff, d_model) # Linear2_fu
        p['bn_w'] = jnp.stack([jnp.full((d_model,), sqrt2, _F32),
                               jnp.full((d_model,), sqrt2, _F32),
                               jnp.zeros((d_model,), _F32)], axis=0)   # (3, D)
        p['bn_b'] = jnp.zeros((2, d_model), _F32)
        layers.append(p)
    return layers


def _cplx_rows(w_r, w_i, b_r, b_i):
    # complex Linear as one matmul against [x | swap(x) | sel]
    return jnp.concatenate([w_r, w_i, b_r - b_i, b_r + b_i], axis=0)


def _cplx_prepool_rows(w_r, w_i, b_r, b_i):
    # also folds the post-projection complex combine feeding AvgPool:
    #   pool_real = real1 - imag1 ; pool_imag = real1 + imag1
    return jnp.concatenate([w_r - w_i, w_r + w_i, -2.0 * b_i, 2.0 * b_r], axis=0)


def stack_params(layer_params, S):
    d_v = layer_params[0]['wv_r'].shape[1]
    r = d_v // S
    # new V column j*S+u holds original feature u*r+j (transpose(1,2).view grouping)
    perm = np.array([(c % S) * r + (c // S) for c in range(d_v)], np.int32)
    per_layer = []
    for p in layer_params:
        q_blk = _cplx_rows(p['wq_r'], p['wq_i'], p['bq_r'], p['bq_i'])
        k_blk = _cplx_prepool_rows(p['wk_r'], p['wk_i'], p['bk_r'], p['bk_i'])
        v_blk = _cplx_prepool_rows(p['wv_r'], p['wv_i'], p['bv_r'], p['bv_i'])[:, perm]
        per_layer.append(dict(
            w_attn=jnp.concatenate([q_blk, k_blk, v_blk], axis=1),
            wo=p['wo'],
            bo2=2.0 * p['bo'],
            w_ff1=_cplx_rows(p['w1'], p['w1f'], p['b1'], p['b1f']),
            w_ff2=_cplx_rows(p['w2'], p['w2f'], p['b2'], p['b2f']),
            bn_w=p['bn_w'],
            bn_b=p['bn_b'],
        ))
    return {k: jnp.stack([lp[k] for lp in per_layer], axis=0) for k in _WEIGHT_ORDER}


if __name__ == "__main__":
    # TSTEncoder(kernel_size=2, stride=2, q_len=8, d_model=16, n_heads=1,
    #            d_ff=32, n_layers=2)  -- n_heads must be 1 (see notes above).
    bs, q_len, d_model, n_heads, d_ff = 4, 8, 16, 1, 32
    kernel_size, stride, n_layers = 2, 2, 2
    d_k = d_v = d_model // n_heads
    L = (q_len - kernel_size) // stride + 1

    assert n_heads == 1, "reference module only type-checks with n_heads=1"
    # TODO(synk): fused transpose(1,2).view handling assumes d_v % q_len == 0.
    assert d_v % q_len == 0

    key = jax.random.PRNGKey(0)
    k_r, k_i, k_p = jax.random.split(key, 3)
    src_real = jax.random.normal(k_r, (bs, q_len, d_model), _F32)
    src_imag = jax.random.normal(k_i, (bs, q_len, d_model), _F32)

    layer_params = init_params(k_p, n_layers, d_model, d_ff, n_heads)
    stacked = stack_params(layer_params, q_len)
    consts = build_constants(bs, q_len, L, kernel_size, stride)
    scale = float(d_k ** -0.5)

    out_r, out_i = tst_encoder_forward(src_real, src_imag, stacked, consts,
                                       bs=bs, S=q_len, D=d_model, d_k=d_k,
                                       d_v=d_v, d_ff=d_ff, L=L,
                                       n_layers=n_layers, scale=scale)
    jax.block_until_ready((out_r, out_i))

    assert out_r.shape == (bs, q_len, d_model)
    assert out_i.shape == (bs, q_len, d_model)
    assert bool(jnp.all(jnp.isfinite(out_r))) and bool(jnp.all(jnp.isfinite(out_i)))
    print("KERNEL_OK")
</pallas_src>

<mosaic_0001>
module attributes {stable_mosaic.version = 11 : i64} {
  func.func @_encoder_kernel(%arg0: i32, %arg1: memref<64x16xf32, #tpu.memory_space<vmem>>, %arg2: memref<8x32xf32, #tpu.memory_space<vmem>>, %arg3: memref<32x8xf32, #tpu.memory_space<vmem>>, %arg4: memref<4x8xf32, #tpu.memory_space<vmem>>, %arg5: memref<64x2xf32, #tpu.memory_space<vmem>>, %arg6: memref<1x34x48xf32, #tpu.memory_space<vmem>>, %arg7: memref<1x16x16xf32, #tpu.memory_space<vmem>>, %arg8: memref<1x1x16xf32, #tpu.memory_space<vmem>>, %arg9: memref<1x34x32xf32, #tpu.memory_space<vmem>>, %arg10: memref<1x66x16xf32, #tpu.memory_space<vmem>>, %arg11: memref<1x3x16xf32, #tpu.memory_space<vmem>>, %arg12: memref<1x2x16xf32, #tpu.memory_space<vmem>>, %arg13: memref<64x16xf32, #tpu.memory_space<vmem>>) attributes {dimension_semantics = [#tpu.dimension_semantics<arbitrary>], iteration_bounds = array<i64: 2>, scalar_prefetch = 0 : i64, scratch_operands = 0 : i64, tpu.core_type = #tpu.core_type<tc>, window_params = [{pipeline_mode = #tpu.pipeline_mode<synchronous>, transform_indices = @transform_0, window_bounds = array<i64: 64, 16>}, {pipeline_mode = #tpu.pipeline_mode<synchronous>, transform_indices = @transform_1, window_bounds = array<i64: 8, 32>}, {pipeline_mode = #tpu.pipeline_mode<synchronous>, transform_indices = @transform_2, window_bounds = array<i64: 32, 8>}, {pipeline_mode = #tpu.pipeline_mode<synchronous>, transform_indices = @transform_3, window_bounds = array<i64: 4, 8>}, {pipeline_mode = #tpu.pipeline_mode<synchronous>, transform_indices = @transform_4, window_bounds = array<i64: 64, 2>}, {transform_indices = @transform_5, window_bounds = array<i64: 1, 34, 48>}, {transform_indices = @transform_6, window_bounds = array<i64: 1, 16, 16>}, {transform_indices = @transform_7, window_bounds = array<i64: 1, 1, 16>}, {transform_indices = @transform_8, window_bounds = array<i64: 1, 34, 32>}, {transform_indices = @transform_9, window_bounds = array<i64: 1, 66, 16>}, {transform_indices = @transform_10, window_bounds = array<i64: 1, 3, 16>}, {transform_indices = @transform_11, window_bounds = array<i64: 1, 2, 16>}, {pipeline_mode = #tpu.pipeline_mode<synchronous>, transform_indices = @transform_12, window_bounds = array<i64: 64, 16>}]} {
    %c0_i32 = arith.constant 0 : i32
    %0 = arith.cmpi eq, %arg0, %c0_i32 : i32
    %1 = arith.extui %0 : i1 to i32
    %c0_i32_0 = arith.constant 0 : i32
    %2 = arith.cmpi ne, %1, %c0_i32_0 : i32
    scf.if %2 {
      %c0_88 = arith.constant 0 : index
      %c0_89 = arith.constant 0 : index
      %267 = vector.load %arg1[%c0_88, %c0_89] : memref<64x16xf32, #tpu.memory_space<vmem>>, vector<64x16xf32>
      %c0_90 = arith.constant 0 : index
      %c0_91 = arith.constant 0 : index
      %268 = vector.load %arg13[%c0_90, %c0_91] : memref<64x16xf32, #tpu.memory_space<vmem>>, vector<64x16xf32>
      tpu.vector_store %arg13[%c0_90, %c0_91], %267 {strides = array<i32>} : memref<64x16xf32, #tpu.memory_space<vmem>>, vector<64x16xf32>,
    } else {
    }
    %c0 = arith.constant 0 : index
    %c0_1 = arith.constant 0 : index
    %3 = vector.load %arg13[%c0, %c0_1] : memref<64x16xf32, #tpu.memory_space<vmem>>, vector<64x16xf32>
    %c0_2 = arith.constant 0 : index
    %c0_3 = arith.constant 0 : index
    %4 = vector.load %arg5[%c0_2, %c0_3] : memref<64x2xf32, #tpu.memory_space<vmem>>, vector<64x2xf32>
    %c0_4 = arith.constant 0 : index
    %c0_5 = arith.constant 0 : index
    %5 = vector.load %arg2[%c0_4, %c0_5] : memref<8x32xf32, #tpu.memory_space<vmem>>, vector<8x32xf32>
    %c0_6 = arith.constant 0 : index
    %c0_7 = arith.constant 0 : index
    %6 = vector.load %arg3[%c0_6, %c0_7] : memref<32x8xf32, #tpu.memory_space<vmem>>, vector<32x8xf32>
    %c0_8 = arith.constant 0 : index
    %c0_9 = arith.constant 0 : index
    %c0_10 = arith.constant 0 : index
    %7 = vector.load %arg11[%c0_8, %c0_9, %c0_10] : memref<1x3x16xf32, #tpu.memory_space<vmem>>, vector<1x3x16xf32>
    %8 = vector.shape_cast %7 : vector<1x3x16xf32> to vector<3x16xf32>
    %c0_11 = arith.constant 0 : index
    %c0_12 = arith.constant 0 : index
    %c0_13 = arith.constant 0 : index
    %9 = vector.load %arg12[%c0_11, %c0_12, %c0_13] : memref<1x2x16xf32, #tpu.memory_space<vmem>>, vector<1x2x16xf32>
    %10 = vector.shape_cast %9 : vector<1x2x16xf32> to vector<2x16xf32>
    %11 = vector.extract_strided_slice %3 {offsets = [32, 0], sizes = [32, 16], strides = [1, 1]} : vector<64x16xf32> to vector<32x16xf32>
    %cst = arith.constant 0.000000e+00 : f32
    %12 = vector.broadcast %cst : f32 to vector<32x16xf32>
    %13 = arith.subf %12, %11 : vector<32x16xf32>
    %14 = vector.extract_strided_slice %3 {offsets = [0, 0], sizes = [32, 16], strides = [1, 1]} : vector<64x16xf32> to vector<32x16xf32>
    %15 = tpu.concatenate %13, %14 in 0 : vector<32x16xf32>, vector<32x16xf32> -> vector<64x16xf32>
    %16 = tpu.concatenate %3, %15, %4 in 1 : vector<64x16xf32>, vector<64x16xf32>, vector<64x2xf32> -> vector<64x34xf32>
    %c0_14 = arith.constant 0 : index
    %c0_15 = arith.constant 0 : index
    %c0_16 = arith.constant 0 : index
    %17 = vector.load %arg6[%c0_14, %c0_15, %c0_16] : memref<1x34x48xf32, #tpu.memory_space<vmem>>, vector<1x34x48xf32>
    %18 = vector.shape_cast %17 : vector<1x34x48xf32> to vector<34x48xf32>
    %cst_17 = arith.constant dense<0.000000e+00> : vector<64x48xf32>
    %19 = tpu.matmul %16, %18, %cst_17 {dimension_numbers = #tpu.dot_dimension_numbers<[1], [0], [0], [1], [0, 0, 1, 1], [], []>} : vector<64x34xf32>, vector<34x48xf32>, vector<64x48xf32> -> vector<64x48xf32>
    %20 = vector.shape_cast %19 : vector<64x48xf32> to vector<8x8x48xf32>
    %21 = vector.extract_strided_slice %20 {offsets = [0, 0, 0], sizes = [8, 8, 16], strides = [1, 1, 1]} : vector<8x8x48xf32> to vector<8x8x16xf32>
    %22 = vector.extract_strided_slice %20 {offsets = [0, 0, 16], sizes = [8, 8, 32], strides = [1, 1, 1]} : vector<8x8x48xf32> to vector<8x8x32xf32>
    %c0_18 = arith.constant 0 : index
    %c0_19 = arith.constant 0 : index
    %23 = vector.load %arg4[%c0_18, %c0_19] : memref<4x8xf32, #tpu.memory_space<vmem>>, vector<4x8xf32>
    %24 = vector.shape_cast %23 : vector<4x8xf32> to vector<1x4x8xf32>
    %25 = vector.broadcast %24 : vector<1x4x8xf32> to vector<8x4x8xf32>
    "tpu.trace_start"() <{level = 10 : i32, message = "bls,bsw->blw"}> : () -> ()
    %cst_20 = arith.constant dense<0.000000e+00> : vector<8x4x32xf32>
    %26 = tpu.matmul %25, %22, %cst_20 {dimension_numbers = #tpu.dot_dimension_numbers<[2], [1], [1], [2], [0, 0, 0, 1, 1, 2], [0], [0]>} : vector<8x4x8xf32>, vector<8x8x32xf32>, vector<8x4x32xf32> -> vector<8x4x32xf32>
    "tpu.trace_stop"() : () -> ()
    %27 = vector.extract_strided_slice %26 {offsets = [0, 0, 0], sizes = [8, 4, 16], strides = [1, 1, 1]} : vector<8x4x32xf32> to vector<8x4x16xf32>
    %28 = vector.extract_strided_slice %26 {offsets = [0, 0, 16], sizes = [8, 4, 16], strides = [1, 1, 1]} : vector<8x4x32xf32> to vector<8x4x16xf32>
    %29 = vector.extract_strided_slice %27 {offsets = [4, 0, 0], sizes = [4, 4, 16], strides = [1, 1, 1]} : vector<8x4x16xf32> to vector<4x4x16xf32>
    %30 = vector.extract_strided_slice %27 {offsets = [0, 0, 0], sizes = [4, 4, 16], strides = [1, 1, 1]} : vector<8x4x16xf32> to vector<4x4x16xf32>
    %31 = tpu.concatenate %29, %30 in 0 : vector<4x4x16xf32>, vector<4x4x16xf32> -> vector<8x4x16xf32>
    "tpu.trace_start"() <{level = 10 : i32, message = "bqd,bkd->bqk"}> : () -> ()
    %cst_21 = arith.constant dense<0.000000e+00> : vector<8x8x4xf32>
    %32 = tpu.matmul %21, %27, %cst_21 {dimension_numbers = #tpu.dot_dimension_numbers<[2], [2], [1], [1], [0, 0, 0, 1, 1, 1], [0], [0]>} : vector<8x8x16xf32>, vector<8x4x16xf32>, vector<8x8x4xf32> -> vector<8x8x4xf32>
    "tpu.trace_stop"() : () -> ()
    %cst_22 = arith.constant 2.500000e-01 : f32
    %33 = vector.broadcast %cst_22 : f32 to vector<8x8x4xf32>
    %34 = arith.mulf %32, %33 : vector<8x8x4xf32>
    "tpu.trace_start"() <{level = 10 : i32, message = "bqd,bkd->bqk"}> : () -> ()
    %cst_23 = arith.constant dense<0.000000e+00> : vector<8x8x4xf32>
    %35 = tpu.matmul %21, %31, %cst_23 {dimension_numbers = #tpu.dot_dimension_numbers<[2], [2], [1], [1], [0, 0, 0, 1, 1, 1], [0], [0]>} : vector<8x8x16xf32>, vector<8x4x16xf32>, vector<8x8x4xf32> -> vector<8x8x4xf32>
    "tpu.trace_stop"() : () -> ()
    %cst_24 = arith.constant 2.500000e-01 : f32
    %36 = vector.broadcast %cst_24 : f32 to vector<8x8x4xf32>
    %37 = arith.mulf %35, %36 : vector<8x8x4xf32>
    %cst_25 = arith.constant dense<0xFF800000> : vector<8x8xf32>
    %38 = vector.multi_reduction <maximumf>, %34, %cst_25 [2] : vector<8x8x4xf32> to vector<8x8xf32>
    %39 = vector.shape_cast %38 : vector<8x8xf32> to vector<8x8x1xf32>
    %40 = vector.broadcast %39 : vector<8x8x1xf32> to vector<8x8x4xf32>
    %41 = arith.subf %34, %40 : vector<8x8x4xf32>
    %42 = math.exp %41 : vector<8x8x4xf32>
    %cst_26 = arith.constant dense<0.000000e+00> : vector<8x8xf32>
    %43 = vector.multi_reduction <add>, %42, %cst_26 [2] : vector<8x8x4xf32> to vector<8x8xf32>
    %44 = vector.shape_cast %43 : vector<8x8xf32> to vector<8x8x1xf32>
    %45 = vector.broadcast %44 : vector<8x8x1xf32> to vector<8x8x4xf32>
    %46 = arith.divf %42, %45 : vector<8x8x4xf32>
    %cst_27 = arith.constant dense<0xFF800000> : vector<8x8xf32>
    %47 = vector.multi_reduction <maximumf>, %37, %cst_27 [2] : vector<8x8x4xf32> to vector<8x8xf32>
    %48 = vector.shape_cast %47 : vector<8x8xf32> to vector<8x8x1xf32>
    %49 = vector.broadcast %48 : vector<8x8x1xf32> to vector<8x8x4xf32>
    %50 = arith.subf %37, %49 : vector<8x8x4xf32>
    %51 = math.exp %50 : vector<8x8x4xf32>
    %cst_28 = arith.constant dense<0.000000e+00> : vector<8x8xf32>
    %52 = vector.multi_reduction <add>, %51, %cst_28 [2] : vector<8x8x4xf32> to vector<8x8xf32>
    %53 = vector.shape_cast %52 : vector<8x8xf32> to vector<8x8x1xf32>
    %54 = vector.broadcast %53 : vector<8x8x1xf32> to vector<8x8x4xf32>
    %55 = arith.divf %51, %54 : vector<8x8x4xf32>
    %56 = vector.extract_strided_slice %46 {offsets = [0, 0, 0], sizes = [4, 8, 4], strides = [1, 1, 1]} : vector<8x8x4xf32> to vector<4x8x4xf32>
    %57 = vector.extract_strided_slice %46 {offsets = [4, 0, 0], sizes = [4, 8, 4], strides = [1, 1, 1]} : vector<8x8x4xf32> to vector<4x8x4xf32>
    %58 = arith.subf %56, %57 : vector<4x8x4xf32>
    %59 = vector.extract_strided_slice %55 {offsets = [0, 0, 0], sizes = [4, 8, 4], strides = [1, 1, 1]} : vector<8x8x4xf32> to vector<4x8x4xf32>
    %60 = vector.extract_strided_slice %55 {offsets = [4, 0, 0], sizes = [4, 8, 4], strides = [1, 1, 1]} : vector<8x8x4xf32> to vector<4x8x4xf32>
    %61 = arith.addf %59, %60 : vector<4x8x4xf32>
    %62 = tpu.concatenate %58, %61 in 0 : vector<4x8x4xf32>, vector<4x8x4xf32> -> vector<8x8x4xf32>
    %63 = vector.extract_strided_slice %28 {offsets = [4, 0, 0], sizes = [4, 4, 16], strides = [1, 1, 1]} : vector<8x4x16xf32> to vector<4x4x16xf32>
    %64 = vector.extract_strided_slice %28 {offsets = [0, 0, 0], sizes = [4, 4, 16], strides = [1, 1, 1]} : vector<8x4x16xf32> to vector<4x4x16xf32>
    %65 = tpu.concatenate %63, %64 in 0 : vector<4x4x16xf32>, vector<4x4x16xf32> -> vector<8x4x16xf32>
    "tpu.trace_start"() <{level = 10 : i32, message = "blv,bql->bvq"}> : () -> ()
    %cst_29 = arith.constant dense<0.000000e+00> : vector<8x16x8xf32>
    %66 = tpu.matmul %28, %62, %cst_29 {dimension_numbers = #tpu.dot_dimension_numbers<[1], [2], [2], [1], [0, 0, 0, 2, 1, 1], [0], [0]>} : vector<8x4x16xf32>, vector<8x8x4xf32>, vector<8x16x8xf32> -> vector<8x16x8xf32>
    %cst_30 = arith.constant dense<0.000000e+00> : vector<8x16x8xf32>
    %67 = tpu.matmul %65, %62, %cst_30 {dimension_numbers = #tpu.dot_dimension_numbers<[1], [2], [2], [1], [0, 0, 0, 2, 1, 1], [0], [0]>} : vector<8x4x16xf32>, vector<8x8x4xf32>, vector<8x16x8xf32> -> vector<8x16x8xf32>
    "tpu.trace_stop"() : () -> ()
    %68 = vector.extract_strided_slice %66 {offsets = [0, 0, 0], sizes = [4, 16, 8], strides = [1, 1, 1]} : vector<8x16x8xf32> to vector<4x16x8xf32>
    %69 = vector.extract_strided_slice %66 {offsets = [4, 0, 0], sizes = [4, 16, 8], strides = [1, 1, 1]} : vector<8x16x8xf32> to vector<4x16x8xf32>
    %70 = arith.subf %68, %69 : vector<4x16x8xf32>
    %71 = vector.extract_strided_slice %67 {offsets = [0, 0, 0], sizes = [4, 16, 8], strides = [1, 1, 1]} : vector<8x16x8xf32> to vector<4x16x8xf32>
    %72 = vector.extract_strided_slice %67 {offsets = [4, 0, 0], sizes = [4, 16, 8], strides = [1, 1, 1]} : vector<8x16x8xf32> to vector<4x16x8xf32>
    %73 = arith.addf %71, %72 : vector<4x16x8xf32>
    %74 = tpu.concatenate %70, %73 in 0 : vector<4x16x8xf32>, vector<4x16x8xf32> -> vector<8x16x8xf32>
    %c0_31 = arith.constant 0 : index
    %c0_32 = arith.constant 0 : index
    %c0_33 = arith.constant 0 : index
    %75 = vector.load %arg7[%c0_31, %c0_32, %c0_33] : memref<1x16x16xf32, #tpu.memory_space<vmem>>, vector<1x16x16xf32>
    %76 = vector.shape_cast %75 : vector<1x16x16xf32> to vector<16x16xf32>
    %77 = vector.extract_strided_slice %74 {offsets = [0, 0, 0], sizes = [8, 8, 8], strides = [1, 1, 1]} : vector<8x16x8xf32> to vector<8x8x8xf32>
    %78 = vector.extract_strided_slice %76 {offsets = [0, 0], sizes = [8, 16], strides = [1, 1]} : vector<16x16xf32> to vector<8x16xf32>
    "tpu.trace_start"() <{level = 10 : i32, message = "bui,im->bum"}> : () -> ()
    %cst_34 = arith.constant dense<0.000000e+00> : vector<8x8x16xf32>
    %79 = tpu.matmul %77, %78, %cst_34 {dimension_numbers = #tpu.dot_dimension_numbers<[2], [0], [0, 1], [1], [0, 0, 0, 1, 1, 1], [], []>} : vector<8x8x8xf32>, vector<8x16xf32>, vector<8x8x16xf32> -> vector<8x8x16xf32>
    "tpu.trace_stop"() : () -> ()
    %80 = vector.extract_strided_slice %74 {offsets = [0, 8, 0], sizes = [8, 8, 8], strides = [1, 1, 1]} : vector<8x16x8xf32> to vector<8x8x8xf32>
    %81 = vector.extract_strided_slice %76 {offsets = [8, 0], sizes = [8, 16], strides = [1, 1]} : vector<16x16xf32> to vector<8x16xf32>
    "tpu.trace_start"() <{level = 10 : i32, message = "bui,im->bum"}> : () -> ()
    %cst_35 = arith.constant dense<0.000000e+00> : vector<8x8x16xf32>
    %82 = tpu.matmul %80, %81, %cst_35 {dimension_numbers = #tpu.dot_dimension_numbers<[2], [0], [0, 1], [1], [0, 0, 0, 1, 1, 1], [], []>} : vector<8x8x8xf32>, vector<8x16xf32>, vector<8x8x16xf32> -> vector<8x8x16xf32>
    "tpu.trace_stop"() : () -> ()
    %83 = arith.addf %79, %82 : vector<8x8x16xf32>
    %84 = vector.shape_cast %83 : vector<8x8x16xf32> to vector<64x16xf32>
    %85 = vector.extract_strided_slice %84 {offsets = [0, 0], sizes = [32, 16], strides = [1, 1]} : vector<64x16xf32> to vector<32x16xf32>
    %86 = vector.extract_strided_slice %84 {offsets = [32, 0], sizes = [32, 16], strides = [1, 1]} : vector<64x16xf32> to vector<32x16xf32>
    %87 = arith.subf %85, %86 : vector<32x16xf32>
    %88 = vector.extract_strided_slice %84 {offsets = [0, 0], sizes = [32, 16], strides = [1, 1]} : vector<64x16xf32> to vector<32x16xf32>
    %89 = vector.extract_strided_slice %84 {offsets = [32, 0], sizes = [32, 16], strides = [1, 1]} : vector<64x16xf32> to vector<32x16xf32>
    %90 = arith.addf %88, %89 : vector<32x16xf32>
    %c0_36 = arith.constant 0 : index
    %c0_37 = arith.constant 0 : index
    %c0_38 = arith.constant 0 : index
    %91 = vector.load %arg8[%c0_36, %c0_37, %c0_38] : memref<1x1x16xf32, #tpu.memory_space<vmem>>, vector<1x1x16xf32>
    %92 = vector.shape_cast %91 : vector<1x1x16xf32> to vector<1x16xf32>
    %93 = vector.broadcast %92 : vector<1x16xf32> to vector<32x16xf32>
    %94 = arith.addf %90, %93 : vector<32x16xf32>
    %95 = vector.extract_strided_slice %3 {offsets = [0, 0], sizes = [32, 16], strides = [1, 1]} : vector<64x16xf32> to vector<32x16xf32>
    %96 = arith.addf %95, %87 : vector<32x16xf32>
    %97 = vector.extract_strided_slice %3 {offsets = [32, 0], sizes = [32, 16], strides = [1, 1]} : vector<64x16xf32> to vector<32x16xf32>
    %98 = arith.addf %97, %94 : vector<32x16xf32>
    %cst_39 = arith.constant dense<0.000000e+00> : vector<8x16xf32>
    %99 = tpu.matmul %5, %96, %cst_39 {dimension_numbers = #tpu.dot_dimension_numbers<[1], [0], [0], [1], [0, 0, 1, 1], [], []>} : vector<8x32xf32>, vector<32x16xf32>, vector<8x16xf32> -> vector<8x16xf32>
    %cst_40 = arith.constant dense<0.000000e+00> : vector<8x16xf32>
    %100 = tpu.matmul %5, %98, %cst_40 {dimension_numbers = #tpu.dot_dimension_numbers<[1], [0], [0], [1], [0, 0, 1, 1], [], []>} : vector<8x32xf32>, vector<32x16xf32>, vector<8x16xf32> -> vector<8x16xf32>
    %cst_41 = arith.constant dense<0.000000e+00> : vector<32x16xf32>
    %101 = tpu.matmul %6, %99, %cst_41 {dimension_numbers = #tpu.dot_dimension_numbers<[1], [0], [0], [1], [0, 0, 1, 1], [], []>} : vector<32x8xf32>, vector<8x16xf32>, vector<32x16xf32> -> vector<32x16xf32>
    %102 = arith.subf %96, %101 : vector<32x16xf32>
    %cst_42 = arith.constant dense<0.000000e+00> : vector<32x16xf32>
    %103 = tpu.matmul %6, %100, %cst_42 {dimension_numbers = #tpu.dot_dimension_numbers<[1], [0], [0], [1], [0, 0, 1, 1], [], []>} : vector<32x8xf32>, vector<8x16xf32>, vector<32x16xf32> -> vector<32x16xf32>
    %104 = arith.subf %98, %103 : vector<32x16xf32>
    %105 = arith.mulf %102, %102 : vector<32x16xf32>
    %cst_43 = arith.constant dense<0.000000e+00> : vector<8x16xf32>
    %106 = tpu.matmul %5, %105, %cst_43 {dimension_numbers = #tpu.dot_dimension_numbers<[1], [0], [0], [1], [0, 0, 1, 1], [], []>} : vector<8x32xf32>, vector<32x16xf32>, vector<8x16xf32> -> vector<8x16xf32>
    %cst_44 = arith.constant 9.99999974E-6 : f32
    %107 = vector.broadcast %cst_44 : f32 to vector<8x16xf32>
    %108 = arith.addf %106, %107 : vector<8x16xf32>
    %109 = arith.mulf %104, %104 : vector<32x16xf32>
    %cst_45 = arith.constant dense<0.000000e+00> : vector<8x16xf32>
    %110 = tpu.matmul %5, %109, %cst_45 {dimension_numbers = #tpu.dot_dimension_numbers<[1], [0], [0], [1], [0, 0, 1, 1], [], []>} : vector<8x32xf32>, vector<32x16xf32>, vector<8x16xf32> -> vector<8x16xf32>
    %cst_46 = arith.constant 9.99999974E-6 : f32
    %111 = vector.broadcast %cst_46 : f32 to vector<8x16xf32>
    %112 = arith.addf %110, %111 : vector<8x16xf32>
    %113 = arith.mulf %102, %104 : vector<32x16xf32>
    %cst_47 = arith.constant dense<0.000000e+00> : vector<8x16xf32>
    %114 = tpu.matmul %5, %113, %cst_47 {dimension_numbers = #tpu.dot_dimension_numbers<[1], [0], [0], [1], [0, 0, 1, 1], [], []>} : vector<8x32xf32>, vector<32x16xf32>, vector<8x16xf32> -> vector<8x16xf32>
    %115 = arith.mulf %108, %112 : vector<8x16xf32>
    %116 = arith.mulf %114, %114 : vector<8x16xf32>
    %117 = arith.subf %115, %116 : vector<8x16xf32>
    %cst_48 = arith.constant 9.99999968E-21 : f32
    %118 = vector.broadcast %cst_48 : f32 to vector<8x16xf32>
    %119 = arith.maximumf %117, %118 : vector<8x16xf32>
    %120 = math.sqrt %119 : vector<8x16xf32>
    %121 = arith.addf %112, %108 : vector<8x16xf32>
    %cst_49 = arith.constant 2.000000e+00 : f32
    %122 = vector.broadcast %cst_49 : f32 to vector<8x16xf32>
    %123 = arith.mulf %122, %120 : vector<8x16xf32>
    %124 = arith.addf %121, %123 : vector<8x16xf32>
    %125 = math.sqrt %124 : vector<8x16xf32>
    %126 = arith.mulf %120, %125 : vector<8x16xf32>
    %cst_50 = arith.constant 9.99999968E-21 : f32
    %127 = vector.broadcast %cst_50 : f32 to vector<8x16xf32>
    %128 = arith.maximumf %126, %127 : vector<8x16xf32>
    %cst_51 = arith.constant 1.000000e+00 : f32
    %129 = vector.broadcast %cst_51 : f32 to vector<8x16xf32>
    %130 = arith.divf %129, %128 : vector<8x16xf32>
    %131 = arith.addf %112, %120 : vector<8x16xf32>
    %132 = arith.mulf %131, %130 : vector<8x16xf32>
    %133 = arith.addf %108, %120 : vector<8x16xf32>
    %134 = arith.mulf %133, %130 : vector<8x16xf32>
    %cst_52 = arith.constant 0.000000e+00 : f32
    %135 = vector.broadcast %cst_52 : f32 to vector<8x16xf32>
    %136 = arith.subf %135, %114 : vector<8x16xf32>
    %137 = arith.mulf %136, %130 : vector<8x16xf32>
    %cst_53 = arith.constant dense<0.000000e+00> : vector<32x16xf32>
    %138 = tpu.matmul %6, %132, %cst_53 {dimension_numbers = #tpu.dot_dimension_numbers<[1], [0], [0], [1], [0, 0, 1, 1], [], []>} : vector<32x8xf32>, vector<8x16xf32>, vector<32x16xf32> -> vector<32x16xf32>
    %cst_54 = arith.constant dense<0.000000e+00> : vector<32x16xf32>
    %139 = tpu.matmul %6, %134, %cst_54 {dimension_numbers = #tpu.dot_dimension_numbers<[1], [0], [0], [1], [0, 0, 1, 1], [], []>} : vector<32x8xf32>, vector<8x16xf32>, vector<32x16xf32> -> vector<32x16xf32>
    %cst_55 = arith.constant dense<0.000000e+00> : vector<32x16xf32>
    %140 = tpu.matmul %6, %137, %cst_55 {dimension_numbers = #tpu.dot_dimension_numbers<[1], [0], [0], [1], [0, 0, 1, 1], [], []>} : vector<32x8xf32>, vector<8x16xf32>, vector<32x16xf32> -> vector<32x16xf32>
    %141 = arith.mulf %138, %102 : vector<32x16xf32>
    %142 = arith.mulf %140, %104 : vector<32x16xf32>
    %143 = arith.addf %141, %142 : vector<32x16xf32>
    %144 = arith.mulf %139, %104 : vector<32x16xf32>
    %145 = arith.mulf %140, %102 : vector<32x16xf32>
    %146 = arith.addf %144, %145 : vector<32x16xf32>
    %147 = vector.extract_strided_slice %8 {offsets = [0, 0], sizes = [1, 16], strides = [1, 1]} : vector<3x16xf32> to vector<1x16xf32>
    %148 = vector.broadcast %147 : vector<1x16xf32> to vector<32x16xf32>
    %149 = arith.mulf %148, %143 : vector<32x16xf32>
    %150 = vector.extract_strided_slice %8 {offsets = [2, 0], sizes = [1, 16], strides = [1, 1]} : vector<3x16xf32> to vector<1x16xf32>
    %151 = vector.broadcast %150 : vector<1x16xf32> to vector<32x16xf32>
    %152 = arith.mulf %151, %146 : vector<32x16xf32>
    %153 = arith.addf %149, %152 : vector<32x16xf32>
    %154 = vector.extract_strided_slice %10 {offsets = [0, 0], sizes = [1, 16], strides = [1, 1]} : vector<2x16xf32> to vector<1x16xf32>
    %155 = vector.broadcast %154 : vector<1x16xf32> to vector<32x16xf32>
    %156 = arith.addf %153, %155 : vector<32x16xf32>
    %157 = vector.extract_strided_slice %8 {offsets = [2, 0], sizes = [1, 16], strides = [1, 1]} : vector<3x16xf32> to vector<1x16xf32>
    %158 = vector.broadcast %157 : vector<1x16xf32> to vector<32x16xf32>
    %159 = arith.mulf %158, %143 : vector<32x16xf32>
    %160 = vector.extract_strided_slice %8 {offsets = [1, 0], sizes = [1, 16], strides = [1, 1]} : vector<3x16xf32> to vector<1x16xf32>
    %161 = vector.broadcast %160 : vector<1x16xf32> to vector<32x16xf32>
    %162 = arith.mulf %161, %146 : vector<32x16xf32>
    %163 = arith.addf %159, %162 : vector<32x16xf32>
    %164 = vector.extract_strided_slice %10 {offsets = [1, 0], sizes = [1, 16], strides = [1, 1]} : vector<2x16xf32> to vector<1x16xf32>
    %165 = vector.broadcast %164 : vector<1x16xf32> to vector<32x16xf32>
    %166 = arith.addf %163, %165 : vector<32x16xf32>
    %167 = tpu.concatenate %156, %166 in 0 : vector<32x16xf32>, vector<32x16xf32> -> vector<64x16xf32>
    %168 = vector.extract_strided_slice %167 {offsets = [32, 0], sizes = [32, 16], strides = [1, 1]} : vector<64x16xf32> to vector<32x16xf32>
    %cst_56 = arith.constant 0.000000e+00 : f32
    %169 = vector.broadcast %cst_56 : f32 to vector<32x16xf32>
    %170 = arith.subf %169, %168 : vector<32x16xf32>
    %171 = vector.extract_strided_slice %167 {offsets = [0, 0], sizes = [32, 16], strides = [1, 1]} : vector<64x16xf32> to vector<32x16xf32>
    %172 = tpu.concatenate %170, %171 in 0 : vector<32x16xf32>, vector<32x16xf32> -> vector<64x16xf32>
    %173 = tpu.concatenate %167, %172, %4 in 1 : vector<64x16xf32>, vector<64x16xf32>, vector<64x2xf32> -> vector<64x34xf32>
    %c0_57 = arith.constant 0 : index
    %c0_58 = arith.constant 0 : index
    %c0_59 = arith.constant 0 : index
    %174 = vector.load %arg9[%c0_57, %c0_58, %c0_59] : memref<1x34x32xf32, #tpu.memory_space<vmem>>, vector<1x34x32xf32>
    %175 = vector.shape_cast %174 : vector<1x34x32xf32> to vector<34x32xf32>
    %cst_60 = arith.constant dense<0.000000e+00> : vector<64x32xf32>
    %176 = tpu.matmul %173, %175, %cst_60 {dimension_numbers = #tpu.dot_dimension_numbers<[1], [0], [0], [1], [0, 0, 1, 1], [], []>} : vector<64x34xf32>, vector<34x32xf32>, vector<64x32xf32> -> vector<64x32xf32>
    %cst_61 = arith.constant 5.000000e-01 : f32
    %177 = vector.broadcast %cst_61 : f32 to vector<64x32xf32>
    %178 = arith.mulf %177, %176 : vector<64x32xf32>
    %cst_62 = arith.constant 0.707106769 : f32
    %179 = vector.broadcast %cst_62 : f32 to vector<64x32xf32>
    %180 = arith.mulf %176, %179 : vector<64x32xf32>
    %181 = math.erf %180 : vector<64x32xf32>
    %cst_63 = arith.constant 1.000000e+00 : f32
    %182 = vector.broadcast %cst_63 : f32 to vector<64x32xf32>
    %183 = arith.addf %182, %181 : vector<64x32xf32>
    %184 = arith.mulf %178, %183 : vector<64x32xf32>
    %185 = vector.extract_strided_slice %184 {offsets = [32, 0], sizes = [32, 32], strides = [1, 1]} : vector<64x32xf32> to vector<32x32xf32>
    %cst_64 = arith.constant 0.000000e+00 : f32
    %186 = vector.broadcast %cst_64 : f32 to vector<32x32xf32>
    %187 = arith.subf %186, %185 : vector<32x32xf32>
    %188 = vector.extract_strided_slice %184 {offsets = [0, 0], sizes = [32, 32], strides = [1, 1]} : vector<64x32xf32> to vector<32x32xf32>
    %189 = tpu.concatenate %187, %188 in 0 : vector<32x32xf32>, vector<32x32xf32> -> vector<64x32xf32>
    %190 = tpu.concatenate %184, %189, %4 in 1 : vector<64x32xf32>, vector<64x32xf32>, vector<64x2xf32> -> vector<64x66xf32>
    %c0_65 = arith.constant 0 : index
    %c0_66 = arith.constant 0 : index
    %c0_67 = arith.constant 0 : index
    %191 = vector.load %arg10[%c0_65, %c0_66, %c0_67] : memref<1x66x16xf32, #tpu.memory_space<vmem>>, vector<1x66x16xf32>
    %192 = vector.shape_cast %191 : vector<1x66x16xf32> to vector<66x16xf32>
    %cst_68 = arith.constant dense<0.000000e+00> : vector<64x16xf32>
    %193 = tpu.matmul %190, %192, %cst_68 {dimension_numbers = #tpu.dot_dimension_numbers<[1], [0], [0], [1], [0, 0, 1, 1], [], []>} : vector<64x66xf32>, vector<66x16xf32>, vector<64x16xf32> -> vector<64x16xf32>
    %194 = arith.addf %167, %193 : vector<64x16xf32>
    %195 = vector.extract_strided_slice %194 {offsets = [0, 0], sizes = [32, 16], strides = [1, 1]} : vector<64x16xf32> to vector<32x16xf32>
    %196 = vector.extract_strided_slice %194 {offsets = [32, 0], sizes = [32, 16], strides = [1, 1]} : vector<64x16xf32> to vector<32x16xf32>
    %cst_69 = arith.constant dense<0.000000e+00> : vector<8x16xf32>
    %197 = tpu.matmul %5, %195, %cst_69 {dimension_numbers = #tpu.dot_dimension_numbers<[1], [0], [0], [1], [0, 0, 1, 1], [], []>} : vector<8x32xf32>, vector<32x16xf32>, vector<8x16xf32> -> vector<8x16xf32>
    %cst_70 = arith.constant dense<0.000000e+00> : vector<8x16xf32>
    %198 = tpu.matmul %5, %196, %cst_70 {dimension_numbers = #tpu.dot_dimension_numbers<[1], [0], [0], [1], [0, 0, 1, 1], [], []>} : vector<8x32xf32>, vector<32x16xf32>, vector<8x16xf32> -> vector<8x16xf32>
    %cst_71 = arith.constant dense<0.000000e+00> : vector<32x16xf32>
    %199 = tpu.matmul %6, %197, %cst_71 {dimension_numbers = #tpu.dot_dimension_numbers<[1], [0], [0], [1], [0, 0, 1, 1], [], []>} : vector<32x8xf32>, vector<8x16xf32>, vector<32x16xf32> -> vector<32x16xf32>
    %200 = arith.subf %195, %199 : vector<32x16xf32>
    %cst_72 = arith.constant dense<0.000000e+00> : vector<32x16xf32>
    %201 = tpu.matmul %6, %198, %cst_72 {dimension_numbers = #tpu.dot_dimension_numbers<[1], [0], [0], [1], [0, 0, 1, 1], [], []>} : vector<32x8xf32>, vector<8x16xf32>, vector<32x16xf32> -> vector<32x16xf32>
    %202 = arith.subf %196, %201 : vector<32x16xf32>
    %203 = arith.mulf %200, %200 : vector<32x16xf32>
    %cst_73 = arith.constant dense<0.000000e+00> : vector<8x16xf32>
    %204 = tpu.matmul %5, %203, %cst_73 {dimension_numbers = #tpu.dot_dimension_numbers<[1], [0], [0], [1], [0, 0, 1, 1], [], []>} : vector<8x32xf32>, vector<32x16xf32>, vector<8x16xf32> -> vector<8x16xf32>
    %cst_74 = arith.constant 9.99999974E-6 : f32
    %205 = vector.broadcast %cst_74 : f32 to vector<8x16xf32>
    %206 = arith.addf %204, %205 : vector<8x16xf32>
    %207 = arith.mulf %202, %202 : vector<32x16xf32>
    %cst_75 = arith.constant dense<0.000000e+00> : vector<8x16xf32>
    %208 = tpu.matmul %5, %207, %cst_75 {dimension_numbers = #tpu.dot_dimension_numbers<[1], [0], [0], [1], [0, 0, 1, 1], [], []>} : vector<8x32xf32>, vector<32x16xf32>, vector<8x16xf32> -> vector<8x16xf32>
    %cst_76 = arith.constant 9.99999974E-6 : f32
    %209 = vector.broadcast %cst_76 : f32 to vector<8x16xf32>
    %210 = arith.addf %208, %209 : vector<8x16xf32>
    %211 = arith.mulf %200, %202 : vector<32x16xf32>
    %cst_77 = arith.constant dense<0.000000e+00> : vector<8x16xf32>
    %212 = tpu.matmul %5, %211, %cst_77 {dimension_numbers = #tpu.dot_dimension_numbers<[1], [0], [0], [1], [0, 0, 1, 1], [], []>} : vector<8x32xf32>, vector<32x16xf32>, vector<8x16xf32> -> vector<8x16xf32>
    %213 = arith.mulf %206, %210 : vector<8x16xf32>
    %214 = arith.mulf %212, %212 : vector<8x16xf32>
    %215 = arith.subf %213, %214 : vector<8x16xf32>
    %cst_78 = arith.constant 9.99999968E-21 : f32
    %216 = vector.broadcast %cst_78 : f32 to vector<8x16xf32>
    %217 = arith.maximumf %215, %216 : vector<8x16xf32>
    %218 = math.sqrt %217 : vector<8x16xf32>
    %219 = arith.addf %210, %206 : vector<8x16xf32>
    %cst_79 = arith.constant 2.000000e+00 : f32
    %220 = vector.broadcast %cst_79 : f32 to vector<8x16xf32>
    %221 = arith.mulf %220, %218 : vector<8x16xf32>
    %222 = arith.addf %219, %221 : vector<8x16xf32>
    %223 = math.sqrt %222 : vector<8x16xf32>
    %224 = arith.mulf %218, %223 : vector<8x16xf32>
    %cst_80 = arith.constant 9.99999968E-21 : f32
    %225 = vector.broadcast %cst_80 : f32 to vector<8x16xf32>
    %226 = arith.maximumf %224, %225 : vector<8x16xf32>
    %cst_81 = arith.constant 1.000000e+00 : f32
    %227 = vector.broadcast %cst_81 : f32 to vector<8x16xf32>
    %228 = arith.divf %227, %226 : vector<8x16xf32>
    %229 = arith.addf %210, %218 : vector<8x16xf32>
    %230 = arith.mulf %229, %228 : vector<8x16xf32>
    %231 = arith.addf %206, %218 : vector<8x16xf32>
    %232 = arith.mulf %231, %228 : vector<8x16xf32>
    %cst_82 = arith.constant 0.000000e+00 : f32
    %233 = vector.broadcast %cst_82 : f32 to vector<8x16xf32>
    %234 = arith.subf %233, %212 : vector<8x16xf32>
    %235 = arith.mulf %234, %228 : vector<8x16xf32>
    %cst_83 = arith.constant dense<0.000000e+00> : vector<32x16xf32>
    %236 = tpu.matmul %6, %230, %cst_83 {dimension_numbers = #tpu.dot_dimension_numbers<[1], [0], [0], [1], [0, 0, 1, 1], [], []>} : vector<32x8xf32>, vector<8x16xf32>, vector<32x16xf32> -> vector<32x16xf32>
    %cst_84 = arith.constant dense<0.000000e+00> : vector<32x16xf32>
    %237 = tpu.matmul %6, %232, %cst_84 {dimension_numbers = #tpu.dot_dimension_numbers<[1], [0], [0], [1], [0, 0, 1, 1], [], []>} : vector<32x8xf32>, vector<8x16xf32>, vector<32x16xf32> -> vector<32x16xf32>
    %cst_85 = arith.constant dense<0.000000e+00> : vector<32x16xf32>
    %238 = tpu.matmul %6, %235, %cst_85 {dimension_numbers = #tpu.dot_dimension_numbers<[1], [0], [0], [1], [0, 0, 1, 1], [], []>} : vector<32x8xf32>, vector<8x16xf32>, vector<32x16xf32> -> vector<32x16xf32>
    %239 = arith.mulf %236, %200 : vector<32x16xf32>
    %240 = arith.mulf %238, %202 : vector<32x16xf32>
    %241 = arith.addf %239, %240 : vector<32x16xf32>
    %242 = arith.mulf %237, %202 : vector<32x16xf32>
    %243 = arith.mulf %238, %200 : vector<32x16xf32>
    %244 = arith.addf %242, %243 : vector<32x16xf32>
    %245 = vector.extract_strided_slice %8 {offsets = [0, 0], sizes = [1, 16], strides = [1, 1]} : vector<3x16xf32> to vector<1x16xf32>
    %246 = vector.broadcast %245 : vector<1x16xf32> to vector<32x16xf32>
    %247 = arith.mulf %246, %241 : vector<32x16xf32>
    %248 = vector.extract_strided_slice %8 {offsets = [2, 0], sizes = [1, 16], strides = [1, 1]} : vector<3x16xf32> to vector<1x16xf32>
    %249 = vector.broadcast %248 : vector<1x16xf32> to vector<32x16xf32>
    %250 = arith.mulf %249, %244 : vector<32x16xf32>
    %251 = arith.addf %247, %250 : vector<32x16xf32>
    %252 = vector.extract_strided_slice %10 {offsets = [0, 0], sizes = [1, 16], strides = [1, 1]} : vector<2x16xf32> to vector<1x16xf32>
    %253 = vector.broadcast %252 : vector<1x16xf32> to vector<32x16xf32>
    %254 = arith.addf %251, %253 : vector<32x16xf32>
    %255 = vector.extract_strided_slice %8 {offsets = [2, 0], sizes = [1, 16], strides = [1, 1]} : vector<3x16xf32> to vector<1x16xf32>
    %256 = vector.broadcast %255 : vector<1x16xf32> to vector<32x16xf32>
    %257 = arith.mulf %256, %241 : vector<32x16xf32>
    %258 = vector.extract_strided_slice %8 {offsets = [1, 0], sizes = [1, 16], strides = [1, 1]} : vector<3x16xf32> to vector<1x16xf32>
    %259 = vector.broadcast %258 : vector<1x16xf32> to vector<32x16xf32>
    %260 = arith.mulf %259, %244 : vector<32x16xf32>
    %261 = arith.addf %257, %260 : vector<32x16xf32>
    %262 = vector.extract_strided_slice %10 {offsets = [1, 0], sizes = [1, 16], strides = [1, 1]} : vector<2x16xf32> to vector<1x16xf32>
    %263 = vector.broadcast %262 : vector<1x16xf32> to vector<32x16xf32>
    %264 = arith.addf %261, %263 : vector<32x16xf32>
    %265 = tpu.concatenate %254, %264 in 0 : vector<32x16xf32>, vector<32x16xf32> -> vector<64x16xf32>
    %c0_86 = arith.constant 0 : index
    %c0_87 = arith.constant 0 : index
    %266 = vector.load %arg13[%c0_86, %c0_87] : memref<64x16xf32, #tpu.memory_space<vmem>>, vector<64x16xf32>
    tpu.vector_store %arg13[%c0_86, %c0_87], %265 {strides = array<i32>} : memref<64x16xf32, #tpu.memory_space<vmem>>, vector<64x16xf32>,
    return
  }
  func.func @transform_0(%arg0: i32) -> (i32, i32) {
    %c0_i32 = arith.constant 0 : i32
    %c0_i32_0 = arith.constant 0 : i32
    %c0_i32_1 = arith.constant 0 : i32
    return %c0_i32, %c0_i32_0 : i32, i32
  }
  func.func @transform_1(%arg0: i32) -> (i32, i32) {
    %c0_i32 = arith.constant 0 : i32
    %c0_i32_0 = arith.constant 0 : i32
    %c0_i32_1 = arith.constant 0 : i32
    return %c0_i32, %c0_i32_0 : i32, i32
  }
  func.func @transform_2(%arg0: i32) -> (i32, i32) {
    %c0_i32 = arith.constant 0 : i32
    %c0_i32_0 = arith.constant 0 : i32
    %c0_i32_1 = arith.constant 0 : i32
    return %c0_i32, %c0_i32_0 : i32, i32
  }
  func.func @transform_3(%arg0: i32) -> (i32, i32) {
    %c0_i32 = arith.constant 0 : i32
    %c0_i32_0 = arith.constant 0 : i32
    %c0_i32_1 = arith.constant 0 : i32
    return %c0_i32, %c0_i32_0 : i32, i32
  }
  func.func @transform_4(%arg0: i32) -> (i32, i32) {
    %c0_i32 = arith.constant 0 : i32
    %c0_i32_0 = arith.constant 0 : i32
    %c0_i32_1 = arith.constant 0 : i32
    return %c0_i32, %c0_i32_0 : i32, i32
  }
  func.func @transform_5(%arg0: i32) -> (i32, i32, i32) {
    %c0_i32 = arith.constant 0 : i32
    %c0_i32_0 = arith.constant 0 : i32
    %c0_i32_1 = arith.constant 0 : i32
    return %arg0, %c0_i32, %c0_i32_0 : i32, i32, i32
  }
  func.func @transform_6(%arg0: i32) -> (i32, i32, i32) {
    %c0_i32 = arith.constant 0 : i32
    %c0_i32_0 = arith.constant 0 : i32
    %c0_i32_1 = arith.constant 0 : i32
    return %arg0, %c0_i32, %c0_i32_0 : i32, i32, i32
  }
  func.func @transform_7(%arg0: i32) -> (i32, i32, i32) {
    %c0_i32 = arith.constant 0 : i32
    %c0_i32_0 = arith.constant 0 : i32
    %c0_i32_1 = arith.constant 0 : i32
    return %arg0, %c0_i32, %c0_i32_0 : i32, i32, i32
  }
  func.func @transform_8(%arg0: i32) -> (i32, i32, i32) {
    %c0_i32 = arith.constant 0 : i32
    %c0_i32_0 = arith.constant 0 : i32
    %c0_i32_1 = arith.constant 0 : i32
    return %arg0, %c0_i32, %c0_i32_0 : i32, i32, i32
  }
  func.func @transform_9(%arg0: i32) -> (i32, i32, i32) {
    %c0_i32 = arith.constant 0 : i32
    %c0_i32_0 = arith.constant 0 : i32
    %c0_i32_1 = arith.constant 0 : i32
    return %arg0, %c0_i32, %c0_i32_0 : i32, i32, i32
  }
  func.func @transform_10(%arg0: i32) -> (i32, i32, i32) {
    %c0_i32 = arith.constant 0 : i32
    %c0_i32_0 = arith.constant 0 : i32
    %c0_i32_1 = arith.constant 0 : i32
    return %arg0, %c0_i32, %c0_i32_0 : i32, i32, i32
  }
  func.func @transform_11(%arg0: i32) -> (i32, i32, i32) {
    %c0_i32 = arith.constant 0 : i32
    %c0_i32_0 = arith.constant 0 : i32
    %c0_i32_1 = arith.constant 0 : i32
    return %arg0, %c0_i32, %c0_i32_0 : i32, i32, i32
  }
  func.func @transform_12(%arg0: i32) -> (i32, i32) {
    %c0_i32 = arith.constant 0 : i32
    %c0_i32_0 = arith.constant 0 : i32
    %c0_i32_1 = arith.constant 0 : i32
    return %c0_i32, %c0_i32_0 : i32, i32
  }
}

</mosaic_0001>

<bundles_post_ra>
// kernel: tpu_custom_call.1
= control target key start
LH: loop header
LB: loop body
LE: loop exit
PB: predicated region body
PF: predicated region fallthrough
CT: control target
= control target key end

     0   :  { %s8213_s21 = smov 0   ;;  %s9580_s0 = inlined_call_operand.vmem [shape: f32[64,16], index: 0, kind: input, shape index: {}]   ;;  %s9581_s1 = inlined_call_operand.vmem [shape: f32[8,32], index: 1, kind: input, shape index: {}]   ;;  %s9582_s2 = inlined_call_operand.vmem [shape: f32[32,8], index: 2, kind: input, shape index: {}]   ;;  %s9583_s3 = inlined_call_operand.vmem [shape: f32[4,8], index: 3, kind: input, shape index: {}]   ;;  %s9584_s4 = inlined_call_operand.vmem [shape: f32[64,2], index: 4, kind: input, shape index: {}]   ;;  %s9585_s5 = inlined_call_operand.vmem [shape: f32[2,34,48], index: 5, kind: input, shape index: {}]   ;;  %s9586_s6 = inlined_call_operand.vmem [shape: f32[2,16,16], index: 6, kind: input, shape index: {}]   ;;  %s9587_s7 = inlined_call_operand.vmem [shape: f32[2,1,16], index: 7, kind: input, shape index: {}]   ;;  %s9588_s8 = inlined_call_operand.vmem [shape: f32[2,34,32], index: 8, kind: input, shape index: {}]   ;;  %s9589_s9 = inlined_call_operand.vmem [shape: f32[2,66,16], index: 9, kind: input, shape index: {}]   ;;  %s9590_s10 = inlined_call_operand.vmem [shape: f32[2,3,16], index: 10, kind: input, shape index: {}]   ;;  %s9591_s11 = inlined_call_operand.vmem [shape: f32[2,2,16], index: 11, kind: input, shape index: {}]   ;;  %s9592_s12 = inlined_call_operand.vmem [shape: f32[64,16], index: 12, kind: output, shape index: {}]  }
   0x1   :  { %9595 = sst [smem:[#allocation3_spill]] %s9582_s2 }
   0x2   :  { %9596 = sst [smem:[#allocation4_spill]] %s9585_s5 }
   0x3 LB: > { %9597 = sst [smem:[#allocation2_spill]] %s8139_s21  ;;  %s6949_s22 = sadd.s32 4294967295, %s8139_s21   ;;  %s8139_s21 = sphi %s8213_s21, %s22_s21  }
   0x4   : > { %p6952_p0 = scmp.ge.s32.totalorder %s8139_s21, 1  ;;  %p413_p1 = scmp.lt.s32.totalorder %s8139_s21, 3 }
   0x6   : > { %p414_p2 = pnand %p6952_p0, %p413_p1 }
   0x7   : > { %p476_p3 = scmp.lt.s32.totalorder (!%p414_p2), %s6949_s22, 1  ;;  %s9598_s5 = sld [smem:[#allocation4_spill]] (!%p414_p2) }
   0x8   : > { %417 = sbr.rel (%p414_p2) target bundleno = 4579 (0x11e3), region = 68  ;;  %p6960_p4 = scmp.ne.s32.totalorder (!%p414_p2), %s6949_s22, 0 }
   0xf   : > { %s8221_s23 = scalar_select %p476_p3, %s6949_s22, 1 }
  0x10   : > { %510 = sbr.rel (%p6960_p4) target bundleno = 23 (0x17), region = 72  ;;  %v511_v0 = vld [vmem:[%s9580_s0] sm:$0xff] (!%p6960_p4)  ;;  %vm519_vm0 = vcmask (!%p6960_p4), 130048   ;;  %v512_v1 = vld [vmem:[%s9580_s0 + $0x8] sm:$0xff] (!%p6960_p4)  ;;  %v513_v2 = vld [vmem:[%s9580_s0 + $0x10] sm:$0xff] (!%p6960_p4) }
  0x11   : > { %s8003_s24 = smul.u32 40, %s8221_s23  ;;  %s7145_s25 = sshll.u32 %s8221_s23, 4  ;;  %520 = vst.msk [vmem:[%s9592_s12] sm:$0xff] (!%p6960_p4), %vm519_vm0, %v511_v0  ;;  %521 = vst.msk [vmem:[%s9592_s12 + $0x8] sm:$0xff] (!%p6960_p4), %vm519_vm0, %v512_v1  ;;  %v514_v3 = vld [vmem:[%s9580_s0 + $0x18] sm:$0xff] (!%p6960_p4)  ;;  %v515_v4 = vld [vmem:[%s9580_s0 + $0x20] sm:$0xff] (!%p6960_p4) }
  0x12   : > { %s8228_s28 = scalar_lea.vmem %s9586_s6, %s7145_s25  ;;  %s8004_s20 = smul.u32 72, %s8221_s23  ;;  %522 = vst.msk [vmem:[%s9592_s12 + $0x10] sm:$0xff] (!%p6960_p4), %vm519_vm0, %v513_v2  ;;  %v516_v5 = vld [vmem:[%s9580_s0 + $0x28] sm:$0xff] (!%p6960_p4)  ;;  %523 = vst.msk [vmem:[%s9592_s12 + $0x18] sm:$0xff] (!%p6960_p4), %vm519_vm0, %v514_v3  ;;  %v517_v6 = vld [vmem:[%s9580_s0 + $0x30] sm:$0xff] (!%p6960_p4) }
  0x13   : > { %s8237_s16 = scalar_lea.vmem %s9598_s5, %s8003_s24  ;;  %s8242_s19 = scalar_lea.vmem %s9588_s8, %s8003_s24  ;;  %524 = vst.msk [vmem:[%s9592_s12 + $0x20] sm:$0xff] (!%p6960_p4), %vm519_vm0, %v515_v4  ;;  %525 = vst.msk [vmem:[%s9592_s12 + $0x28] sm:$0xff] (!%p6960_p4), %vm519_vm0, %v516_v5  ;;  %v518_v7 = vld [vmem:[%s9580_s0 + $0x38] sm:$0xff] (!%p6960_p4) }
  0x14   : > { %s6958_s21 = sshll.u32 %s8221_s23, 2  ;;  %s6959_s27 = sshll.u32 %s8221_s23, 1  ;;  %526 = vst.msk [vmem:[%s9592_s12 + $0x30] sm:$0xff] (!%p6960_p4), %vm519_vm0, %v517_v6  ;;  %527 = vst.msk [vmem:[%s9592_s12 + $0x38] sm:$0xff] (!%p6960_p4), %vm519_vm0, %v518_v7 }
  0x15   : > { %s8249_s25 = scalar_lea.vmem %s9590_s10, %s6958_s21  ;;  %s8255_s13 = scalar_lea.vmem %s9589_s9, %s8004_s20 }
  0x16   : > { %s8260_s5 = scalar_lea.vmem %s9591_s11, %s6959_s27 }
  0x17 PF: > { %v536_v8 = vld [vmem:[%s9584_s4] sm:$0xff]  ;;  %s8141_s30 = smov 32   ;;  %v537_v12 = vld [vmem:[%s9584_s4 + $0x8] sm:$0xff]  ;;  %s8142_s18 = smov 16   ;;  %v639_v20 = vld [vmem:[%s8237_s16 + $0x10] sm:$0xff]  ;;  %vm667_vm1 = vcmask 1041408  }
  0x18   : > { %595 = vrot.lane.b32.xlu1 %v536_v8, %s8141_s30  ;;  %v637_v17 = vld [vmem:[%s8237_s16] sm:$0xff]  ;;  %v638_v18 = vld [vmem:[%s8237_s16 + $0x8] sm:$0xff]  ;;  %v640_v21 = vld [vmem:[%s8237_s16 + $0x18] sm:$0xff]  ;;  %vm619_vm2 = vcmask 130048   ;;  %vm628_vm3 = vcmask 261120   ;;  %vm642_vm4 = vcmask 277504   ;;  %s9599_s29 = scalar_lea.vmem %s9587_s7, %s8221_s23 }
  0x19   : > { %v7895_v19 = vpack.c.bf16 %v638_v18, %v637_v17  ;;  %v7899_v23 = vpack.c.bf16 %v640_v21, %v639_v20  ;;  %v539_v24 = vld [vmem:[%s9584_s4 + $0x18] sm:$0xff]  ;;  %v641_v25 = vld [vmem:[%s8237_s16 + $0x20] sm:$0x3]  ;;  %v538_v26 = vld [vmem:[%s9584_s4 + $0x10] sm:$0xff]  ;;  %v8143_v3 = vmov 0.0   ;;  %vm8144_vm5 = vmmov 0  }
  0x1a   : > { %v8316_v9 = vld [vmem:[%s9592_s12 + $0x20] sm:$0xff]  ;;  %v8323_v11 = vld [vmem:[%s9592_s12 + $0x28] sm:$0xff]  ;;  %v531_v31 = vld [vmem:[%s9592_s12 + $0x18] sm:$0xff]  ;;  %7425 = vmatprep.subr.mxu1 %v8143_v3  ;;  %7427 = vmatprep.mubr.msk.f32.mxu1 %vm8144_vm5, %v8143_v3  ;;  %s8145_s16 = smov 112   ;;  %vm781_vm6 = vcmask 64512   ;;  %vm2549_vm7 = vcmask 31744  }
  0x1b   : > { %v551_v10 = vsub.f32 0.0, %v8316_v9  ;;  %v8331_v13 = vld [vmem:[%s9592_s12 + $0x38] sm:$0xff]  ;;  %v552_v14 = vsub.f32 0.0, %v8323_v11  ;;  %v8338_v15 = vld [vmem:[%s9592_s12 + $0x30] sm:$0xff]  ;;  %7896 = vmatprep.subr.bf16.mxu0 %v7895_v19  ;;  %v529_v27 = vld [vmem:[%s9592_s12 + $0x8] sm:$0xff]  ;;  %s9600_s17 = sld [smem:[#allocation3_spill]] }
  0x1c   : > { %597 = vrot.lane.b32.xlu1 %v537_v12, %s8141_s30  ;;  %v554_v16 = vsub.f32 0.0, %v8331_v13  ;;  %v553_v22 = vsub.f32 0.0, %v8338_v15  ;;  %7898 = vmatpush3.bf16.msra.mxu0 %v7895_v19  ;;  %v528_v28 = vld [vmem:[%s9592_s12] sm:$0xff]  ;;  %v541_v29 = vld [vmem:[%s9584_s4 + $0x28] sm:$0xff]  ;;  %v530_v32 = vld [vmem:[%s9592_s12 + $0x10] sm:$0xff]  ;;  %vm5803_vm12 = vcmask 523264  }
  0x1d   : > { %563 = vrot.lane.b32.xlu0 %v551_v10, %s8142_s18  ;;  %7900 = vmatprep.subr.bf16.mxu0 %v7899_v23  ;;  %v540_v30 = vld [vmem:[%s9584_s4 + $0x20] sm:$0xff]  ;;  %v543_v33 = vld [vmem:[%s9584_s4 + $0x38] sm:$0xff]  ;;  %v542_v34 = vld [vmem:[%s9584_s4 + $0x30] sm:$0xff]  ;;  %vm5821_vm13 = vcmask 539648  }
  0x1e   : > { %v776_v12 = vld [vmem:[%s9583_s3] sm:$0xf] }
  0x20   : > { %569 = vrot.lane.b32.xlu1 %v554_v16, %s8142_s18  ;;  %7902 = vmatpush3.bf16.msra.mxu0 %v7899_v23 }
  0x21   : > { %565 = vrot.lane.b32.xlu0 %v552_v14, %s8142_s18  ;;  %7411 = vmatprep.subr.msk.mxu0 %vm667_vm1, %v641_v25 }
  0x24   : > { %601 = vrot.lane.b32.xlu1 %v539_v24, %s8141_s30  ;;  %7412 = vmatpush3.msk.msra.mxu0 %vm667_vm1, %v641_v25 }
  0x25   : > { %567 = vrot.lane.b32.xlu0 %v553_v22, %s8142_s18  ;;  %7455 = vmatprep.subr.mxu0 %v8143_v3 }
  0x28   : > { %573 = vrot.lane.b32.xlu1 %v529_v27, %s8142_s18 }
  0x29   : > { %599 = vrot.lane.b32.xlu0 %v538_v26, %s8141_s30 }
  0x2c   : > { %605 = vrot.lane.b32.xlu1 %v541_v29, %s8141_s30 }
  0x2d   : > { %571 = vrot.lane.b32.xlu0 %v528_v28, %s8142_s18 }
  0x30   : > { %577 = vrot.lane.b32.xlu1 %v531_v31, %s8142_s18 }
  0x31   : > { %603 = vrot.lane.b32.xlu0 %v540_v30, %s8141_s30 }
  0x34   : > { %609 = vrot.lane.b32.xlu1 %v543_v33, %s8141_s30 }
  0x35   : > { %575 = vrot.lane.b32.xlu0 %v530_v32, %s8142_s18 }
  0x39   : > { %607 = vrot.lane.b32.xlu0 %v542_v34, %s8141_s30 }
  0x8a   : > { %v8393_v35 = vpop.permute.xlu1 %595 }
  0x8e   : > { %v8396_v38 = vpop.permute.xlu1 %597 }
  0x8f   : > { %v564_v36 = vpop.permute.xlu0 %563 }
  0x90   : > { %v620_v37 = vsel %vm619_vm2, %v528_v28, %v564_v36 }
  0x91   : > { %v629_v39 = vsel %vm628_vm3, %v620_v37, %v8393_v35 }
  0x92   : > { %7413 = vmatprep.mubr.msk.f32.mxu0 %vm642_vm4, %v629_v39  ;;  %v570_v42 = vpop.permute.xlu1 %569 }
  0x93   : > { %v566_v40 = vpop.permute.xlu0 %565  ;;  %v623_v46 = vsel %vm619_vm2, %v531_v31, %v570_v42 }
  0x94   : > { %v621_v41 = vsel %vm619_vm2, %v529_v27, %v566_v40 }
  0x95   : > { %v630_v43 = vsel %vm628_vm3, %v621_v41, %v8396_v38 }
  0x96   : > { %7414 = vmatmul.mubr.msk.f32.vlgmr.msra.gmra.mrb[0].mxu0 %vm642_vm4, %v630_v43  ;;  %v8405_v45 = vpop.permute.xlu1 %601 }
  0x97   : > { %v568_v44 = vpop.permute.xlu0 %567  ;;  %v632_v50 = vsel %vm628_vm3, %v623_v46, %v8405_v45 }
  0x98   : > { %v622_v47 = vsel %vm619_vm2, %v530_v32, %v568_v44 }
  0x9a   : > { %v574_v51 = vpop.permute.xlu1 %573 }
  0x9b   : > { %v8409_v48 = vpop.permute.xlu0 %599  ;;  %v625_v54 = vsel %vm619_vm2, %v8323_v11, %v574_v51 }
  0x9c   : > { %v631_v49 = vsel %vm628_vm3, %v622_v47, %v8409_v48 }
  0x9d   : > { %7416 = vmatprep.mubr.msk.f32.mxu0 %vm642_vm4, %v631_v49 }
  0x9e   : > { %7417 = vmatmul.mubr.msk.f32.gmra.mrb[2].mxu0 %vm642_vm4, %v632_v50  ;;  %v8417_v53 = vpop.permute.xlu1 %605 }
  0x9f   : > { %v572_v52 = vpop.permute.xlu0 %571  ;;  %v634_v58 = vsel %vm628_vm3, %v625_v54, %v8417_v53 }
  0xa0   : > { %v624_v55 = vsel %vm619_vm2, %v8316_v9, %v572_v52 }
  0xa2   : > { %v578_v59 = vpop.permute.xlu1 %577 }
  0xa3   : > { %v8423_v56 = vpop.permute.xlu0 %603  ;;  %v627_v61 = vsel %vm619_vm2, %v8331_v13, %v578_v59 }
  0xa4   : > { %v633_v57 = vsel %vm628_vm3, %v624_v55, %v8423_v56 }
  0xa5   : > { %7419 = vmatprep.mubr.msk.f32.mxu0 %vm642_vm4, %v633_v57 }
  0xa6   : > { %7420 = vmatmul.mubr.msk.f32.gmra.mrb[4].mxu0 %vm642_vm4, %v634_v58  ;;  %v8435_v63 = vpop.permute.xlu1 %609 }
  0xa7   : > { %v576_v60 = vpop.permute.xlu0 %575  ;;  %v636_v1 = vsel %vm628_vm3, %v627_v61, %v8435_v63 }
  0xa8   : > { %v626_v62 = vsel %vm619_vm2, %v8338_v15, %v576_v60 }
  0xab   : > { %v8437_v0 = vpop.permute.xlu0 %607 }
  0xac   : > { %v635_v2 = vsel %vm628_vm3, %v626_v62, %v8437_v0 }
  0xad   : > { %7422 = vmatprep.mubr.msk.f32.mxu0 %vm642_vm4, %v635_v2 }
  0xae   : > { %7423 = vmatmul.mubr.msk.f32.gmra.mrb[6].mxu0 %vm642_vm4, %v636_v1 }
  0xaf   : > { %7457 = vmatprep.mubr.msk.f32.mxu0 %vm8144_vm5, %v8143_v3 }
 0x169   : > { %v8451_v4 = vpop.f32.mrb[0].mxu0 }
 0x16a   : > { %856 = vrot.lane.b32.xlu1 %v8451_v4, %s8145_s16  ;;  %v8455_v5 = vpop.f32.mrb[1].mxu0 }
 0x16b   : > { %778 = vrot.lane.b32.xlu0 %v8455_v5, %s8145_s16 }
 0x171   : > { %v8459_v6 = vpop.f32.mrb[2].mxu0 }
 0x172   : > { %1004 = vrot.lane.b32.xlu1 %v8459_v6, %s8145_s16  ;;  %v8463_v7 = vpop.f32.mrb[3].mxu0 }
 0x173   : > { %930 = vrot.lane.b32.xlu0 %v8463_v7, %s8145_s16 }
 0x179   : > { %v8467_v8 = vpop.f32.mrb[4].mxu0 }
 0x17a   : > { %1152 = vrot.lane.b32.xlu1 %v8467_v8, %s8145_s16  ;;  %v8471_v9 = vpop.f32.mrb[5].mxu0 }
 0x17b   : > { %1078 = vrot.lane.b32.xlu0 %v8471_v9, %s8145_s16 }
 0x181   : > { %v8475_v10 = vpop.f32.mrb[6].mxu0 }
 0x182   : > { %v8477_v11 = vpop.f32.mrb[7].mxu0  ;;  %1300 = vrot.lane.b32.xlu1 %v8475_v10, %s8145_s16 }
 0x183   : > { %1226 = vrot.lane.b32.xlu0 %v8477_v11, %s8145_s16 }
 0x1dc   : > { %v857_v14 = vpop.permute.xlu1 %856 }
 0x1dd   : > { %v779_v13 = vpop.permute.xlu0 %778 }
 0x1de   : > { %7426 = vmatpush3.msra.mxu1 %v779_v13 }
 0x1df   : > { %7428 = vmatmul.mubr.msk.f32.vlgmr.msra.gmra.mrb[0].mxu1 %vm781_vm6, %v776_v12  ;;  %7430 = vmatprep.subr.mxu1 %v8143_v3 }
 0x1e0   : > { %7431 = vmatpush3.msra.mxu1 %v857_v14  ;;  %7432 = vmatprep.mubr.msk.f32.mxu1 %vm8144_vm5, %v8143_v3 }
 0x1e1   : > { %7435 = vmatprep.subr.mxu1 %v8143_v3 }
 0x1e3   : > { %7433 = vmatmul.mubr.msk.f32.vlgmr.msra.gmra.mrb[2].mxu1 %vm781_vm6, %v776_v12 }
 0x1e4   : > { %7437 = vmatprep.mubr.msk.f32.mxu1 %vm8144_vm5, %v8143_v3  ;;  %v1005_v16 = vpop.permute.xlu1 %1004 }
 0x1e5   : > { %v931_v15 = vpop.permute.xlu0 %930 }
 0x1e6   : > { %7436 = vmatpush3.msra.mxu1 %v931_v15 }
 0x1e7   : > { %7438 = vmatmul.mubr.msk.f32.vlgmr.msra.gmra.mrb[4].mxu1 %vm781_vm6, %v776_v12  ;;  %7440 = vmatprep.subr.mxu1 %v8143_v3 }
 0x1e8   : > { %7441 = vmatpush3.msra.mxu1 %v1005_v16  ;;  %7442 = vmatprep.mubr.msk.f32.mxu1 %vm8144_vm5, %v8143_v3 }
 0x1e9   : > { %7445 = vmatprep.subr.mxu1 %v8143_v3 }
 0x1eb   : > { %7443 = vmatmul.mubr.msk.f32.vlgmr.msra.gmra.mrb[6].mxu1 %vm781_vm6, %v776_v12 }
 0x1ec   : > { %7447 = vmatprep.mubr.msk.f32.mxu1 %vm8144_vm5, %v8143_v3  ;;  %v1153_v18 = vpop.permute.xlu1 %1152 }
 0x1ed   : > { %v1079_v17 = vpop.permute.xlu0 %1078 }
 0x1ee   : > { %7446 = vmatpush3.msra.mxu1 %v1079_v17 }
 0x1ef   : > { %7448 = vmatmul.mubr.msk.f32.vlgmr.msra.gmra.mrb[8].mxu1 %vm781_vm6, %v776_v12  ;;  %7450 = vmatprep.subr.mxu1 %v8143_v3 }
 0x1f0   : > { %7451 = vmatpush3.msra.mxu1 %v1153_v18  ;;  %7452 = vmatprep.mubr.msk.f32.mxu1 %vm8144_vm5, %v8143_v3 }
 0x1f1   : > { %7460 = vmatprep.subr.mxu1 %v8143_v3 }
 0x1f3   : > { %7453 = vmatmul.mubr.msk.f32.vlgmr.msra.gmra.mrb[10].mxu1 %vm781_vm6, %v776_v12 }
 0x1f4   : > { %v1301_v19 = vpop.permute.xlu1 %1300  ;;  %7462 = vmatprep.mubr.msk.f32.mxu1 %vm8144_vm5, %v8143_v3 }
 0x1f5   : > { %v1227_v20 = vpop.permute.xlu0 %1226  ;;  %7461 = vmatpush3.msra.mxu1 %v1301_v19 }
 0x1f6   : > { %7456 = vmatpush3.msra.mxu0 %v1227_v20  ;;  %7470 = vmatprep.subr.mxu1 %v8143_v3 }
 0x1f7   : > { %7458 = vmatmul.mubr.msk.f32.vlgmr.msra.gmra.mrb[8].mxu0 %vm781_vm6, %v776_v12  ;;  %7463 = vmatmul.mubr.msk.f32.vlgmr.msra.gmra.mrb[12].mxu1 %vm781_vm6, %v776_v12 }
 0x1f8   : > { %7465 = vmatprep.subr.mxu0 %v8143_v3  ;;  %7467 = vmatprep.mubr.msk.f32.mxu0 %vm8144_vm5, %v8143_v3 }
 0x1f9   : > { %7472 = vmatprep.mubr.msk.f32.mxu1 %vm8144_vm5, %v8143_v3 }
 0x2b2   : > { %v8518_v21 = vpop.f32.mrb[0].mxu1 }
 0x2b3   : > { %v7429_v22 = vpop.f32.mrb[1].mxu1  ;;  %2734 = vrot.lane.b32.xlu1 %v8518_v21, %s8145_s16  ;;  %7466 = vmatpush3.xpose.msk.msra.mxu0 %vm619_vm2, %v8518_v21 }
 0x2b4   : > { %7475 = vmatprep.subr.mxu0 %v8143_v3 }
 0x2b6   : > { %v8525_v23 = vpop.f32.mrb[2].mxu1  ;;  %7468 = vmatmul.mubr.msk.f32.vlgmr.msra.gmra.mrb[10].mxu0 %vm619_vm2, %v8455_v5 }
 0x2b7   : > { %v7434_v24 = vpop.f32.mrb[3].mxu1  ;;  %7471 = vmatpush3.xpose.msk.msra.mxu1 %vm619_vm2, %v8525_v23  ;;  %7477 = vmatprep.mubr.msk.f32.mxu0 %vm8144_vm5, %v8143_v3 }
 0x2b8   : > { %7480 = vmatprep.subr.mxu1 %v8143_v3 }
 0x2ba   : > { %v8534_v25 = vpop.f32.mrb[4].mxu1  ;;  %7473 = vmatmul.mubr.msk.f32.vlgmr.msra.gmra.mrb[14].mxu1 %vm619_vm2, %v8451_v4 }
 0x2bb   : > { %v7439_v26 = vpop.f32.mrb[5].mxu1  ;;  %7476 = vmatpush3.xpose.msk.msra.mxu0 %vm619_vm2, %v8534_v25  ;;  %7482 = vmatprep.mubr.msk.f32.mxu1 %vm8144_vm5, %v8143_v3 }
 0x2bc   : > { %7485 = vmatprep.subr.mxu0 %v8143_v3 }
 0x2be   : > { %v8543_v27 = vpop.f32.mrb[6].mxu1  ;;  %7478 = vmatmul.mubr.msk.f32.vlgmr.msra.gmra.mrb[12].mxu0 %vm619_vm2, %v8463_v7 }
 0x2bf   : > { %v7444_v28 = vpop.f32.mrb[7].mxu1  ;;  %7481 = vmatpush3.xpose.msk.msra.mxu1 %vm619_vm2, %v8543_v27  ;;  %7487 = vmatprep.mubr.msk.f32.mxu0 %vm8144_vm5, %v8143_v3 }
 0x2c0   : > { %7490 = vmatprep.subr.mxu1 %v8143_v3 }
 0x2c2   : > { %v8552_v29 = vpop.f32.mrb[8].mxu1  ;;  %7483 = vmatmul.mubr.msk.f32.vlgmr.msra.gmra.mrb[16].mxu1 %vm619_vm2, %v8459_v6 }
 0x2c3   : > { %v7449_v30 = vpop.f32.mrb[9].mxu1  ;;  %7486 = vmatpush3.xpose.msk.msra.mxu0 %vm619_vm2, %v8552_v29  ;;  %7492 = vmatprep.mubr.msk.f32.mxu1 %vm8144_vm5, %v8143_v3 }
 0x2c4   : > { %7495 = vmatprep.subr.mxu0 %v8143_v3 }
 0x2c6   : > { %v8561_v31 = vpop.f32.mrb[10].mxu1  ;;  %7488 = vmatmul.mubr.msk.f32.vlgmr.msra.gmra.mrb[14].mxu0 %vm619_vm2, %v8471_v9 }
 0x2c7   : > { %v7454_v32 = vpop.f32.mrb[11].mxu1  ;;  %7491 = vmatpush3.xpose.msk.msra.mxu1 %vm619_vm2, %v8561_v31  ;;  %7497 = vmatprep.mubr.msk.f32.mxu0 %vm8144_vm5, %v8143_v3 }
 0x2c8   : > { %7500 = vmatprep.subr.mxu1 %v8143_v3 }
 0x2ca   : > { %v8570_v33 = vpop.f32.mrb[8].mxu0  ;;  %v8572_v34 = vpop.f32.mrb[12].mxu1  ;;  %7493 = vmatmul.mubr.msk.f32.vlgmr.msra.gmra.mrb[18].mxu1 %vm619_vm2, %v8467_v8 }
 0x2cb   : > { %7496 = vmatpush3.xpose.msk.msra.mxu0 %vm619_vm2, %v8570_v33  ;;  %7501 = vmatpush3.xpose.msk.msra.mxu1 %vm619_vm2, %v8572_v34  ;;  %v7459_v36 = vpop.f32.mrb[9].mxu0  ;;  %v7464_v37 = vpop.f32.mrb[13].mxu1 }
 0x2cc   : > { %7502 = vmatprep.mubr.msk.f32.mxu1 %vm8144_vm5, %v8143_v3  ;;  %7505 = vmatprep.subr.mxu0 %v8143_v3 }
 0x2cd   : > { %7510 = vmatprep.subr.mxu1 %v8143_v3 }
 0x2ce   : > { %7498 = vmatmul.mubr.msk.f32.vlgmr.msra.gmra.mrb[16].mxu0 %vm619_vm2, %v8477_v11  ;;  %7503 = vmatmul.mubr.msk.f32.vlgmr.msra.gmra.mrb[20].mxu1 %vm619_vm2, %v8475_v10 }
 0x2cf   : > { %7506 = vmatpush3.xpose.msk.msra.mxu0 %vm619_vm2, %v8552_v29  ;;  %7511 = vmatpush3.xpose.msk.msra.mxu1 %vm619_vm2, %v8561_v31 }
 0x2d0   : > { %7507 = vmatprep.mubr.msk.f32.mxu0 %vm8144_vm5, %v8143_v3  ;;  %7512 = vmatprep.mubr.msk.f32.mxu1 %vm8144_vm5, %v8143_v3 }
 0x2d1   : > { %7515 = vmatprep.subr.mxu0 %v8143_v3  ;;  %7520 = vmatprep.subr.mxu1 %v8143_v3 }
 0x2d2   : > { %7508 = vmatmul.mubr.msk.f32.vlgmr.msra.gmra.mrb[18].mxu0 %vm619_vm2, %v8455_v5  ;;  %7513 = vmatmul.mubr.msk.f32.vlgmr.msra.gmra.mrb[22].mxu1 %vm619_vm2, %v8451_v4 }
 0x2d3   : > { %7516 = vmatpush3.xpose.msk.msra.mxu0 %vm619_vm2, %v8570_v33  ;;  %7521 = vmatpush3.xpose.msk.msra.mxu1 %vm619_vm2, %v8572_v34 }
 0x2d4   : > { %7517 = vmatprep.mubr.msk.f32.mxu0 %vm8144_vm5, %v8143_v3  ;;  %7522 = vmatprep.mubr.msk.f32.mxu1 %vm8144_vm5, %v8143_v3 }
 0x2d5   : > { %7525 = vmatprep.subr.mxu0 %v8143_v3  ;;  %7530 = vmatprep.subr.mxu1 %v8143_v3 }
 0x2d6   : > { %7518 = vmatmul.mubr.msk.f32.vlgmr.msra.gmra.mrb[20].mxu0 %vm619_vm2, %v8463_v7  ;;  %7523 = vmatmul.mubr.msk.f32.vlgmr.msra.gmra.mrb[24].mxu1 %vm619_vm2, %v8459_v6 }
 0x2d7   : > { %7526 = vmatpush3.xpose.msk.msra.mxu0 %vm619_vm2, %v8518_v21  ;;  %7531 = vmatpush3.xpose.msk.msra.mxu1 %vm619_vm2, %v8525_v23 }
 0x2d8   : > { %7527 = vmatprep.mubr.msk.f32.mxu0 %vm8144_vm5, %v8143_v3  ;;  %7532 = vmatprep.mubr.msk.f32.mxu1 %vm8144_vm5, %v8143_v3 }
 0x2d9   : > { %7535 = vmatprep.subr.mxu0 %v8143_v3  ;;  %7540 = vmatprep.subr.mxu1 %v8143_v3 }
 0x2da   : > { %7528 = vmatmul.mubr.msk.f32.vlgmr.msra.gmra.mrb[22].mxu0 %vm619_vm2, %v8471_v9  ;;  %7533 = vmatmul.mubr.msk.f32.vlgmr.msra.gmra.mrb[26].mxu1 %vm619_vm2, %v8467_v8 }
 0x2db   : > { %7536 = vmatpush3.xpose.msk.msra.mxu0 %vm619_vm2, %v8534_v25  ;;  %7541 = vmatpush3.xpose.msk.msra.mxu1 %vm619_vm2, %v8543_v27 }
 0x2dc   : > { %7537 = vmatprep.mubr.msk.f32.mxu0 %vm8144_vm5, %v8143_v3  ;;  %7542 = vmatprep.mubr.msk.f32.mxu1 %vm8144_vm5, %v8143_v3 }
 0x2de   : > { %7538 = vmatmul.mubr.msk.f32.vlgmr.msra.gmra.mrb[24].mxu0 %vm619_vm2, %v8477_v11  ;;  %7543 = vmatmul.mubr.msk.f32.vlgmr.msra.gmra.mrb[28].mxu1 %vm619_vm2, %v8475_v10 }
 0x325   : > { %v2735_v39 = vpop.permute.xlu1 %2734 }
 0x326   : > { %2737 = vxpose.xlu0.b32.start.end [1/1] (short) (narrow) %v2735_v39, 16 }
 0x389   : > { %v1444_v40 = vpop.f32.mrb[10].mxu0 }
 0x38a   : > { %v8642_v41 = vmul.f32 0.25, %v1444_v40  ;;  %v7469_v42 = vpop.f32.mrb[11].mxu0 }
 0x38c   : > { %v2550_v43 = vsel %vm2549_vm7, %v8642_v41, -inf }
 0x38d   : > { %v1519_v44 = vpop.f32.mrb[14].mxu1  ;;  %2551 = vmax.xlane.f32.xlu0 %v2550_v43 }
 0x38e   : > { %v8646_v46 = vmul.f32 0.25, %v1519_v44  ;;  %v7474_v47 = vpop.f32.mrb[15].mxu1 }
 0x390   : > { %v2553_v49 = vsel %vm2549_vm7, %v8646_v46, -inf }
 0x391   : > { %2554 = vmax.xlane.f32.xlu0 %v2553_v49  ;;  %v1594_v50 = vpop.f32.mrb[12].mxu0 }
 0x392   : > { %v8650_v51 = vmul.f32 0.25, %v1594_v50  ;;  %v7479_v52 = vpop.f32.mrb[13].mxu0 }
 0x394   : > { %v2556_v54 = vsel %vm2549_vm7, %v8650_v51, -inf }
 0x395   : > { %v1669_v55 = vpop.f32.mrb[16].mxu1  ;;  %2557 = vmax.xlane.f32.xlu1 %v2556_v54 }
 0x396   : > { %v8654_v57 = vmul.f32 0.25, %v1669_v55  ;;  %v7484_v58 = vpop.f32.mrb[17].mxu1 }
 0x398   : > { %v2559_v59 = vsel %vm2549_vm7, %v8654_v57, -inf }
 0x399   : > { %2560 = vmax.xlane.f32.xlu1 %v2559_v59  ;;  %v1744_v60 = vpop.f32.mrb[14].mxu0 }
 0x39a   : > { %v8658_v61 = vmul.f32 0.25, %v1744_v60  ;;  %v7489_v62 = vpop.f32.mrb[15].mxu0 }
 0x39c   : > { %v2562_v1 = vsel %vm2549_vm7, %v8658_v61, -inf }
 0x39d   : > { %v1819_v2 = vpop.f32.mrb[18].mxu1  ;;  %2563 = vmax.xlane.f32.xlu1 %v2562_v1 }
 0x39e   : > { %v8662_v4 = vmul.f32 0.25, %v1819_v2  ;;  %v7494_v5 = vpop.f32.mrb[19].mxu1 }
 0x3a0   : > { %v2565_v6 = vsel %vm2549_vm7, %v8662_v4, -inf }
 0x3a1   : > { %v1969_v7 = vpop.f32.mrb[20].mxu1  ;;  %2566 = vmax.xlane.f32.xlu0 %v2565_v6  ;;  %v1894_v8 = vpop.f32.mrb[16].mxu0 }
 0x3a2   : > { %v8666_v9 = vmul.f32 0.25, %v1894_v8  ;;  %v7499_v10 = vpop.f32.mrb[17].mxu0  ;;  %v7504_v11 = vpop.f32.mrb[21].mxu1  ;;  %v8668_v12 = vmul.f32 0.25, %v1969_v7 }
 0x3a4   : > { %v2568_v13 = vsel %vm2549_vm7, %v8666_v9, -inf  ;;  %v2571_v21 = vsel %vm2549_vm7, %v8668_v12, -inf }
 0x3a5   : > { %v2117_v14 = vpop.f32.mrb[22].mxu1  ;;  %2569 = vmax.xlane.f32.xlu0 %v2568_v13  ;;  %v2047_v15 = vpop.f32.mrb[18].mxu0 }
 0x3a6   : > { %v8672_v16 = vmul.f32 0.25, %v2047_v15  ;;  %v7509_v17 = vpop.f32.mrb[19].mxu0  ;;  %v7514_v18 = vpop.f32.mrb[23].mxu1  ;;  %v8676_v20 = vmul.f32 0.25, %v2117_v14 }
 0x3a7   : > { %v8674_v19 = vpop.trf.xlu0 }
 0x3a8   : > { %v2638_v22 = vsel %vm2549_vm7, %v8672_v16, -inf  ;;  %7547 = vmatprep.mubr.msk.f32.mxu0 %vm2549_vm7, %v8674_v19  ;;  %v2641_v36 = vsel %vm2549_vm7, %v8676_v20, -inf }
 0x3a9   : > { %v2257_v24 = vpop.f32.mrb[24].mxu1  ;;  %2572 = vmax.xlane.f32.xlu0 %v2571_v21  ;;  %2639 = vmax.xlane.f32.xlu1 %v2638_v22  ;;  %v2187_v26 = vpop.f32.mrb[20].mxu0 }
 0x3aa   : > { %v7519_v28 = vpop.f32.mrb[21].mxu0  ;;  %v7524_v30 = vpop.f32.mrb[25].mxu1  ;;  %v8684_v32 = vmul.f32 0.25, %v2187_v26  ;;  %v8690_v44 = vmul.f32 0.25, %v2257_v24 }
 0x3ac   : > { %v2644_v47 = vsel %vm2549_vm7, %v8684_v32, -inf  ;;  %v2647_v58 = vsel %vm2549_vm7, %v8690_v44, -inf }
 0x3ad   : > { %v2397_v37 = vpop.f32.mrb[26].mxu1  ;;  %2642 = vmax.xlane.f32.xlu1 %v2641_v36  ;;  %v2327_v39 = vpop.f32.mrb[22].mxu0 }
 0x3ae   : > { %v8688_v40 = vmul.f32 0.25, %v2327_v39  ;;  %v7529_v42 = vpop.f32.mrb[23].mxu0  ;;  %v7534_v43 = vpop.f32.mrb[27].mxu1  ;;  %v8710_v59 = vmul.f32 0.25, %v2397_v37 }
 0x3b0   : > { %v2650_v49 = vsel %vm2549_vm7, %v8688_v40, -inf }
 0x3b1   : > { %v2537_v50 = vpop.f32.mrb[28].mxu1  ;;  %2645 = vmax.xlane.f32.xlu1 %v2644_v47  ;;  %2651 = vmax.xlane.f32.xlu0 %v2650_v49  ;;  %v2467_v52 = vpop.f32.mrb[24].mxu0 }
 0x3b2   : > { %v7539_v54 = vpop.f32.mrb[25].mxu0  ;;  %v7544_v55 = vpop.f32.mrb[29].mxu1  ;;  %v8712_v60 = vmul.f32 0.25, %v2467_v52 }
 0x3b5   : > { %2648 = vmax.xlane.f32.xlu1 %v2647_v58 }
 0x3c6   : > { %2972 = vrot.lane.b32.xlu1 %v8534_v25, %s8145_s16  ;;  %v2653_v25 = vsel %vm2549_vm7, %v8710_v59, -inf }
 0x3c7   : > { %2853 = vrot.lane.b32.xlu0 %v8525_v23, %s8145_s16  ;;  %v8716_v23 = vmul.f32 0.25, %v2537_v50 }
 0x3ca   : > { %3210 = vrot.lane.b32.xlu1 %v8552_v29, %s8145_s16  ;;  %v2656_v29 = vsel %vm2549_vm7, %v8712_v60, -inf }
 0x3cb   : > { %3091 = vrot.lane.b32.xlu0 %v8543_v27, %s8145_s16  ;;  %v2659_v27 = vsel %vm2549_vm7, %v8716_v23, -inf }
 0x3ce   : > { %3329 = vrot.lane.b32.xlu1 %v8561_v31, %s8145_s16  ;;  %v8722_v31 = vpop.trf.xlu0 }
 0x3d2   : > { %3567 = vrot.lane.b32.xlu1 %v8572_v34, %s8145_s16 }
 0x3ea   : > { %2654 = vmax.xlane.f32.xlu0 %v2653_v25 }
 0x3ee   : > { %2657 = vmax.xlane.f32.xlu0 %v2656_v29 }
 0x3f2   : > { %2660 = vmax.xlane.f32.xlu0 %v2659_v27 }
 0x41a   : > { %v2552_v34 = vpop.xlane.xlu0 %2551 }
 0x41b   : > { %v2574_v62 = vsub.f32 %v8642_v41, %v2552_v34 }
 0x41d   : > { %v2582_v1 = vmul.f32 1.442695, %v2574_v62 }
 0x41e   : > { %v2555_v2 = vpop.xlane.xlu0 %2554 }
 0x41f   : > { %8020 = vpow2.f32 %v2582_v1  ;;  %v2575_v5 = vsub.f32 %v8646_v46, %v2555_v2 }
 0x421   : > { %v2584_v6 = vmul.f32 1.442695, %v2575_v5 }
 0x422   : > { %v2558_v7 = vpop.xlane.xlu1 %2557 }
 0x423   : > { %8022 = vpow2.f32 %v2584_v6  ;;  %v2576_v8 = vsub.f32 %v8650_v51, %v2558_v7 }
 0x425   : > { %v2586_v10 = vmul.f32 1.442695, %v2576_v8 }
 0x426   : > { %v2561_v11 = vpop.xlane.xlu1 %2560 }
 0x427   : > { %8024 = vpow2.f32 %v2586_v10 }
 0x429   : > { %v8727_v13 = vpop.eup %8020 }
 0x42a   : > { %v2564_v14 = vpop.xlane.xlu1 %2563  ;;  %v2598_v15 = vsel %vm2549_vm7, %v8727_v13, 0.0 }
 0x42b   : > { %v2578_v41 = vsub.f32 %v8658_v61, %v2564_v14  ;;  %2599 = vadd.xlane.f32.xlu1 %v2598_v15  ;;  %v2577_v14 = vsub.f32 %v8654_v57, %v2561_v11 }
 0x42d   : > { %v8732_v17 = vpop.eup %8022  ;;  %v2590_v46 = vmul.f32 1.442695, %v2578_v41 }
 0x42e   : > { %v2567_v18 = vpop.xlane.xlu0 %2566  ;;  %v2601_v21 = vsel %vm2549_vm7, %v8732_v17, 0.0 }
 0x42f   : > { %8026 = vpow2.f32 %v2590_v46  ;;  %v2579_v51 = vsub.f32 %v8662_v4, %v2567_v18  ;;  %2602 = vadd.xlane.f32.xlu0 %v2601_v21 }
 0x431   : > { %v8737_v22 = vpop.eup %8024  ;;  %v2592_v24 = vmul.f32 1.442695, %v2579_v51 }
 0x432   : > { %v2604_v26 = vsel %vm2549_vm7, %v8737_v22, 0.0  ;;  %v2570_v61 = vpop.xlane.xlu0 %2569 }
 0x433   : > { %8028 = vpow2.f32 %v2592_v24  ;;  %2605 = vadd.xlane.f32.xlu1 %v2604_v26 }
 0x436   : > { %v2573_v30 = vpop.xlane.xlu0 %2572  ;;  %v2640_v50 = vpop.xlane.xlu1 %2639 }
 0x437   : > { %v2581_v41 = vsub.f32 %v8668_v12, %v2573_v30  ;;  %v2662_v46 = vsub.f32 %v8672_v16, %v2640_v50 }
 0x439   : > { %v8741_v28 = vpop.eup %8026  ;;  %v2596_v18 = vmul.f32 1.442695, %v2581_v41  ;;  %v2670_v21 = vmul.f32 1.442695, %v2662_v46 }
 0x43a   : > { %v2610_v36 = vsel %vm2549_vm7, %v8741_v28, 0.0  ;;  %v8754_v52 = vpop.xlane.xlu1 %2642 }
 0x43b   : > { %2611 = vadd.xlane.f32.xlu0 %v2610_v36  ;;  %v2663_v50 = vsub.f32 %v8676_v20, %v8754_v52 }
 0x43d   : > { %v8745_v37 = vpop.eup %8028 }
 0x43e   : > { %v2652_v4 = vpop.xlane.xlu0 %2651  ;;  %v2613_v39 = vsel %vm2549_vm7, %v8745_v37, 0.0  ;;  %v8756_v54 = vpop.xlane.xlu1 %2645 }
 0x43f   : > { %v2666_v42 = vsub.f32 %v8688_v40, %v2652_v4  ;;  %2614 = vadd.xlane.f32.xlu0 %v2613_v39 }
 0x441   : > { %v2678_v43 = vmul.f32 1.442695, %v2666_v42 }
 0x442   : > { %v8758_v55 = vpop.xlane.xlu1 %2648  ;;  %v2854_v58 = vpop.permute.xlu0 %2853 }
 0x443   : > { %8030 = vpow2.f32 %v2678_v43 }
 0x446   : > { %v2973_v25 = vpop.permute.xlu1 %2972  ;;  %v3092_v40 = vpop.permute.xlu0 %3091 }
 0x44a   : > { %v3211_v29 = vpop.permute.xlu1 %3210 }
 0x44d   : > { %v8750_v47 = vpop.eup %8030 }
 0x44e   : > { %v2698_v49 = vsel %vm2549_vm7, %v8750_v47, 0.0 }
 0x44f   : > { %2699 = vadd.xlane.f32.xlu1 %v2698_v49 }
 0x46c   : > { %2975 = vxpose.xlu0.b32.start.end [1/1] (short) (narrow) %v2973_v25, 16 }
 0x471   : > { %3094 = vxpose.xlu0.b32.start.end [1/1] (short) (narrow) %v3092_v40, 16 }
 0x476   : > { %3213 = vxpose.xlu0.b32.start.end [1/1] (short) (narrow) %v3211_v29, 16 }
 0x477   : > { %v2655_v27 = vpop.xlane.xlu0 %2654 }
 0x478   : > { %v2667_v34 = vsub.f32 %v8710_v59, %v2655_v27  ;;  %v2580_v59 = vsub.f32 %v8666_v9, %v2570_v61  ;;  %v3330_v61 = vpop.permute.xlu1 %3329  ;;  %v2672_v27 = vmul.f32 1.442695, %v2663_v50 }
 0x47a   : > { %v2680_v62 = vmul.f32 1.442695, %v2667_v34  ;;  %v2594_v15 = vmul.f32 1.442695, %v2580_v59  ;;  %v2664_v34 = vsub.f32 %v8684_v32, %v8756_v54 }
 0x47b   : > { %v2658_v1 = vpop.xlane.xlu0 %2657 }
 0x47c   : > { %8032 = vpow2.f32 %v2680_v62  ;;  %v2668_v2 = vsub.f32 %v8712_v60, %v2658_v1  ;;  %v2588_v60 = vmul.f32 1.442695, %v2577_v14  ;;  %v8790_v30 = vpop.permute.xlu1 %3567 }
 0x47e   : > { %v2682_v5 = vmul.f32 1.442695, %v2668_v2 }
 0x47f   : > { %v2661_v36 = vpop.xlane.xlu0 %2660 }
 0x480   : > { %8034 = vpow2.f32 %v2682_v5 }
 0x481   : > { %8036 = vpow2.f32 %v2594_v15 }
 0x482   : > { %8038 = vpow2.f32 %v2588_v60 }
 0x483   : > { %8040 = vpow2.f32 %v2596_v18 }
 0x484   : > { %8042 = vpow2.f32 %v2670_v21 }
 0x486   : > { %v8762_v6 = vpop.eup %8032 }
 0x487   : > { %v2701_v7 = vsel %vm2549_vm7, %v8762_v6, 0.0 }
 0x488   : > { %2702 = vadd.xlane.f32.xlu1 %v2701_v7 }
 0x48a   : > { %v8766_v8 = vpop.eup %8034 }
 0x48b   : > { %v2704_v10 = vsel %vm2549_vm7, %v8766_v8, 0.0  ;;  %v8774_v51 = vpop.eup %8036 }
 0x48c   : > { %2705 = vadd.xlane.f32.xlu1 %v2704_v10  ;;  %v2616_v24 = vsel %vm2549_vm7, %v8774_v51, 0.0  ;;  %v8778_v9 = vpop.eup %8038 }
 0x48d   : > { %v2607_v57 = vsel %vm2549_vm7, %v8778_v9, 0.0  ;;  %v8782_v11 = vpop.eup %8040 }
 0x48e   : > { %v2619_v12 = vsel %vm2549_vm7, %v8782_v11, 0.0  ;;  %v8786_v16 = vpop.eup %8042 }
 0x48f   : > { %v2686_v26 = vsel %vm2549_vm7, %v8786_v16, 0.0 }
 0x4a7   : > { %2617 = vadd.xlane.f32.xlu0 %v2616_v24 }
 0x4ab   : > { %2608 = vadd.xlane.f32.xlu0 %v2607_v57 }
 0x4af   : > { %2620 = vadd.xlane.f32.xlu0 %v2619_v12 }
 0x4b3   : > { %2687 = vadd.xlane.f32.xlu0 %v2686_v26 }
 0x4b8   : > { %v2600_v4 = vpop.xlane.xlu1 %2599 }
 0x4b9   : > { %8044 = vrcp.f32 %v2600_v4 }
 0x4bc   : > { %v2603_v39 = vpop.xlane.xlu0 %2602 }
 0x4bf   : > { %2856 = vxpose.xlu1.b32.start.end [1/1] (short) (narrow) %v2854_v58, 16 }
 0x4c0   : > { %v2606_v46 = vpop.xlane.xlu1 %2605 }
 0x4c3   : > { %v8045_v49 = vpop.eup %8044 }
 0x4c4   : > { %v2623_v58 = vmul.f32 %v8045_v49, %v8727_v13  ;;  %v2674_v13 = vmul.f32 1.442695, %v2664_v34 }
 0x4c8   : > { %v2612_v42 = vpop.xlane.xlu0 %2611 }
 0x4c9   : > { %8046 = vrcp.f32 %v2612_v42  ;;  %3448 = vrot.lane.b32.xlu0 %v8570_v33, %s8145_s16 }
 0x4ca   : > { %8048 = vrcp.f32 %v2603_v39 }
 0x4cc   : > { %v2615_v43 = vpop.xlane.xlu0 %2614 }
 0x4cd   : > { %8050 = vrcp.f32 %v2615_v43 }
 0x4ce   : > { %8052 = vpow2.f32 %v2672_v27 }
 0x4cf   : > { %8054 = vpow2.f32 %v2674_v13 }
 0x4d3   : > { %v8047_v25 = vpop.eup %8046 }
 0x4d4   : > { %v2631_v40 = vmul.f32 %v8047_v25, %v8741_v28  ;;  %v8049_v29 = vpop.eup %8048  ;;  %v2665_v28 = vsub.f32 %v8690_v44, %v8758_v55 }
 0x4d5   : > { %v2625_v1 = vmul.f32 %v8049_v29, %v8732_v17  ;;  %v2669_v17 = vsub.f32 %v8716_v23, %v2661_v36 }
 0x4d6   : > { %v8800_v62 = vsub.f32 %v2623_v58, %v2631_v40  ;;  %v2676_v32 = vmul.f32 1.442695, %v2665_v28 }
 0x4d7   : > { %v8051_v33 = vpop.eup %8050 }
 0x4d8   : > { %7545 = vmatprep.subr.msk.mxu0 %vm2549_vm7, %v8800_v62  ;;  %v2633_v20 = vmul.f32 %v8051_v33, %v8745_v37  ;;  %8056 = vpow2.f32 %v2676_v32  ;;  %v2684_v37 = vmul.f32 1.442695, %v2669_v17  ;;  %v8819_v54 = vpop.eup %8052 }
 0x4d9   : > { %7546 = vmatpush3.xpose.msk.msra.mxu0 %vm2549_vm7, %v8800_v62  ;;  %v2689_v44 = vsel %vm2549_vm7, %v8819_v54, 0.0  ;;  %v8823_v55 = vpop.eup %8054 }
 0x4da   : > { %v8810_v52 = vsub.f32 %v2625_v1, %v2633_v20  ;;  %8058 = vpow2.f32 %v2684_v37  ;;  %v2692_v2 = vsel %vm2549_vm7, %v8823_v55, 0.0 }
 0x4db   : > { %8060 = vrcp.f32 %v2606_v46 }
 0x4dc   : > { %7548 = vmatmul.mubr.msk.f32.vlgmr.msra.gmra.mrb[26].mxu0 %vm2549_vm7, %v8722_v31  ;;  %7550 = vmatprep.subr.msk.mxu1 %vm2549_vm7, %v8810_v52  ;;  %v2700_v21 = vpop.xlane.xlu1 %2699 }
 0x4dd   : > { %7551 = vmatpush3.xpose.msk.msra.mxu1 %vm2549_vm7, %v8810_v52 }
 0x4e2   : > { %v8827_v5 = vpop.eup %8056 }
 0x4e3   : > { %v2695_v23 = vsel %vm2549_vm7, %v8827_v5, 0.0 }
 0x4e4   : > { %v8835_v10 = vpop.eup %8058 }
 0x4e5   : > { %v2707_v59 = vsel %vm2549_vm7, %v8835_v10, 0.0  ;;  %v8061_v4 = vpop.eup %8060 }
 0x4e6   : > { %v2627_v43 = vmul.f32 %v8061_v4, %v8737_v22 }
 0x4e8   : > { %2690 = vadd.xlane.f32.xlu0 %v2689_v44 }
 0x4ec   : > { %2693 = vadd.xlane.f32.xlu0 %v2692_v2  ;;  %v8829_v7 = vpop.trf.xlu0 }
 0x4ed   : > { %7557 = vmatprep.mubr.msk.f32.mxu0 %vm2549_vm7, %v8829_v7 }
 0x4f0   : > { %2696 = vadd.xlane.f32.xlu0 %v2695_v23  ;;  %v8839_v14 = vpop.trf.xlu0 }
 0x4f4   : > { %2708 = vadd.xlane.f32.xlu0 %v2707_v59  ;;  %v8841_v15 = vpop.trf.xlu0 }
 0x4f8   : > { %v8843_v60 = vpop.trf.xlu0 }
 0x4fc   : > { %v8845_v41 = vpop.trf.xlu0 }
 0x500   : > { %v8847_v18 = vpop.trf.xlu0 }
 0x515   : > { %v2703_v57 = vpop.xlane.xlu1 %2702 }
 0x519   : > { %v2706_v26 = vpop.xlane.xlu1 %2705 }
 0x521   : > { %3332 = vxpose.xlu0.b32.start.end [1/1] (short) (narrow) %v3330_v61, 16 }
 0x534   : > { %v2618_v24 = vpop.xlane.xlu0 %2617 }
 0x535   : > { %8062 = vrcp.f32 %v2618_v24 }
 0x538   : > { %v2609_v12 = vpop.xlane.xlu0 %2608 }
 0x539   : > { %8064 = vrcp.f32 %v2609_v12 }
 0x53c   : > { %v2621_v36 = vpop.xlane.xlu0 %2620 }
 0x53d   : > { %8066 = vrcp.f32 %v2621_v36 }
 0x53e   : > { %8068 = vrcp.f32 %v2700_v21 }
 0x53f   : > { %v8063_v39 = vpop.eup %8062  ;;  %v8849_v61 = vpop.trf.xlu1 }
 0x540   : > { %v2688_v42 = vpop.xlane.xlu0 %2687  ;;  %7552 = vmatprep.mubr.msk.f32.mxu1 %vm2549_vm7, %v8849_v61  ;;  %v2635_v49 = vmul.f32 %v8063_v39, %v8774_v51 }
 0x541   : > { %8070 = vrcp.f32 %v2688_v42 }
 0x542   : > { %v8855_v50 = vsub.f32 %v2627_v43, %v2635_v49  ;;  %8072 = vrcp.f32 %v2703_v57 }
 0x543   : > { %v8857_v25 = vpop.trf.xlu1  ;;  %v8065_v40 = vpop.eup %8064 }
 0x544   : > { %7553 = vmatmul.mubr.msk.f32.vlgmr.msra.gmra.mrb[30].mxu1 %vm2549_vm7, %v8857_v25  ;;  %7555 = vmatprep.subr.msk.mxu0 %vm2549_vm7, %v8855_v50  ;;  %v3449_v58 = vpop.permute.xlu0 %3448  ;;  %v2629_v51 = vmul.f32 %v8065_v40, %v8778_v9 }
 0x545   : > { %7556 = vmatpush3.xpose.msk.msra.mxu0 %vm2549_vm7, %v8855_v50  ;;  %7562 = vmatprep.mubr.msk.f32.mxu1 %vm2549_vm7, %v8841_v15 }
 0x546   : > { %3451 = vxpose.xlu0.b32.start.end [1/1] (short) (narrow) %v3449_v58, 16 }
 0x547   : > { %v8067_v22 = vpop.eup %8066 }
 0x548   : > { %7558 = vmatmul.mubr.msk.f32.vlgmr.msra.gmra.mrb[28].mxu0 %vm2549_vm7, %v8839_v14  ;;  %v2637_v29 = vmul.f32 %v8067_v22, %v8782_v11  ;;  %v8069_v27 = vpop.eup %8068 }
 0x549   : > { %7567 = vmatprep.mubr.msk.f32.mxu0 %vm2549_vm7, %v8845_v41  ;;  %v2719_v20 = vmul.f32 %v8069_v27, %v8750_v47 }
 0x54a   : > { %v8873_v34 = vsub.f32 %v2629_v51, %v2637_v29 }
 0x54b   : > { %v8071_v33 = vpop.eup %8070  ;;  %3570 = vxpose.xlu0.b32.start.end [1/1] (short) (narrow) %v8790_v30, 16 }
 0x54c   : > { %7560 = vmatprep.subr.msk.mxu1 %vm2549_vm7, %v8873_v34  ;;  %v2711_v1 = vmul.f32 %v8071_v33, %v8786_v16  ;;  %v8073_v30 = vpop.eup %8072 }
 0x54d   : > { %7561 = vmatpush3.xpose.msk.msra.mxu1 %vm2549_vm7, %v8873_v34  ;;  %v2721_v17 = vmul.f32 %v8073_v30, %v8762_v6 }
 0x54e   : > { %v2730_v9 = vadd.f32 %v2719_v20, %v2711_v1 }
 0x550   : > { %7563 = vmatmul.mubr.msk.f32.vlgmr.msra.gmra.mrb[32].mxu1 %vm2549_vm7, %v8843_v60  ;;  %7565 = vmatprep.subr.msk.mxu0 %vm2549_vm7, %v2730_v9 }
 0x551   : > { %7566 = vmatpush3.xpose.msk.msra.mxu0 %vm2549_vm7, %v2730_v9 }
 0x554   : > { %7568 = vmatmul.mubr.msk.f32.vlgmr.msra.gmra.mrb[30].mxu0 %vm2549_vm7, %v8847_v18 }
 0x575   : > { %v2691_v11 = vpop.xlane.xlu0 %2690 }
 0x576   : > { %8074 = vrcp.f32 %v2691_v11 }
 0x577   : > { %8076 = vrcp.f32 %v2706_v26 }
 0x579   : > { %v2694_v16 = vpop.xlane.xlu0 %2693 }
 0x57a   : > { %8078 = vrcp.f32 %v2694_v16 }
 0x57d   : > { %v2697_v47 = vpop.xlane.xlu0 %2696 }
 0x57e   : > { %8080 = vrcp.f32 %v2697_v47 }
 0x580   : > { %v8075_v13 = vpop.eup %8074 }
 0x581   : > { %v2709_v28 = vpop.xlane.xlu0 %2708  ;;  %v2713_v32 = vmul.f32 %v8075_v13, %v8819_v54  ;;  %v8077_v37 = vpop.eup %8076  ;;  %v8146_v13 = vmov 0.0|0.0  }
 0x582   : > { %8082 = vrcp.f32 %v2709_v28  ;;  %v2723_v59 = vmul.f32 %v8077_v37, %v8766_v8 }
 0x583   : > { %v2731_v44 = vadd.f32 %v2721_v17, %v2713_v32 }
 0x584   : > { %v8079_v2 = vpop.eup %8078 }
 0x585   : > { %7570 = vmatprep.subr.msk.mxu1 %vm2549_vm7, %v2731_v44  ;;  %v2715_v23 = vmul.f32 %v8079_v2, %v8823_v55 }
 0x586   : > { %7571 = vmatpush3.xpose.msk.msra.mxu1 %vm2549_vm7, %v2731_v44 }
 0x587   : > { %v2732_v46 = vadd.f32 %v2723_v59, %v2715_v23 }
 0x588   : > { %v8081_v21 = vpop.eup %8080 }
 0x589   : > { %7575 = vmatprep.subr.msk.mxu0 %vm2549_vm7, %v2732_v46  ;;  %v2717_v54 = vmul.f32 %v8081_v21, %v8827_v5 }
 0x58a   : > { %7576 = vmatpush3.xpose.msk.msra.mxu0 %vm2549_vm7, %v2732_v46 }
 0x58b   : > { %7585 = vmatprep.subr.msk.mxu0 %vm2549_vm7, %v8800_v62 }
 0x58c   : > { %v8083_v6 = vpop.eup %8082 }
 0x58d   : > { %v2725_v24 = vmul.f32 %v8083_v6, %v8835_v10 }
 0x58f   : > { %v2733_v57 = vadd.f32 %v2725_v24, %v2717_v54  ;;  %v8112_v54 = vld [vmem:[%s9592_s12 + $0x8] sm:$0xff] }
 0x591   : > { %7580 = vmatprep.subr.msk.mxu1 %vm2549_vm7, %v2733_v57 }
 0x5a1   : > { %v3348_v8 = vpop.trf.xlu0 }
 0x5a2   : > { %7572 = vmatprep.mubr.msk.f32.mxu1 %vm2549_vm7, %v3348_v8 }
 0x5a5   : > { %v3349_v55 = vpop.trf.xlu0 }
 0x5a6   : > { %7573 = vmatmul.mubr.msk.f32.vlgmr.msra.gmra.mrb[34].mxu1 %vm2549_vm7, %v3349_v55 }
 0x5a7   : > { %7581 = vmatpush3.xpose.msk.msra.mxu1 %vm2549_vm7, %v2733_v57 }
 0x5a8   : > { %7590 = vmatprep.subr.msk.mxu1 %vm2549_vm7, %v8810_v52 }
 0x5af   : > { %v7549_v12 = vpop.f32.mrb[26].mxu0 }
 0x5b0   : > { %v8906_v26 = vpop.f32.mrb[27].mxu0 }
 0x5c6   : > { %v3467_v5 = vpop.trf.xlu0 }
 0x5c7   : > { %7577 = vmatprep.mubr.msk.f32.mxu0 %vm2549_vm7, %v3467_v5 }
 0x5ca   : > { %v3468_v10 = vpop.trf.xlu0 }
 0x5cb   : > { %7578 = vmatmul.mubr.msk.f32.vlgmr.msra.gmra.mrb[32].mxu0 %vm2549_vm7, %v3468_v10 }
 0x5cc   : > { %7586 = vmatpush3.xpose.msk.msra.mxu0 %vm2549_vm7, %v8800_v62  ;;  %7587 = vmatprep.mubr.msk.f32.mxu0 %vm2549_vm7, %v8845_v41 }
 0x5cd   : > { %7595 = vmatprep.subr.msk.mxu0 %vm2549_vm7, %v8855_v50 }
 0x5ce   : > { %v3586_v36 = vpop.trf.xlu0 }
 0x5cf   : > { %7582 = vmatprep.mubr.msk.f32.mxu1 %vm2549_vm7, %v3586_v36  ;;  %7588 = vmatmul.mubr.msk.f32.vlgmr.msra.gmra.mrb[34].mxu0 %vm2549_vm7, %v8847_v18 }
 0x5d0   : > { %7596 = vmatpush3.xpose.msk.msra.mxu0 %vm2549_vm7, %v8855_v50  ;;  %7597 = vmatprep.mubr.msk.f32.mxu0 %vm2549_vm7, %v3467_v5 }
 0x5d1   : > { %7605 = vmatprep.subr.msk.mxu0 %vm2549_vm7, %v2730_v9 }
 0x5d2   : > { %v3587_v62 = vpop.trf.xlu0 }
 0x5d3   : > { %7583 = vmatmul.mubr.msk.f32.vlgmr.msra.gmra.mrb[36].mxu1 %vm2549_vm7, %v3587_v62  ;;  %7598 = vmatmul.mubr.msk.f32.vlgmr.msra.gmra.mrb[36].mxu0 %vm2549_vm7, %v3468_v10 }
 0x5d4   : > { %7591 = vmatpush3.xpose.msk.msra.mxu1 %vm2549_vm7, %v8810_v52  ;;  %7606 = vmatpush3.xpose.msk.msra.mxu0 %vm2549_vm7, %v2730_v9 }
 0x5d5   : > { %7592 = vmatprep.mubr.msk.f32.mxu1 %vm2549_vm7, %v3348_v8  ;;  %7600 = vmatprep.subr.msk.mxu1 %vm2549_vm7, %v8873_v34 }
 0x5d6   : > { %7607 = vmatprep.mubr.msk.f32.mxu0 %vm2549_vm7, %v8674_v19  ;;  %7615 = vmatprep.subr.msk.mxu0 %vm2549_vm7, %v2732_v46  ;;  %v4303_v19 = vld [vmem:[%s8228_s28 + $0x8] sm:$0xff] }
 0x5d7   : > { %7593 = vmatmul.mubr.msk.f32.vlgmr.msra.gmra.mrb[38].mxu1 %vm2549_vm7, %v3349_v55  ;;  %7608 = vmatmul.mubr.msk.f32.vlgmr.msra.gmra.mrb[34].mxu0 %vm2549_vm7, %v8722_v31 }
 0x5d8   : > { %7601 = vmatpush3.xpose.msk.msra.mxu1 %vm2549_vm7, %v8873_v34  ;;  %7616 = vmatpush3.xpose.msk.msra.mxu0 %vm2549_vm7, %v2732_v46  ;;  %v7074_v46 = vld [vmem:[%s9599_s29] ss:$0 sm:$0xff] }
 0x5d9   : > { %7602 = vmatprep.mubr.msk.f32.mxu1 %vm2549_vm7, %v3586_v36  ;;  %7610 = vmatprep.subr.msk.mxu1 %vm2549_vm7, %v2731_v44 }
 0x5da   : > { %7617 = vmatprep.mubr.msk.f32.mxu0 %vm2549_vm7, %v8829_v7  ;;  %7625 = vmatprep.subr.mxu0 %v4303_v19 }
 0x5db   : > { %7603 = vmatmul.mubr.msk.f32.vlgmr.msra.gmra.mrb[40].mxu1 %vm2549_vm7, %v3587_v62  ;;  %7618 = vmatmul.mubr.msk.f32.vlgmr.msra.gmra.mrb[36].mxu0 %vm2549_vm7, %v8839_v14 }
 0x5dc   : > { %7611 = vmatpush3.xpose.msk.msra.mxu1 %vm2549_vm7, %v2731_v44  ;;  %7612 = vmatprep.mubr.msk.f32.mxu1 %vm2549_vm7, %v8849_v61 }
 0x5dd   : > { %7620 = vmatprep.subr.msk.mxu1 %vm2549_vm7, %v2733_v57  ;;  %7626 = vmatpush3.msra.mxu0 %v4303_v19 }
 0x5df   : > { %7613 = vmatmul.mubr.msk.f32.vlgmr.msra.gmra.mrb[38].mxu1 %vm2549_vm7, %v8857_v25 }
 0x5e0   : > { %7621 = vmatpush3.xpose.msk.msra.mxu1 %vm2549_vm7, %v2733_v57  ;;  %7622 = vmatprep.mubr.msk.f32.mxu1 %vm2549_vm7, %v8841_v15  ;;  %v8113_v57 = vld [vmem:[%s9592_s12] sm:$0xff] }
 0x5e1   : > { %7903 = vmatprep.subr.bf16.mxu1 %v8146_v13 }
 0x5e3   : > { %7623 = vmatmul.mubr.msk.f32.vlgmr.msra.gmra.mrb[40].mxu1 %vm2549_vm7, %v8843_v60  ;;  %v4302_v60 = vld [vmem:[%s8228_s28] sm:$0xff] }
 0x5e4   : > { %7661 = vmatprep.mubr.msk.f32.mxu1 %vm8144_vm5, %v8143_v3  ;;  %7639 = vmatprep.subr.mxu0 %v4302_v60 }
 0x617   : > { %v7554_v31 = vpop.f32.mrb[30].mxu1 }
 0x618   : > { %v2963_v52 = vpop.f32.mrb[31].mxu1 }
 0x61b   : > { %v7559_v7 = vpop.f32.mrb[28].mxu0 }
 0x61c   : > { %v3082_v14 = vpop.f32.mrb[29].mxu0 }
 0x623   : > { %v7564_v41 = vpop.f32.mrb[32].mxu1 }
 0x624   : > { %v3201_v18 = vpop.f32.mrb[33].mxu1 }
 0x627   : > { %v7569_v4 = vpop.f32.mrb[30].mxu0 }
 0x628   : > { %v4287_v39 = vsub.f32 %v7549_v12, %v7569_v4  ;;  %v3320_v61 = vpop.f32.mrb[31].mxu0 }
 0x629   : > { %v4286_v15 = vsub.f32 %v8906_v26, %v3320_v61 }
 0x62a   : > { %7627 = vmatprep.mubr.msk.f32.mxu0 %vm781_vm6, %v4287_v39  ;;  %v8117_v39 = vld [vmem:[%s9592_s12 + $0x20] sm:$0xff] }
 0x679   : > { %v7574_v42 = vpop.f32.mrb[34].mxu1 }
 0x67a   : > { %v4289_v43 = vsub.f32 %v7554_v31, %v7574_v42  ;;  %v3439_v49 = vpop.f32.mrb[35].mxu1 }
 0x67b   : > { %v4288_v50 = vsub.f32 %v2963_v52, %v3439_v49  ;;  %v8114_v52 = vld [vmem:[%s9592_s12 + $0x18] sm:$0xff] }
 0x67c   : > { %7628 = vmatmul.mubr.msk.f32.vlgmr.msra.gmra.mrb[38].mxu0 %vm781_vm6, %v4289_v43  ;;  %v9016_v43 = vld [vmem:[%s9581_s1] sm:$0xff]  ;;  %v8118_v49 = vld [vmem:[%s9592_s12 + $0x38] sm:$0xff] }
 0x67d   : > { %7640 = vmatpush3.msra.mxu0 %v4302_v60 }
 0x67e   : > { %7915 = vmatprep.subr.bf16.mxu0 %v8146_v13 }
 0x69e   : > { %v7579_v25 = vpop.f32.mrb[32].mxu0 }
 0x69f   : > { %v4291_v58 = vsub.f32 %v7559_v7, %v7579_v25  ;;  %v3558_v40 = vpop.f32.mrb[33].mxu0  ;;  %v8119_v25 = vld [vmem:[%s9592_s12 + $0x30] sm:$0xff] }
 0x6a0   : > { %v4290_v22 = vsub.f32 %v3082_v14, %v3558_v40  ;;  %v8115_v14 = vld [vmem:[%s9592_s12 + $0x10] sm:$0xff] }
 0x6a1   : > { %7630 = vmatprep.mubr.msk.f32.mxu0 %vm781_vm6, %v4291_v58 }
 0x6a6   : > { %v7584_v51 = vpop.f32.mrb[36].mxu1 }
 0x6a7   : > { %v4293_v29 = vsub.f32 %v7564_v41, %v7584_v51  ;;  %v3677_v27 = vpop.f32.mrb[37].mxu1  ;;  %v9035_v51 = vld [vmem:[%s9600_s17] sm:$0xff] }
 0x6a8   : > { %v4292_v34 = vsub.f32 %v3201_v18, %v3677_v27  ;;  %v8116_v18 = vld [vmem:[%s9592_s12 + $0x28] sm:$0xff] }
 0x6a9   : > { %7631 = vmatmul.mubr.msk.f32.gmra.mrb[40].mxu0 %vm781_vm6, %v4293_v29  ;;  %v9042_v27 = vld [vmem:[%s9600_s17 + $0x8] sm:$0xff] }
 0x6aa   : > { %v7609_v33 = vpop.f32.mrb[34].mxu0 }
 0x6ab   : > { %v4052_v1 = vpop.f32.mrb[35].mxu0  ;;  %7633 = vmatprep.mubr.msk.f32.mxu0 %vm781_vm6, %v7609_v33  ;;  %v9047_v33 = vld [vmem:[%s9600_s17 + $0x10] sm:$0xff] }
 0x6ae   : > { %v7619_v20 = vpop.f32.mrb[36].mxu0 }
 0x6af   : > { %v4202_v9 = vpop.f32.mrb[37].mxu0 }
 0x6b2   : > { %v7614_v11 = vpop.f32.mrb[38].mxu1 }
 0x6b3   : > { %v4127_v16 = vpop.f32.mrb[39].mxu1  ;;  %7634 = vmatmul.mubr.msk.f32.gmra.mrb[42].mxu0 %vm781_vm6, %v7614_v11 }
 0x6b4   : > { %7636 = vmatprep.mubr.msk.f32.mxu0 %vm781_vm6, %v7619_v20 }
 0x6b6   : > { %v7624_v47 = vpop.f32.mrb[40].mxu1 }
 0x6b7   : > { %v4277_v30 = vpop.f32.mrb[41].mxu1  ;;  %7637 = vmatmul.mubr.msk.f32.gmra.mrb[44].mxu0 %vm781_vm6, %v7624_v47 }
 0x6b8   : > { %7641 = vmatprep.mubr.msk.f32.mxu0 %vm781_vm6, %v4286_v15 }
 0x6bb   : > { %7642 = vmatmul.mubr.msk.f32.vlgmr.msra.gmra.mrb[38].mxu0 %vm781_vm6, %v4288_v50 }
 0x6bc   : > { %7644 = vmatprep.mubr.msk.f32.mxu0 %vm781_vm6, %v4290_v22 }
 0x6bf   : > { %7645 = vmatmul.mubr.msk.f32.gmra.mrb[40].mxu0 %vm781_vm6, %v4292_v34 }
 0x6c0   : > { %7647 = vmatprep.mubr.msk.f32.mxu0 %vm781_vm6, %v4052_v1  ;;  %v9056_v1 = vld [vmem:[%s9600_s17 + $0x18] sm:$0xff] }
 0x6c3   : > { %7648 = vmatmul.mubr.msk.f32.gmra.mrb[42].mxu0 %vm781_vm6, %v4127_v16 }
 0x6c4   : > { %7650 = vmatprep.mubr.msk.f32.mxu0 %vm781_vm6, %v4202_v9 }
 0x6c7   : > { %7651 = vmatmul.mubr.msk.f32.gmra.mrb[44].mxu0 %vm781_vm6, %v4277_v30 }
 0x6c8   : > { %7699 = vmatprep.mubr.msk.f32.mxu0 %vm8144_vm5, %v8143_v3 }
 0x78e   : > { %v7643_v28 = vpop.f32.mrb[38].mxu0 }
 0x78f   : > { %v4523_v32 = vpop.f32.mrb[39].mxu0 }
 0x792   : > { %v7646_v17 = vpop.f32.mrb[40].mxu0 }
 0x793   : > { %v4533_v37 = vpop.f32.mrb[41].mxu0 }
 0x796   : > { %v7649_v44 = vpop.f32.mrb[42].mxu0 }
 0x797   : > { %v4563_v2 = vsub.f32 %v7643_v28, %v7649_v44  ;;  %v4567_v23 = vadd.f32 %v7649_v44, %v7643_v28  ;;  %v4543_v59 = vpop.f32.mrb[43].mxu0 }
 0x798   : > { %v4562_v21 = vsub.f32 %v4523_v32, %v4543_v59  ;;  %v4566_v6 = vadd.f32 %v4543_v59, %v4523_v32 }
 0x799   : > { %v8991_v24 = vadd.f32 %v8112_v54, %v4563_v2  ;;  %v4578_v12 = vadd.f32 %v7074_v46, %v4567_v23 }
 0x79a   : > { %v8996_v8 = vadd.f32 %v8113_v57, %v4562_v21  ;;  %v7652_v55 = vpop.f32.mrb[44].mxu0  ;;  %v4577_v36 = vadd.f32 %v7074_v46, %v4566_v6 }
 0x79b   : > { %v4565_v26 = vsub.f32 %v7646_v17, %v7652_v55  ;;  %v4569_v5 = vadd.f32 %v7652_v55, %v7646_v17  ;;  %v4553_v10 = vpop.f32.mrb[45].mxu0  ;;  %v4586_v4 = vadd.f32 %v8116_v18, %v4578_v12 }
 0x79c   : > { %v7904_v62 = vpack.c.bf16 %v8991_v24, %v8996_v8  ;;  %v4564_v19 = vsub.f32 %v4533_v37, %v4553_v10  ;;  %v4568_v31 = vadd.f32 %v4553_v10, %v4533_v37  ;;  %v4585_v61 = vadd.f32 %v8117_v39, %v4577_v36 }
 0x79d   : > { %v4584_v7 = vadd.f32 %v8114_v52, %v4565_v26  ;;  %v4580_v15 = vadd.f32 %v7074_v46, %v4569_v5 }
 0x79e   : > { %v4583_v41 = vadd.f32 %v8115_v14, %v4564_v19  ;;  %7905 = vmatpush3.bf16.msra.mxu1 %v7904_v62  ;;  %v4579_v60 = vadd.f32 %v7074_v46, %v4568_v31  ;;  %v7910_v40 = vpack.c.bf16 %v4586_v4, %v4585_v61 }
 0x79f   : > { %7906 = vmatprep.subr.bf16.mxu1 %v8146_v13  ;;  %v4588_v50 = vadd.f32 %v8118_v49, %v4580_v15 }
 0x7a0   : > { %v7907_v42 = vpack.c.bf16 %v4584_v7, %v4583_v41  ;;  %v4587_v58 = vadd.f32 %v8119_v25, %v4579_v60 }
 0x7a2   : > { %7908 = vmatpush3.bf16.msra.mxu1 %v7907_v42  ;;  %v7913_v22 = vpack.c.bf16 %v4588_v50, %v4587_v58 }
 0x7a3   : > { %7909 = vmatprep.subr.bf16.mxu1 %v8146_v13 }
 0x7a5   : > { %7662 = vmatmul.mubr.msk.f32.vlgmr.msra.gmra.mrb[42].mxu1 %vm628_vm3, %v9016_v43 }
 0x7a6   : > { %7911 = vmatpush3.bf16.msra.mxu1 %v7910_v40  ;;  %7672 = vmatprep.mubr.msk.f32.mxu1 %vm8144_vm5, %v8143_v3 }
 0x7a7   : > { %7912 = vmatprep.subr.bf16.mxu1 %v8146_v13 }
 0x7aa   : > { %7914 = vmatpush3.bf16.msra.mxu1 %v7913_v22 }
 0x7ad   : > { %7673 = vmatmul.mubr.msk.f32.vlgmr.msra.gmra.mrb[44].mxu1 %vm628_vm3, %v9016_v43 }
 0x7ae   : > { %7677 = vmatprep.mubr.msk.f32.mxu1 %vm781_vm6, %v9035_v51 }
 0x878   : > { %v4658_v29 = vpop.f32.mrb[42].mxu1 }
 0x879   : > { %v7663_v34 = vpop.f32.mrb[43].mxu1  ;;  %7675 = vmatprep.subr.mxu1 %v4658_v29 }
 0x87a   : > { %7676 = vmatpush3.msra.mxu1 %v4658_v29 }
 0x87b   : > { %7678 = vmatmul.mubr.msk.f32.vlgmr.msra.gmra.mrb[46].mxu1 %vm781_vm6, %v9042_v27 }
 0x87c   : > { %7680 = vmatprep.mubr.msk.f32.mxu1 %vm781_vm6, %v9047_v33 }
 0x87f   : > { %7681 = vmatmul.mubr.msk.f32.gmra.mrb[48].mxu1 %vm781_vm6, %v9056_v1 }
 0x880   : > { %v4728_v20 = vpop.f32.mrb[44].mxu1  ;;  %7685 = vmatprep.mubr.msk.f32.mxu1 %vm781_vm6, %v9035_v51 }
 0x881   : > { %v7674_v9 = vpop.f32.mrb[45].mxu1  ;;  %7683 = vmatprep.subr.mxu1 %v4728_v20 }
 0x882   : > { %7684 = vmatpush3.msra.mxu1 %v4728_v20 }
 0x883   : > { %7686 = vmatmul.mubr.msk.f32.vlgmr.msra.gmra.mrb[50].mxu1 %vm781_vm6, %v9042_v27  ;;  %7921 = vmatprep.subr.bf16.mxu1 %v8146_v13 }
 0x884   : > { %7688 = vmatprep.mubr.msk.f32.mxu1 %vm781_vm6, %v9047_v33 }
 0x887   : > { %7689 = vmatmul.mubr.msk.f32.gmra.mrb[52].mxu1 %vm781_vm6, %v9056_v1 }
 0x888   : > { %7710 = vmatprep.mubr.msk.f32.mxu1 %vm8144_vm5, %v8143_v3 }
 0x94e   : > { %v7679_v11 = vpop.f32.mrb[46].mxu1 }
 0x94f   : > { %v9072_v16 = vsub.f32 %v8991_v24, %v7679_v11  ;;  %v4810_v47 = vpop.f32.mrb[47].mxu1 }
 0x950   : > { %v9075_v30 = vsub.f32 %v8996_v8, %v4810_v47 }
 0x951   : > { %v4923_v28 = vmul.f32 %v9072_v16, %v9072_v16 }
 0x952   : > { %v4922_v32 = vmul.f32 %v9075_v30, %v9075_v30  ;;  %v7682_v17 = vpop.f32.mrb[48].mxu1 }
 0x953   : > { %v9081_v37 = vsub.f32 %v4584_v7, %v7682_v17  ;;  %v4820_v44 = vpop.f32.mrb[49].mxu1 }
 0x954   : > { %v9083_v2 = vsub.f32 %v4583_v41, %v4820_v44  ;;  %v7916_v23 = vpack.c.bf16 %v4923_v28, %v4922_v32 }
 0x955   : > { %v4925_v59 = vmul.f32 %v9081_v37, %v9081_v37 }
 0x956   : > { %v4924_v46 = vmul.f32 %v9083_v2, %v9083_v2  ;;  %v7687_v21 = vpop.f32.mrb[50].mxu1  ;;  %7917 = vmatpush3.bf16.msra.mxu0 %v7916_v23 }
 0x957   : > { %v9089_v6 = vsub.f32 %v4586_v4, %v7687_v21  ;;  %v4899_v54 = vpop.f32.mrb[51].mxu1  ;;  %7918 = vmatprep.subr.bf16.mxu0 %v8146_v13 }
 0x958   : > { %v9092_v24 = vsub.f32 %v4585_v61, %v4899_v54  ;;  %v7919_v57 = vpack.c.bf16 %v4925_v59, %v4924_v46 }
 0x959   : > { %v4997_v8 = vmul.f32 %v9089_v6, %v9089_v6  ;;  %v5071_v55 = vmul.f32 %v9089_v6, %v9072_v16 }
 0x95a   : > { %v4996_v12 = vmul.f32 %v9092_v24, %v9092_v24  ;;  %v5070_v26 = vmul.f32 %v9092_v24, %v9075_v30  ;;  %v7690_v5 = vpop.f32.mrb[52].mxu1  ;;  %7920 = vmatpush3.bf16.msra.mxu0 %v7919_v57 }
 0x95b   : > { %v9102_v10 = vsub.f32 %v4588_v50, %v7690_v5  ;;  %v4909_v36 = vpop.f32.mrb[53].mxu1  ;;  %7927 = vmatprep.subr.bf16.mxu0 %v8146_v13 }
 0x95c   : > { %v9105_v62 = vsub.f32 %v4587_v58, %v4909_v36  ;;  %v7922_v19 = vpack.c.bf16 %v4997_v8, %v4996_v12  ;;  %v7928_v31 = vpack.c.bf16 %v5071_v55, %v5070_v26 }
 0x95d   : > { %v4999_v52 = vmul.f32 %v9102_v10, %v9102_v10  ;;  %v5073_v7 = vmul.f32 %v9102_v10, %v9081_v37  ;;  %7700 = vmatmul.mubr.msk.f32.vlgmr.msra.gmra.mrb[46].mxu0 %vm628_vm3, %v9016_v43 }
 0x95e   : > { %v4998_v14 = vmul.f32 %v9105_v62, %v9105_v62  ;;  %v5072_v41 = vmul.f32 %v9105_v62, %v9083_v2  ;;  %7923 = vmatpush3.bf16.msra.mxu1 %v7922_v19  ;;  %7929 = vmatpush3.bf16.msra.mxu0 %v7928_v31  ;;  %v5558_v31 = vld [vmem:[%s8242_s19] sm:$0xff] }
 0x95f   : > { %7924 = vmatprep.subr.bf16.mxu1 %v8146_v13  ;;  %7930 = vmatprep.subr.bf16.mxu0 %v8146_v13 }
 0x960   : > { %v7925_v18 = vpack.c.bf16 %v4999_v52, %v4998_v14  ;;  %v7931_v4 = vpack.c.bf16 %v5073_v7, %v5072_v41  ;;  %7721 = vmatprep.mubr.msk.f32.mxu0 %vm8144_vm5, %v8143_v3  ;;  %v5559_v52 = vld [vmem:[%s8242_s19 + $0x8] sm:$0xff]  ;;  %v5560_v7 = vld [vmem:[%s8242_s19 + $0x10] sm:$0xff]  ;;  %v5561_v41 = vld [vmem:[%s8242_s19 + $0x18] sm:$0xff] }
 0x961   : > { %v7933_v14 = vpack.c.bf16 %v5559_v52, %v5558_v31 }
 0x962   : > { %7926 = vmatpush3.bf16.msra.mxu1 %v7925_v18  ;;  %7932 = vmatpush3.bf16.msra.mxu0 %v7931_v4  ;;  %v7937_v18 = vpack.c.bf16 %v5561_v41, %v5560_v7  ;;  %v5454_v4 = vlaneseq }
 0x965   : > { %7711 = vmatmul.mubr.msk.f32.vlgmr.msra.gmra.mrb[54].mxu1 %vm628_vm3, %v9016_v43  ;;  %7722 = vmatmul.mubr.msk.f32.vlgmr.msra.gmra.mrb[48].mxu0 %vm628_vm3, %v9016_v43 }
 0x966   : > { %7726 = vmatprep.mubr.msk.f32.mxu1 %vm781_vm6, %v9035_v51  ;;  %7734 = vmatprep.mubr.msk.f32.mxu0 %vm781_vm6, %v9035_v51 }
 0xa30   : > { %v4992_v39 = vpop.f32.mrb[46].mxu0 }
 0xa31   : > { %v7701_v61 = vpop.f32.mrb[47].mxu0  ;;  %v4993_v42 = vadd.f32 1e-05, %v4992_v39 }
 0xa38   : > { %v5066_v15 = vpop.f32.mrb[54].mxu1  ;;  %v5140_v60 = vpop.f32.mrb[48].mxu0 }
 0xa39   : > { %v5067_v49 = vadd.f32 1e-05, %v5066_v15  ;;  %v7712_v50 = vpop.f32.mrb[55].mxu1  ;;  %v5145_v25 = vmul.f32 %v5140_v60, %v5140_v60  ;;  %v7723_v58 = vpop.f32.mrb[49].mxu0  ;;  %v5173_v12 = vsub.f32 0.0, %v5140_v60  ;;  %v9153_v15 = vshrl.u32 %v5454_v4, 7 }
 0xa3b   : > { %v5144_v40 = vmul.f32 %v5067_v49, %v4993_v42  ;;  %v5155_v22 = vadd.f32 %v5067_v49, %v4993_v42  ;;  %v5464_v58 = vsub.s32 2, %v9153_v15 }
 0xa3d   : > { %v5146_v29 = vsub.f32 %v5144_v40, %v5145_v25  ;;  %v5456_v25 = vsub.s32 0, %v9153_v15  ;;  %v5488_v40 = vsub.s32 1, %v9153_v15 }
 0xa3f   : > { %v5147_v34 = vmax.f32 %v5146_v29, 1e-20 }
 0xa41   : > { %8084 = vrsqrt.f32 %v5147_v34  ;;  %vm5150_vm8 = vcmp.eq.f32.partialorder %v5147_v34, inf  ;;  %v5153_v11 = vand.u32 2147483648, %v5147_v34  ;;  %vm5152_vm9 = vcmp.eq.f32.partialorder %v5147_v34, 0.0 }
 0xa4b   : > { %v8085_v20 = vpop.eup %8084 }
 0xa4c   : > { %v5149_v9 = vmul.f32 %v8085_v20, %v5147_v34  ;;  %v550_v20 = vld [vmem:[%s8260_s5] sm:$0x3] }
 0xa4e   : > { %v5151_v47 = vsel %vm5150_vm8, %v5147_v34, %v5149_v9  ;;  %v549_v34 = vld [vmem:[%s8249_s25] sm:$0x7]  ;;  %s8147_s25 = smov 64  }
 0xa4f   : > { %v5154_v28 = vsel %vm5152_vm9, %v5153_v11, %v5151_v47  ;;  %v9160_v11 = vrot.slane %v549_v34, %v5456_v25  ;;  %v9162_v47 = vrot.slane %v549_v34, %v5464_v58 }
 0xa50   : > { %v5156_v32 = vmul.f32 2.0, %v5154_v28  ;;  %v5169_v17 = vadd.f32 %v5154_v28, %v5067_v49  ;;  %v5171_v44 = vadd.f32 %v5154_v28, %v4993_v42 }
 0xa52   : > { %v5157_v23 = vadd.f32 %v5156_v32, %v5155_v22  ;;  %v9166_v32 = vrot.slane %v550_v20, %v5488_v40 }
 0xa54   : > { %8086 = vrsqrt.f32 %v5157_v23  ;;  %vm5160_vm10 = vcmp.eq.f32.partialorder %v5157_v23, inf  ;;  %v5163_v21 = vand.u32 2147483648, %v5157_v23  ;;  %vm5162_vm11 = vcmp.eq.f32.partialorder %v5157_v23, 0.0 }
 0xa5e   : > { %v8087_v59 = vpop.eup %8086 }
 0xa5f   : > { %v5159_v46 = vmul.f32 %v8087_v59, %v5157_v23 }
 0xa61   : > { %v5161_v54 = vsel %vm5160_vm10, %v5157_v23, %v5159_v46 }
 0xa62   : > { %v5164_v57 = vsel %vm5162_vm11, %v5163_v21, %v5161_v54 }
 0xa63   : > { %v5165_v8 = vmul.f32 %v5164_v57, %v5154_v28  ;;  %v9164_v28 = vrot.slane %v549_v34, %v5488_v40 }
 0xa65   : > { %v5166_v55 = vmax.f32 %v5165_v8, 1e-20 }
 0xa67   : > { %8088 = vrcp.f32 %v5166_v55 }
 0xa71   : > { %v8089_v26 = vpop.eup %8088 }
 0xa72   : > { %v5174_v5 = vmul.f32 %v8089_v26, %v5173_v12  ;;  %v5170_v36 = vmul.f32 %v8089_v26, %v5169_v17  ;;  %v5172_v19 = vmul.f32 %v8089_v26, %v5171_v44 }
 0xa74   : > { %7724 = vmatprep.subr.mxu1 %v5170_v36  ;;  %7732 = vmatprep.subr.mxu0 %v5172_v19 }
 0xa75   : > { %7725 = vmatpush3.msra.mxu1 %v5170_v36  ;;  %7733 = vmatpush3.msra.mxu0 %v5172_v19  ;;  %v5562_v36 = vld [vmem:[%s8242_s19 + $0x20] sm:$0x3] }
 0xa76   : > { %7727 = vmatmul.mubr.msk.f32.vlgmr.msra.gmra.mrb[56].mxu1 %vm781_vm6, %v9042_v27  ;;  %7735 = vmatmul.mubr.msk.f32.vlgmr.msra.gmra.mrb[50].mxu0 %vm781_vm6, %v9042_v27 }
 0xa77   : > { %7740 = vmatprep.subr.mxu1 %v5174_v5  ;;  %7729 = vmatprep.mubr.msk.f32.mxu1 %vm781_vm6, %v9047_v33 }
 0xa78   : > { %7741 = vmatpush3.msra.mxu1 %v5174_v5  ;;  %7737 = vmatprep.mubr.msk.f32.mxu0 %vm781_vm6, %v9047_v33 }
 0xa79   : > { %7934 = vmatprep.subr.bf16.mxu0 %v7933_v14 }
 0xa7a   : > { %7730 = vmatmul.mubr.msk.f32.gmra.mrb[58].mxu1 %vm781_vm6, %v9056_v1  ;;  %7738 = vmatmul.mubr.msk.f32.gmra.mrb[52].mxu0 %vm781_vm6, %v9056_v1 }
 0xa7b   : > { %7742 = vmatprep.mubr.msk.f32.mxu1 %vm781_vm6, %v9035_v51  ;;  %7936 = vmatpush3.bf16.msra.mxu0 %v7933_v14 }
 0xa7c   : > { %7938 = vmatprep.subr.bf16.mxu0 %v7937_v18 }
 0xa7e   : > { %7743 = vmatmul.mubr.msk.f32.vlgmr.msra.gmra.mrb[60].mxu1 %vm781_vm6, %v9042_v27 }
 0xa7f   : > { %7745 = vmatprep.mubr.msk.f32.mxu1 %vm781_vm6, %v9047_v33  ;;  %7940 = vmatpush3.bf16.msra.mxu0 %v7937_v18 }
 0xa80   : > { %7756 = vmatprep.subr.msk.mxu0 %vm667_vm1, %v5562_v36 }
 0xa82   : > { %7746 = vmatmul.mubr.msk.f32.gmra.mrb[62].mxu1 %vm781_vm6, %v9056_v1 }
 0xa83   : > { %7757 = vmatpush3.msk.msra.mxu0 %vm667_vm1, %v5562_v36 }
 0xa84   : > { %7957 = vmatprep.subr.bf16.mxu0 %v8146_v13 }
 0xb49   : > { %v7728_v39 = vpop.f32.mrb[56].mxu1  ;;  %v7736_v61 = vpop.f32.mrb[50].mxu0 }
 0xb4a   : > { %v5241_v60 = vpop.f32.mrb[57].mxu1  ;;  %v5326_v42 = vpop.f32.mrb[51].mxu0  ;;  %v5431_v17 = vmul.f32 %v7728_v39, %v9072_v16  ;;  %v5443_v44 = vmul.f32 %v7736_v61, %v9089_v6 }
 0xb4b   : > { %v5430_v21 = vmul.f32 %v5241_v60, %v9075_v30  ;;  %v5442_v54 = vmul.f32 %v5326_v42, %v9092_v24 }
 0xb4d   : > { %v7731_v49 = vpop.f32.mrb[58].mxu1  ;;  %v7739_v50 = vpop.f32.mrb[52].mxu0 }
 0xb4e   : > { %v5251_v22 = vpop.f32.mrb[59].mxu1  ;;  %v5336_v29 = vpop.f32.mrb[53].mxu0  ;;  %v5433_v55 = vmul.f32 %v7731_v49, %v9081_v37  ;;  %v5445_v12 = vmul.f32 %v7739_v50, %v9102_v10 }
 0xb51   : > { %v7744_v9 = vpop.f32.mrb[60].mxu1 }
 0xb52   : > { %v5435_v23 = vmul.f32 %v7744_v9, %v9089_v6  ;;  %v5447_v59 = vmul.f32 %v7744_v9, %v9072_v16  ;;  %v5411_v46 = vpop.f32.mrb[61].mxu1  ;;  %v5432_v6 = vmul.f32 %v5251_v22, %v9083_v2  ;;  %v5444_v16 = vmul.f32 %v5336_v29, %v9105_v62 }
 0xb53   : > { %v5434_v57 = vmul.f32 %v5411_v46, %v9092_v24  ;;  %v5446_v8 = vmul.f32 %v5411_v46, %v9075_v30 }
 0xb54   : > { %v5439_v26 = vadd.f32 %v5435_v23, %v5431_v17  ;;  %v5451_v5 = vadd.f32 %v5447_v59, %v5443_v44  ;;  %v9202_v59 = vrot.slane %v550_v20, %v5456_v25 }
 0xb55   : > { %v5438_v19 = vadd.f32 %v5434_v57, %v5430_v21  ;;  %v5450_v31 = vadd.f32 %v5446_v8, %v5442_v54  ;;  %v7747_v52 = vpop.f32.mrb[62].mxu1 }
 0xb56   : > { %v5459_v24 = vmul.f32 %v9160_v11, %v5439_v26  ;;  %v5467_v30 = vmul.f32 %v9162_v47, %v5451_v5  ;;  %v5483_v7 = vmul.f32 %v9162_v47, %v5439_v26  ;;  %v5491_v14 = vmul.f32 %v9164_v28, %v5451_v5  ;;  %v5421_v41 = vpop.f32.mrb[63].mxu1 }
 0xb57   : > { %v5458_v18 = vmul.f32 %v9160_v11, %v5438_v19  ;;  %v5466_v4 = vmul.f32 %v9162_v47, %v5450_v31  ;;  %v5482_v39 = vmul.f32 %v9162_v47, %v5438_v19  ;;  %v5490_v61 = vmul.f32 %v9164_v28, %v5450_v31 }
 0xb58   : > { %v5471_v15 = vadd.f32 %v5467_v30, %v5459_v24  ;;  %v5495_v60 = vadd.f32 %v5491_v14, %v5483_v7  ;;  %v5437_v42 = vmul.f32 %v7747_v52, %v9102_v10  ;;  %v5449_v49 = vmul.f32 %v7747_v52, %v9081_v37 }
 0xb59   : > { %v5494_v50 = vadd.f32 %v5490_v61, %v5482_v39  ;;  %v5436_v58 = vmul.f32 %v5421_v41, %v9105_v62  ;;  %v5448_v40 = vmul.f32 %v5421_v41, %v9083_v2  ;;  %v5470_v22 = vadd.f32 %v5466_v4, %v5458_v18 }
 0xb5a   : > { %v5441_v29 = vadd.f32 %v5437_v42, %v5433_v55  ;;  %v5453_v34 = vadd.f32 %v5449_v49, %v5445_v12  ;;  %v9197_v9 = vadd.f32 %v9166_v32, %v5495_v60 }
 0xb5b   : > { %v9200_v17 = vadd.f32 %v9166_v32, %v5494_v50  ;;  %v5440_v44 = vadd.f32 %v5436_v58, %v5432_v6  ;;  %v5452_v23 = vadd.f32 %v5448_v40, %v5444_v16  ;;  %v9221_v6 = vadd.f32 %v9202_v59, %v5471_v15 }
 0xb5c   : > { %v5461_v37 = vmul.f32 %v9160_v11, %v5441_v29  ;;  %v5469_v10 = vmul.f32 %v9162_v47, %v5453_v34  ;;  %v5485_v62 = vmul.f32 %v9162_v47, %v5441_v29  ;;  %v5493_v2 = vmul.f32 %v9164_v28, %v5453_v34 }
 0xb5d   : > { %v5460_v46 = vmul.f32 %v9160_v11, %v5440_v44  ;;  %v5468_v21 = vmul.f32 %v9162_v47, %v5452_v23  ;;  %v5484_v54 = vmul.f32 %v9162_v47, %v5440_v44  ;;  %v5492_v57 = vmul.f32 %v9164_v28, %v5452_v23  ;;  %v8123_v23 = vld [vmem:[%s9584_s4 + $0x10] sm:$0xff] }
 0xb5e   : > { %v5473_v8 = vadd.f32 %v5469_v10, %v5461_v37  ;;  %v5497_v55 = vadd.f32 %v5493_v2, %v5485_v62  ;;  %v5507_v25 = vsub.f32 0.0, %v9197_v9  ;;  %v5506_v20 = vsub.f32 0.0, %v9200_v17  ;;  %v5812_v37 = vld [vmem:[%s8255_s13] sm:$0xff]  ;;  %v5813_v10 = vld [vmem:[%s8255_s13 + $0x8] sm:$0xff] }
 0xb5f   : > { %v5496_v12 = vadd.f32 %v5492_v57, %v5484_v54  ;;  %v5472_v26 = vadd.f32 %v5468_v21, %v5460_v46  ;;  %v9237_v52 = vadd.f32 %v9202_v59, %v5470_v22  ;;  %v7941_v62 = vpack.c.bf16 %v5813_v10, %v5812_v37  ;;  %v5814_v57 = vld [vmem:[%s8255_s13 + $0x10] sm:$0xff] }
 0xb60   : > { %5520 = vrot.lane.b32.xlu1 %v5507_v25, %s8142_s18  ;;  %5518 = vrot.lane.b32.xlu0 %v5506_v20, %s8142_s18  ;;  %v9217_v5 = vadd.f32 %v9166_v32, %v5497_v55  ;;  %v9231_v31 = vadd.f32 %v9202_v59, %v5473_v8  ;;  %v5815_v8 = vld [vmem:[%s8255_s13 + $0x18] sm:$0xff]  ;;  %v5816_v55 = vld [vmem:[%s8255_s13 + $0x20] sm:$0xff] }
 0xb61   : > { %v9224_v16 = vadd.f32 %v9166_v32, %v5496_v12  ;;  %v9242_v24 = vadd.f32 %v9202_v59, %v5472_v26  ;;  %7942 = vmatprep.subr.bf16.mxu1 %v7941_v62  ;;  %v7945_v25 = vpack.c.bf16 %v5815_v8, %v5814_v57  ;;  %v5817_v20 = vld [vmem:[%s8255_s13 + $0x28] sm:$0xff] }
 0xb62   : > { %v5509_v36 = vsub.f32 0.0, %v9217_v5  ;;  %7944 = vmatpush3.bf16.msra.mxu1 %v7941_v62  ;;  %v7949_v26 = vpack.c.bf16 %v5817_v20, %v5816_v55 }
 0xb63   : > { %v5508_v19 = vsub.f32 0.0, %v9224_v16  ;;  %7946 = vmatprep.subr.bf16.mxu1 %v7945_v25 }
 0xb64   : > { %5524 = vrot.lane.b32.xlu1 %v5509_v36, %s8142_s18  ;;  %5528 = vrot.lane.b32.xlu0 %v9221_v6, %s8142_s18  ;;  %v5818_v36 = vld [vmem:[%s8255_s13 + $0x30] sm:$0xff] }
 0xb66   : > { %7948 = vmatpush3.bf16.msra.mxu1 %v7945_v25 }
 0xb67   : > { %7950 = vmatprep.subr.bf16.mxu1 %v7949_v26 }
 0xb68   : > { %5522 = vrot.lane.b32.xlu1 %v5508_v19, %s8142_s18  ;;  %5532 = vrot.lane.b32.xlu0 %v9231_v31, %s8142_s18  ;;  %v5819_v19 = vld [vmem:[%s8255_s13 + $0x38] sm:$0xff] }
 0xb6a   : > { %7952 = vmatpush3.bf16.msra.mxu1 %v7949_v26 }
 0xb6c   : > { %5526 = vrot.lane.b32.xlu1 %v9237_v52, %s8142_s18 }
 0xb70   : > { %5530 = vrot.lane.b32.xlu1 %v9242_v24, %s8142_s18 }
 0xbd2   : > { %v5521_v30 = vpop.permute.xlu1 %5520  ;;  %v5519_v7 = vpop.permute.xlu0 %5518 }
 0xbd3   : > { %v5543_v14 = vsel %vm619_vm2, %v9221_v6, %v5521_v30  ;;  %v5542_v41 = vsel %vm619_vm2, %v9237_v52, %v5519_v7  ;;  %v7953_v7 = vpack.c.bf16 %v5819_v19, %v5818_v36 }
 0xbd4   : > { %v5550_v18 = vsel %vm628_vm3, %v5542_v41, %v8393_v35  ;;  %v5551_v4 = vsel %vm628_vm3, %v5543_v14, %v8396_v38 }
 0xbd5   : > { %7758 = vmatprep.mubr.msk.f32.mxu0 %vm642_vm4, %v5550_v18  ;;  %7954 = vmatprep.subr.bf16.mxu1 %v7953_v7 }
 0xbd6   : > { %v5525_v39 = vpop.permute.xlu1 %5524  ;;  %7759 = vmatmul.mubr.msk.f32.vlgmr.msra.gmra.mrb[54].mxu0 %vm642_vm4, %v5551_v4  ;;  %v5529_v61 = vpop.permute.xlu0 %5528  ;;  %7956 = vmatpush3.bf16.msra.mxu1 %v7953_v7 }
 0xbd7   : > { %v5545_v15 = vsel %vm619_vm2, %v9231_v31, %v5525_v39  ;;  %v5547_v38 = vsel %vm619_vm2, %v9197_v9, %v5529_v61 }
 0xbd8   : > { %v5553_v35 = vsel %vm628_vm3, %v5545_v15, %v8405_v45 }
 0xbda   : > { %v5523_v60 = vpop.permute.xlu1 %5522  ;;  %v5533_v58 = vpop.permute.xlu0 %5532 }
 0xbdb   : > { %v5544_v42 = vsel %vm619_vm2, %v9242_v24, %v5523_v60  ;;  %v5549_v45 = vsel %vm619_vm2, %v9217_v5, %v5533_v58 }
 0xbdc   : > { %v5552_v49 = vsel %vm628_vm3, %v5544_v42, %v8409_v48  ;;  %v5555_v48 = vsel %vm628_vm3, %v5547_v38, %v8417_v53  ;;  %v8120_v53 = vld [vmem:[%s9584_s4 + $0x8] sm:$0xff] }
 0xbdd   : > { %7761 = vmatprep.mubr.msk.f32.mxu0 %vm642_vm4, %v5552_v49  ;;  %5773 = vrot.lane.b32.xlu0 %v8120_v53, %s8147_s25 }
 0xbde   : > { %v5527_v50 = vpop.permute.xlu1 %5526  ;;  %7762 = vmatmul.mubr.msk.f32.gmra.mrb[56].mxu0 %vm642_vm4, %v5553_v35 }
 0xbdf   : > { %v5546_v40 = vsel %vm619_vm2, %v9200_v17, %v5527_v50 }
 0xbe0   : > { %v5554_v22 = vsel %vm628_vm3, %v5546_v40, %v8423_v56  ;;  %v5557_v56 = vsel %vm628_vm3, %v5549_v45, %v8435_v63  ;;  %v8122_v63 = vld [vmem:[%s9584_s4 + $0x18] sm:$0xff] }
 0xbe1   : > { %7764 = vmatprep.mubr.msk.f32.mxu0 %vm642_vm4, %v5554_v22  ;;  %5777 = vrot.lane.b32.xlu0 %v8122_v63, %s8147_s25 }
 0xbe2   : > { %v5531_v29 = vpop.permute.xlu1 %5530  ;;  %7765 = vmatmul.mubr.msk.f32.gmra.mrb[58].mxu0 %vm642_vm4, %v5555_v48  ;;  %v5820_v48 = vld [vmem:[%s8255_s13 + $0x40] sm:$0x3] }
 0xbe3   : > { %v5548_v34 = vsel %vm619_vm2, %v9224_v16, %v5531_v29  ;;  %7786 = vmatprep.subr.msk.mxu1 %vm667_vm1, %v5820_v48 }
 0xbe4   : > { %v5556_v44 = vsel %vm628_vm3, %v5548_v34, %v8437_v0  ;;  %v8121_v0 = vld [vmem:[%s9584_s4] sm:$0xff]  ;;  %7787 = vmatpush3.msk.msra.mxu1 %vm667_vm1, %v5820_v48 }
 0xbe5   : > { %7767 = vmatprep.mubr.msk.f32.mxu0 %vm642_vm4, %v5556_v44  ;;  %5771 = vrot.lane.b32.xlu1 %v8121_v0, %s8147_s25 }
 0xbe6   : > { %7768 = vmatmul.mubr.msk.f32.gmra.mrb[60].mxu0 %vm642_vm4, %v5557_v56 }
 0xbe7   : > { %7808 = vmatprep.mubr.msk.f32.mxu0 %vm8144_vm5, %v8143_v3 }
 0xbe9   : > { %5775 = vrot.lane.b32.xlu1 %v8123_v23, %s8147_s25 }
 0xca9   : > { %v7760_v2 = vpop.f32.mrb[54].mxu0 }
 0xcaa   : > { %v5704_v46 = vmul.f32 0.70710677, %v7760_v2  ;;  %v5656_v21 = vpop.f32.mrb[55].mxu0  ;;  %v5696_v61 = vmul.f32 0.5, %v7760_v2 }
 0xcab   : > { %v5703_v54 = vmul.f32 0.70710677, %v5656_v21  ;;  %v5695_v42 = vmul.f32 0.5, %v5656_v21 }
 0xcac   : > { %8090 = verf.f32 %v5704_v46 }
 0xcad   : > { %8092 = verf.f32 %v5703_v54 }
 0xcb1   : > { %v9310_v12 = vpop.f32.mrb[56].mxu0 }
 0xcb2   : > { %v9314_v30 = vpop.f32.mrb[57].mxu0  ;;  %v5706_v45 = vmul.f32 0.70710677, %v9310_v12 }
 0xcb3   : > { %v5705_v29 = vmul.f32 0.70710677, %v9314_v30 }
 0xcb5   : > { %v7766_v14 = vpop.f32.mrb[58].mxu0 }
 0xcb6   : > { %v8091_v41 = vpop.eup %8090  ;;  %v5708_v18 = vmul.f32 0.70710677, %v7766_v14  ;;  %v5676_v4 = vpop.f32.mrb[59].mxu0  ;;  %v5700_v56 = vmul.f32 0.5, %v7766_v14 }
 0xcb7   : > { %v8093_v39 = vpop.eup %8092  ;;  %v5720_v15 = vadd.f32 1.0, %v8091_v41  ;;  %v5707_v60 = vmul.f32 0.70710677, %v5676_v4  ;;  %v5699_v0 = vmul.f32 0.5, %v5676_v4  ;;  %v5698_v41 = vmul.f32 0.5, %v9310_v12  ;;  %v8126_v12 = vld [vmem:[%s9584_s4 + $0x38] sm:$0xff] }
 0xcb8   : > { %v5719_v49 = vadd.f32 1.0, %v8093_v39  ;;  %8094 = verf.f32 %v5708_v18  ;;  %v8124_v18 = vld [vmem:[%s9584_s4 + $0x28] sm:$0xff]  ;;  %v5697_v4 = vmul.f32 0.5, %v9314_v30  ;;  %v8125_v39 = vld [vmem:[%s9584_s4 + $0x20] sm:$0xff]  ;;  %v8127_v30 = vld [vmem:[%s9584_s4 + $0x30] sm:$0xff] }
 0xcb9   : > { %v9316_v35 = vmul.f32 %v5720_v15, %v5696_v61  ;;  %8096 = verf.f32 %v5707_v60  ;;  %v7769_v38 = vpop.f32.mrb[60].mxu0  ;;  %v5774_v60 = vpop.permute.xlu0 %5773 }
 0xcba   : > { %v9318_v50 = vmul.f32 %v5719_v49, %v5695_v42  ;;  %v5710_v58 = vmul.f32 0.70710677, %v7769_v38  ;;  %v5686_v40 = vpop.f32.mrb[61].mxu0  ;;  %v5702_v46 = vmul.f32 0.5, %v7769_v38  ;;  %v5772_v42 = vpop.permute.xlu1 %5771 }
 0xcbb   : > { %v5709_v22 = vmul.f32 0.70710677, %v5686_v40  ;;  %5757 = vrot.lane.b32.xlu0 %v9316_v35, %s8141_s30  ;;  %v5701_v54 = vmul.f32 0.5, %v5686_v40 }
 0xcbc   : > { %8098 = verf.f32 %v5710_v58  ;;  %5755 = vrot.lane.b32.xlu1 %v9318_v50, %s8141_s30 }
 0xcbd   : > { %8100 = verf.f32 %v5709_v22  ;;  %v5778_v49 = vpop.permute.xlu0 %5777 }
 0xcbe   : > { %8102 = verf.f32 %v5706_v45  ;;  %v5776_v38 = vpop.permute.xlu1 %5775 }
 0xcbf   : > { %8104 = verf.f32 %v5705_v29 }
 0xcc2   : > { %v8095_v34 = vpop.eup %8094 }
 0xcc3   : > { %v8097_v44 = vpop.eup %8096  ;;  %v5724_v53 = vadd.f32 1.0, %v8095_v34 }
 0xcc4   : > { %v5723_v63 = vadd.f32 1.0, %v8097_v44 }
 0xcc5   : > { %v9329_v23 = vmul.f32 %v5724_v53, %v5700_v56 }
 0xcc6   : > { %v8099_v37 = vpop.eup %8098  ;;  %v5731_v10 = vmul.f32 %v5723_v63, %v5699_v0 }
 0xcc7   : > { %v8101_v62 = vpop.eup %8100  ;;  %v5736_v2 = vsub.f32 0.0, %v9329_v23  ;;  %v5726_v21 = vadd.f32 1.0, %v8099_v37 }
 0xcc8   : > { %v5725_v57 = vadd.f32 1.0, %v8101_v62  ;;  %v5735_v8 = vsub.f32 0.0, %v5731_v10  ;;  %v8103_v26 = vpop.eup %8102 }
 0xcc9   : > { %v9332_v55 = vmul.f32 %v5726_v21, %v5702_v46  ;;  %5749 = vrot.lane.b32.xlu0 %v5736_v2, %s8141_s30  ;;  %v8105_v19 = vpop.eup %8104  ;;  %v5722_v7 = vadd.f32 1.0, %v8103_v26 }
 0xcca   : > { %v5733_v25 = vmul.f32 %v5725_v57, %v5701_v54  ;;  %5747 = vrot.lane.b32.xlu1 %v5735_v8, %s8141_s30  ;;  %v5721_v14 = vadd.f32 1.0, %v8105_v19 }
 0xccb   : > { %v5738_v20 = vsub.f32 0.0, %v9332_v55  ;;  %v5730_v61 = vmul.f32 %v5722_v7, %v5698_v41 }
 0xccc   : > { %v5737_v36 = vsub.f32 0.0, %v5733_v25  ;;  %v5729_v15 = vmul.f32 %v5721_v14, %v5697_v4 }
 0xccd   : > { %5753 = vrot.lane.b32.xlu0 %v5738_v20, %s8141_s30 }
 0xcce   : > { %5751 = vrot.lane.b32.xlu1 %v5737_v36, %s8141_s30 }
 0xcd1   : > { %5781 = vrot.lane.b32.xlu0 %v8124_v18, %s8147_s25 }
 0xcd2   : > { %5779 = vrot.lane.b32.xlu1 %v8125_v39, %s8147_s25 }
 0xcd5   : > { %5761 = vrot.lane.b32.xlu0 %v5730_v61, %s8141_s30 }
 0xcd6   : > { %5759 = vrot.lane.b32.xlu1 %v5729_v15, %s8141_s30 }
 0xcd9   : > { %5785 = vrot.lane.b32.xlu0 %v8126_v12, %s8147_s25 }
 0xcda   : > { %5783 = vrot.lane.b32.xlu1 %v8127_v30, %s8147_s25 }
 0xd2d   : > { %v5758_v58 = vpop.permute.xlu0 %5757 }
 0xd2e   : > { %v5756_v40 = vpop.permute.xlu1 %5755  ;;  %v5800_v21 = vsel %vm628_vm3, %v9329_v23, %v5758_v58 }
 0xd2f   : > { %v5799_v62 = vsel %vm628_vm3, %v5731_v10, %v5756_v40 }
 0xd3b   : > { %v5750_v22 = vpop.permute.xlu0 %5749 }
 0xd3c   : > { %v5796_v48 = vsel %vm628_vm3, %v9316_v35, %v5750_v22  ;;  %v5748_v45 = vpop.permute.xlu1 %5747 }
 0xd3d   : > { %v5795_v29 = vsel %vm628_vm3, %v9318_v50, %v5748_v45  ;;  %v5805_v44 = vsel %vm5803_vm12, %v5796_v48, %v5774_v60 }
 0xd3e   : > { %v5804_v34 = vsel %vm5803_vm12, %v5795_v29, %v5772_v42 }
 0xd3f   : > { %7788 = vmatprep.mubr.msk.f32.mxu1 %vm5821_vm13, %v5804_v34  ;;  %v5754_v56 = vpop.permute.xlu0 %5753 }
 0xd40   : > { %v5798_v53 = vsel %vm628_vm3, %v5730_v61, %v5754_v56  ;;  %7789 = vmatmul.mubr.msk.f32.vlgmr.msra.gmra.mrb[64].mxu1 %vm5821_vm13, %v5805_v44  ;;  %v5752_v0 = vpop.permute.xlu1 %5751 }
 0xd41   : > { %v5797_v63 = vsel %vm628_vm3, %v5729_v15, %v5752_v0  ;;  %v5807_v50 = vsel %vm5803_vm12, %v5798_v53, %v5778_v49 }
 0xd42   : > { %v5806_v35 = vsel %vm5803_vm12, %v5797_v63, %v5776_v38 }
 0xd43   : > { %v5782_v37 = vpop.permute.xlu0 %5781  ;;  %7791 = vmatprep.mubr.msk.f32.mxu1 %vm5821_vm13, %v5806_v35 }
 0xd44   : > { %7792 = vmatmul.mubr.msk.f32.gmra.mrb[66].mxu1 %vm5821_vm13, %v5807_v50  ;;  %v5780_v2 = vpop.permute.xlu1 %5779  ;;  %v5809_v54 = vsel %vm5803_vm12, %v5800_v21, %v5782_v37 }
 0xd45   : > { %v5808_v46 = vsel %vm5803_vm12, %v5799_v62, %v5780_v2 }
 0xd46   : > { %7794 = vmatprep.mubr.msk.f32.mxu1 %vm5821_vm13, %v5808_v46 }
 0xd47   : > { %v5762_v57 = vpop.permute.xlu0 %5761 }
 0xd48   : > { %7795 = vmatmul.mubr.msk.f32.gmra.mrb[68].mxu1 %vm5821_vm13, %v5809_v54  ;;  %v5760_v8 = vpop.permute.xlu1 %5759  ;;  %v5802_v36 = vsel %vm628_vm3, %v9332_v55, %v5762_v57 }
 0xd49   : > { %v5801_v26 = vsel %vm628_vm3, %v5733_v25, %v5760_v8 }
 0xd4b   : > { %v5786_v20 = vpop.permute.xlu0 %5785 }
 0xd4c   : > { %v5784_v10 = vpop.permute.xlu1 %5783  ;;  %v5811_v7 = vsel %vm5803_vm12, %v5802_v36, %v5786_v20 }
 0xd4d   : > { %v5810_v19 = vsel %vm5803_vm12, %v5801_v26, %v5784_v10 }
 0xd4e   : > { %7797 = vmatprep.mubr.msk.f32.mxu1 %vm5821_vm13, %v5810_v19 }
 0xd4f   : > { %7798 = vmatmul.mubr.msk.f32.gmra.mrb[70].mxu1 %vm5821_vm13, %v5811_v7 }
 0xd50   : > { %7824 = vmatprep.mubr.msk.f32.mxu1 %vm781_vm6, %v9035_v51 }
 0xe13   : > { %v7790_v23 = vpop.f32.mrb[64].mxu1 }
 0xe14   : > { %v5955_v14 = vadd.f32 %v7790_v23, %v9221_v6  ;;  %v5915_v41 = vpop.f32.mrb[65].mxu1 }
 0xe15   : > { %v5954_v25 = vadd.f32 %v5915_v41, %v9237_v52 }
 0xe17   : > { %v7958_v18 = vpack.c.bf16 %v5955_v14, %v5954_v25  ;;  %v7793_v4 = vpop.f32.mrb[66].mxu1 }
 0xe18   : > { %v5957_v55 = vadd.f32 %v7793_v4, %v9231_v31  ;;  %v5925_v39 = vpop.f32.mrb[67].mxu1 }
 0xe19   : > { %v5956_v61 = vadd.f32 %v5925_v39, %v9242_v24  ;;  %7959 = vmatpush3.bf16.msra.mxu0 %v7958_v18 }
 0xe1a   : > { %7960 = vmatprep.subr.bf16.mxu0 %v8146_v13 }
 0xe1b   : > { %v7961_v15 = vpack.c.bf16 %v5957_v55, %v5956_v61  ;;  %v7796_v12 = vpop.f32.mrb[68].mxu1 }
 0xe1c   : > { %v5959_v30 = vadd.f32 %v7796_v12, %v9197_v9  ;;  %v5935_v60 = vpop.f32.mrb[69].mxu1 }
 0xe1d   : > { %v5958_v6 = vadd.f32 %v5935_v60, %v9200_v17  ;;  %7962 = vmatpush3.bf16.msra.mxu0 %v7961_v15 }
 0xe1e   : > { %7963 = vmatprep.subr.bf16.mxu0 %v8146_v13 }
 0xe1f   : > { %v7964_v52 = vpack.c.bf16 %v5959_v30, %v5958_v6 }
 0xe20   : > { %7809 = vmatmul.mubr.msk.f32.vlgmr.msra.gmra.mrb[62].mxu0 %vm628_vm3, %v9016_v43 }
 0xe21   : > { %7965 = vmatpush3.bf16.msra.mxu0 %v7964_v52  ;;  %7819 = vmatprep.mubr.msk.f32.mxu0 %vm8144_vm5, %v8143_v3 }
 0xe22   : > { %v7799_v31 = vpop.f32.mrb[70].mxu1  ;;  %7966 = vmatprep.subr.bf16.mxu0 %v8146_v13 }
 0xe23   : > { %v5961_v24 = vadd.f32 %v7799_v31, %v9217_v5  ;;  %v5945_v9 = vpop.f32.mrb[71].mxu1 }
 0xe24   : > { %v5960_v42 = vadd.f32 %v5945_v9, %v9224_v16 }
 0xe26   : > { %v7967_v17 = vpack.c.bf16 %v5961_v24, %v5960_v42 }
 0xe28   : > { %7968 = vmatpush3.bf16.msra.mxu0 %v7967_v17 }
 0xe2b   : > { %7820 = vmatmul.mubr.msk.f32.vlgmr.msra.gmra.mrb[64].mxu0 %vm628_vm3, %v9016_v43 }
 0xe2c   : > { %7832 = vmatprep.mubr.msk.f32.mxu0 %vm781_vm6, %v9035_v51 }
 0xef3   : > { %v6028_v49 = vpop.f32.mrb[62].mxu0 }
 0xef4   : > { %v7810_v38 = vpop.f32.mrb[63].mxu0  ;;  %7822 = vmatprep.subr.mxu1 %v6028_v49 }
 0xef5   : > { %7823 = vmatpush3.msra.mxu1 %v6028_v49 }
 0xef6   : > { %7825 = vmatmul.mubr.msk.f32.vlgmr.msra.gmra.mrb[72].mxu1 %vm781_vm6, %v9042_v27  ;;  %7969 = vmatprep.subr.bf16.mxu1 %v8146_v13 }
 0xef7   : > { %7827 = vmatprep.mubr.msk.f32.mxu1 %vm781_vm6, %v9047_v33 }
 0xefa   : > { %7828 = vmatmul.mubr.msk.f32.gmra.mrb[74].mxu1 %vm781_vm6, %v9056_v1 }
 0xefb   : > { %7846 = vmatprep.mubr.msk.f32.mxu1 %vm8144_vm5, %v8143_v3 }
 0xefe   : > { %v6098_v5 = vpop.f32.mrb[64].mxu0 }
 0xeff   : > { %7830 = vmatprep.subr.mxu0 %v6098_v5  ;;  %v7821_v16 = vpop.f32.mrb[65].mxu0 }
 0xf00   : > { %7831 = vmatpush3.msra.mxu0 %v6098_v5 }
 0xf01   : > { %7833 = vmatmul.mubr.msk.f32.vlgmr.msra.gmra.mrb[66].mxu0 %vm781_vm6, %v9042_v27  ;;  %7975 = vmatprep.subr.bf16.mxu0 %v8146_v13 }
 0xf02   : > { %7835 = vmatprep.mubr.msk.f32.mxu0 %vm781_vm6, %v9047_v33 }
 0xf05   : > { %7836 = vmatmul.mubr.msk.f32.gmra.mrb[68].mxu0 %vm781_vm6, %v9056_v1 }
 0xf06   : > { %7857 = vmatprep.mubr.msk.f32.mxu0 %vm8144_vm5, %v8143_v3 }
 0xfc9   : > { %v7826_v58 = vpop.f32.mrb[72].mxu1 }
 0xfca   : > { %v9426_v40 = vsub.f32 %v5955_v14, %v7826_v58  ;;  %v6168_v22 = vpop.f32.mrb[73].mxu1  ;;  %v8128_v14 = vld [vmem:[%s9581_s1] sm:$0xff] }
 0xfcb   : > { %v9428_v48 = vsub.f32 %v5954_v25, %v6168_v22 }
 0xfcc   : > { %v6281_v27 = vmul.f32 %v9426_v40, %v9426_v40 }
 0xfcd   : > { %v6280_v45 = vmul.f32 %v9428_v48, %v9428_v48  ;;  %v7829_v29 = vpop.f32.mrb[74].mxu1 }
 0xfce   : > { %v9434_v33 = vsub.f32 %v5957_v55, %v7829_v29  ;;  %v6178_v34 = vpop.f32.mrb[75].mxu1 }
 0xfcf   : > { %v9436_v1 = vsub.f32 %v5956_v61, %v6178_v34  ;;  %v7970_v44 = vpack.c.bf16 %v6281_v27, %v6280_v45 }
 0xfd0   : > { %v6283_v56 = vmul.f32 %v9434_v33, %v9434_v33 }
 0xfd1   : > { %v6282_v53 = vmul.f32 %v9436_v1, %v9436_v1  ;;  %7971 = vmatpush3.bf16.msra.mxu1 %v7970_v44 }
 0xfd2   : > { %7972 = vmatprep.subr.bf16.mxu1 %v8146_v13 }
 0xfd3   : > { %v7973_v0 = vpack.c.bf16 %v6283_v56, %v6282_v53 }
 0xfd4   : > { %v7834_v63 = vpop.f32.mrb[66].mxu0 }
 0xfd5   : > { %v9443_v35 = vsub.f32 %v5959_v30, %v7834_v63  ;;  %v6257_v37 = vpop.f32.mrb[67].mxu0  ;;  %7974 = vmatpush3.bf16.msra.mxu1 %v7973_v0  ;;  %v8129_v63 = vld [vmem:[%s9600_s17 + $0x8] sm:$0xff] }
 0xfd6   : > { %v9445_v50 = vsub.f32 %v5958_v6, %v6257_v37  ;;  %7981 = vmatprep.subr.bf16.mxu1 %v8146_v13  ;;  %v8130_v37 = vld [vmem:[%s9600_s17 + $0x10] sm:$0xff] }
 0xfd7   : > { %v6355_v62 = vmul.f32 %v9443_v35, %v9443_v35  ;;  %v6429_v2 = vmul.f32 %v9443_v35, %v9426_v40 }
 0xfd8   : > { %v6354_v46 = vmul.f32 %v9445_v50, %v9445_v50  ;;  %v6428_v21 = vmul.f32 %v9445_v50, %v9428_v48  ;;  %v7837_v54 = vpop.f32.mrb[68].mxu0  ;;  %7847 = vmatmul.mubr.msk.f32.vlgmr.msra.gmra.mrb[76].mxu1 %vm628_vm3, %v9016_v43 }
 0xfd9   : > { %v9458_v57 = vsub.f32 %v5961_v24, %v7837_v54  ;;  %v6267_v8 = vpop.f32.mrb[69].mxu0  ;;  %7868 = vmatprep.mubr.msk.f32.mxu1 %vm8144_vm5, %v8143_v3 }
 0xfda   : > { %v9462_v20 = vsub.f32 %v5960_v42, %v6267_v8  ;;  %v7976_v26 = vpack.c.bf16 %v6355_v62, %v6354_v46  ;;  %v7982_v10 = vpack.c.bf16 %v6429_v2, %v6428_v21  ;;  %v8131_v62 = vld [vmem:[%s9600_s17 + $0x18] sm:$0xff]  ;;  %v8132_v2 = vld [vmem:[%s9600_s17] sm:$0xff] }
 0xfdb   : > { %v6357_v36 = vmul.f32 %v9458_v57, %v9458_v57  ;;  %v6431_v19 = vmul.f32 %v9458_v57, %v9434_v33 }
 0xfdc   : > { %v6356_v7 = vmul.f32 %v9462_v20, %v9462_v20  ;;  %v6430_v43 = vmul.f32 %v9462_v20, %v9436_v1  ;;  %7977 = vmatpush3.bf16.msra.mxu0 %v7976_v26  ;;  %7983 = vmatpush3.bf16.msra.mxu1 %v7982_v10 }
 0xfdd   : > { %7978 = vmatprep.subr.bf16.mxu0 %v8146_v13  ;;  %7984 = vmatprep.subr.bf16.mxu1 %v8146_v13 }
 0xfde   : > { %v7979_v3 = vpack.c.bf16 %v6357_v36, %v6356_v7  ;;  %v7985_v23 = vpack.c.bf16 %v6431_v19, %v6430_v43 }
 0xfe0   : > { %7980 = vmatpush3.bf16.msra.mxu0 %v7979_v3  ;;  %7986 = vmatpush3.bf16.msra.mxu1 %v7985_v23 }
 0xfe3   : > { %7858 = vmatmul.mubr.msk.f32.vlgmr.msra.gmra.mrb[70].mxu0 %vm628_vm3, %v8128_v14  ;;  %7869 = vmatmul.mubr.msk.f32.vlgmr.msra.gmra.mrb[78].mxu1 %vm628_vm3, %v8128_v14 }
 0xfe4   : > { %7873 = vmatprep.mubr.msk.f32.mxu0 %vm781_vm6, %v9035_v51  ;;  %7881 = vmatprep.mubr.msk.f32.mxu1 %vm781_vm6, %v9035_v51 }
0x10ab   : > { %v6350_v41 = vpop.f32.mrb[76].mxu1 }
0x10ac   : > { %v7848_v13 = vpop.f32.mrb[77].mxu1  ;;  %v6351_v4 = vadd.f32 1e-05, %v6350_v41 }
0x10b6   : > { %v6424_v25 = vpop.f32.mrb[70].mxu0  ;;  %v6498_v18 = vpop.f32.mrb[78].mxu1 }
0x10b7   : > { %v6425_v55 = vadd.f32 1e-05, %v6424_v25  ;;  %v6503_v39 = vmul.f32 %v6498_v18, %v6498_v18  ;;  %v7859_v61 = vpop.f32.mrb[71].mxu0  ;;  %v7870_v15 = vpop.f32.mrb[79].mxu1  ;;  %v6531_v34 = vsub.f32 0.0, %v6498_v18 }
0x10b9   : > { %v6502_v12 = vmul.f32 %v6425_v55, %v6351_v4  ;;  %v6513_v30 = vadd.f32 %v6425_v55, %v6351_v4 }
0x10bb   : > { %v6504_v60 = vsub.f32 %v6502_v12, %v6503_v39 }
0x10bd   : > { %v6505_v6 = vmax.f32 %v6504_v60, 1e-20 }
0x10bf   : > { %8106 = vrsqrt.f32 %v6505_v6  ;;  %vm6508_vm14 = vcmp.eq.f32.partialorder %v6505_v6, inf  ;;  %v6511_v24 = vand.u32 2147483648, %v6505_v6  ;;  %vm6510_vm15 = vcmp.eq.f32.partialorder %v6505_v6, 0.0 }
0x10c9   : > { %v8107_v52 = vpop.eup %8106 }
0x10ca   : > { %v6507_v31 = vmul.f32 %v8107_v52, %v6505_v6 }
0x10cc   : > { %v6509_v9 = vsel %vm6508_vm14, %v6505_v6, %v6507_v31 }
0x10cd   : > { %v6512_v51 = vsel %vm6510_vm15, %v6511_v24, %v6509_v9 }
0x10ce   : > { %v6514_v42 = vmul.f32 2.0, %v6512_v51  ;;  %v6527_v17 = vadd.f32 %v6512_v51, %v6425_v55  ;;  %v6529_v49 = vadd.f32 %v6512_v51, %v6351_v4 }
0x10d0   : > { %v6515_v38 = vadd.f32 %v6514_v42, %v6513_v30 }
0x10d2   : > { %8108 = vrsqrt.f32 %v6515_v38  ;;  %vm6518_vm0 = vcmp.eq.f32.partialorder %v6515_v38, inf  ;;  %v6521_v58 = vand.u32 2147483648, %v6515_v38  ;;  %vm6520_vm1 = vcmp.eq.f32.partialorder %v6515_v38, 0.0 }
0x10dc   : > { %v8109_v5 = vpop.eup %8108 }
0x10dd   : > { %v6517_v16 = vmul.f32 %v8109_v5, %v6515_v38 }
0x10df   : > { %v6519_v22 = vsel %vm6518_vm0, %v6515_v38, %v6517_v16 }
0x10e0   : > { %v6522_v27 = vsel %vm6520_vm1, %v6521_v58, %v6519_v22 }
0x10e1   : > { %v6523_v45 = vmul.f32 %v6522_v27, %v6512_v51 }
0x10e3   : > { %v6524_v29 = vmax.f32 %v6523_v45, 1e-20 }
0x10e5   : > { %8110 = vrcp.f32 %v6524_v29 }
0x10ef   : > { %v8111_v44 = vpop.eup %8110 }
0x10f0   : > { %v6532_v56 = vmul.f32 %v8111_v44, %v6531_v34  ;;  %v6528_v53 = vmul.f32 %v8111_v44, %v6527_v17  ;;  %v6530_v0 = vmul.f32 %v8111_v44, %v6529_v49 }
0x10f2   : > { %7871 = vmatprep.subr.mxu0 %v6528_v53  ;;  %7879 = vmatprep.subr.mxu1 %v6530_v0 }
0x10f3   : > { %7872 = vmatpush3.msra.mxu0 %v6528_v53  ;;  %7880 = vmatpush3.msra.mxu1 %v6530_v0 }
0x10f4   : > { %7874 = vmatmul.mubr.msk.f32.vlgmr.msra.gmra.mrb[72].mxu0 %vm781_vm6, %v8129_v63  ;;  %7882 = vmatmul.mubr.msk.f32.vlgmr.msra.gmra.mrb[80].mxu1 %vm781_vm6, %v8129_v63 }
0x10f5   : > { %7887 = vmatprep.subr.mxu0 %v6532_v56  ;;  %7876 = vmatprep.mubr.msk.f32.mxu0 %vm781_vm6, %v8130_v37 }
0x10f6   : > { %7888 = vmatpush3.msra.mxu0 %v6532_v56  ;;  %7884 = vmatprep.mubr.msk.f32.mxu1 %vm781_vm6, %v8130_v37 }
0x10f8   : > { %7877 = vmatmul.mubr.msk.f32.gmra.mrb[74].mxu0 %vm781_vm6, %v8131_v62  ;;  %7885 = vmatmul.mubr.msk.f32.gmra.mrb[82].mxu1 %vm781_vm6, %v8131_v62 }
0x10f9   : > { %7889 = vmatprep.mubr.msk.f32.mxu0 %vm781_vm6, %v8132_v2 }
0x10fc   : > { %7890 = vmatmul.mubr.msk.f32.vlgmr.msra.gmra.mrb[76].mxu0 %vm781_vm6, %v8129_v63 }
0x10fd   : > { %7892 = vmatprep.mubr.msk.f32.mxu0 %vm781_vm6, %v8130_v37 }
0x1100   : > { %7893 = vmatmul.mubr.msk.f32.gmra.mrb[78].mxu0 %vm781_vm6, %v8131_v62 }
0x11c7   : > { %v7875_v46 = vpop.f32.mrb[72].mxu0  ;;  %v7883_v21 = vpop.f32.mrb[80].mxu1 }
0x11c8   : > { %v6599_v54 = vpop.f32.mrb[73].mxu0  ;;  %v6684_v8 = vpop.f32.mrb[81].mxu1  ;;  %v6789_v43 = vmul.f32 %v7875_v46, %v9426_v40  ;;  %v6801_v3 = vmul.f32 %v7883_v21, %v9443_v35 }
0x11c9   : > { %v6788_v13 = vmul.f32 %v6599_v54, %v9428_v48  ;;  %v6800_v25 = vmul.f32 %v6684_v8, %v9445_v50 }
0x11cb   : > { %v7878_v26 = vpop.f32.mrb[74].mxu0  ;;  %v7886_v10 = vpop.f32.mrb[82].mxu1 }
0x11cc   : > { %v6609_v36 = vpop.f32.mrb[75].mxu0  ;;  %v6694_v19 = vpop.f32.mrb[83].mxu1  ;;  %v6791_v55 = vmul.f32 %v7878_v26, %v9434_v33  ;;  %v6803_v39 = vmul.f32 %v7886_v10, %v9458_v57 }
0x11cd   : > { %v6790_v12 = vmul.f32 %v6609_v36, %v9436_v1 }
0x11cf   : > { %v7891_v7 = vpop.f32.mrb[76].mxu0 }
0x11d0   : > { %v6793_v23 = vmul.f32 %v7891_v7, %v9443_v35  ;;  %v6805_v14 = vmul.f32 %v7891_v7, %v9426_v40  ;;  %v6769_v41 = vpop.f32.mrb[77].mxu0  ;;  %v6802_v35 = vmul.f32 %v6694_v19, %v9462_v20 }
0x11d1   : > { %v6792_v18 = vmul.f32 %v6769_v41, %v9445_v50  ;;  %v6804_v4 = vmul.f32 %v6769_v41, %v9428_v48 }
0x11d2   : > { %v6797_v61 = vadd.f32 %v6793_v23, %v6789_v43  ;;  %v6809_v15 = vadd.f32 %v6805_v14, %v6801_v3 }
0x11d3   : > { %v6796_v40 = vadd.f32 %v6792_v18, %v6788_v13  ;;  %v6808_v30 = vadd.f32 %v6804_v4, %v6800_v25  ;;  %v7894_v60 = vpop.f32.mrb[78].mxu0 }
0x11d4   : > { %v6813_v6 = vmul.f32 %v6797_v61, %v9160_v11  ;;  %v6817_v52 = vmul.f32 %v6809_v15, %v9162_v47  ;;  %v6829_v50 = vmul.f32 %v6797_v61, %v9162_v47  ;;  %v6833_v48 = vmul.f32 %v6809_v15, %v9164_v28  ;;  %v6779_v31 = vpop.f32.mrb[79].mxu0 }
0x11d5   : > { %v6812_v24 = vmul.f32 %v6796_v40, %v9160_v11  ;;  %v6816_v9 = vmul.f32 %v6808_v30, %v9162_v47  ;;  %v6828_v51 = vmul.f32 %v6796_v40, %v9162_v47  ;;  %v6832_v42 = vmul.f32 %v6808_v30, %v9164_v28 }
0x11d6   : > { %v6821_v17 = vadd.f32 %v6817_v52, %v6813_v6  ;;  %v6837_v49 = vadd.f32 %v6833_v48, %v6829_v50  ;;  %v6795_v38 = vmul.f32 %v7894_v60, %v9458_v57  ;;  %v6807_v5 = vmul.f32 %v7894_v60, %v9434_v33 }
0x11d7   : > { %v6820_v16 = vadd.f32 %v6816_v9, %v6812_v24  ;;  %v6836_v58 = vadd.f32 %v6832_v42, %v6828_v51  ;;  %v6794_v22 = vmul.f32 %v6779_v31, %v9462_v20  ;;  %v6806_v27 = vmul.f32 %v6779_v31, %v9436_v1 }
0x11d8   : > { %v6825_v45 = vadd.f32 %v6821_v17, %v9202_v59  ;;  %v6841_v29 = vadd.f32 %v6837_v49, %v9166_v32  ;;  %v6799_v34 = vadd.f32 %v6795_v38, %v6791_v55  ;;  %v6811_v44 = vadd.f32 %v6807_v5, %v6803_v39 }
0x11d9   : > { %v6824_v56 = vadd.f32 %v6820_v16, %v9202_v59  ;;  %v6840_v53 = vadd.f32 %v6836_v58, %v9166_v32  ;;  %v6798_v0 = vadd.f32 %v6794_v22, %v6790_v12  ;;  %v6810_v57 = vadd.f32 %v6806_v27, %v6802_v35 }
0x11da   : > { %6845 = vst.msk [vmem:[%s9592_s12 + $0x8] sm:$0xff] %vm619_vm2, %v6825_v45  ;;  %6849 = vst.msk [vmem:[%s9592_s12 + $0x28] sm:$0xff] %vm619_vm2, %v6841_v29  ;;  %v6815_v33 = vmul.f32 %v6799_v34, %v9160_v11  ;;  %v6819_v1 = vmul.f32 %v6811_v44, %v9162_v47  ;;  %v6831_v20 = vmul.f32 %v6799_v34, %v9162_v47 }
0x11db   : > { %v6835_v63 = vmul.f32 %v6811_v44, %v9164_v28  ;;  %6844 = vst.msk [vmem:[%s9592_s12] sm:$0xff] %vm619_vm2, %v6824_v56  ;;  %6848 = vst.msk [vmem:[%s9592_s12 + $0x20] sm:$0xff] %vm619_vm2, %v6840_v53  ;;  %v6814_v37 = vmul.f32 %v6798_v0, %v9160_v11  ;;  %v6818_v62 = vmul.f32 %v6810_v57, %v9162_v47 }
0x11dc   : > { %v6830_v2 = vmul.f32 %v6798_v0, %v9162_v47  ;;  %v6834_v46 = vmul.f32 %v6810_v57, %v9164_v28  ;;  %v6823_v21 = vadd.f32 %v6819_v1, %v6815_v33 }
0x11dd   : > { %v6839_v54 = vadd.f32 %v6835_v63, %v6831_v20  ;;  %v6822_v8 = vadd.f32 %v6818_v62, %v6814_v37 }
0x11de   : > { %v6838_v26 = vadd.f32 %v6834_v46, %v6830_v2  ;;  %v6827_v10 = vadd.f32 %v6823_v21, %v9202_v59 }
0x11df   : > { %v6843_v36 = vadd.f32 %v6839_v54, %v9166_v32  ;;  %v6826_v19 = vadd.f32 %v6822_v8, %v9202_v59 }
0x11e0   : > { %v6842_v7 = vadd.f32 %v6838_v26, %v9166_v32  ;;  %6847 = vst.msk [vmem:[%s9592_s12 + $0x18] sm:$0xff] %vm619_vm2, %v6827_v10 }
0x11e1   : > { %6851 = vst.msk [vmem:[%s9592_s12 + $0x38] sm:$0xff] %vm619_vm2, %v6843_v36  ;;  %6846 = vst.msk [vmem:[%s9592_s12 + $0x10] sm:$0xff] %vm619_vm2, %v6826_v19 }
0x11e2   : > { %6850 = vst.msk [vmem:[%s9592_s12 + $0x30] sm:$0xff] %vm619_vm2, %v6842_v7 }
0x11e3 PF: > { %s9601_s27 = sld [smem:[#allocation2_spill]] }
0x11e9   : > { %s22_s21 = sadd.s32 1, %s9601_s27  }
0x11ea   : > { %p19_p5 = scmp.ge.s32.totalorder %s22_s21, 4  }
0x11ec   :  { %21 = sbr.rel (!%p19_p5) target bundleno = 3 (0x3), region = 116 }

</bundles_post_ra>
